<compile_context>
chip_gen: v5e
topology: v5e:2x2
jax: 0.10.0
libtpu: 0.0.40
codegen_flags: <defaults>
</compile_context>

<pallas_src>
import functools

import jax
import jax.numpy as jnp
from jax.experimental import pallas as pl
from jax.experimental.pallas import tpu as pltpu


def _round_up(x, m):
    return (x + m - 1) // m * m


# -----------------------------------------------------------------------------
# In-kernel helpers
# -----------------------------------------------------------------------------
def _layer_norm(x, g, b, eps=1e-5):
    # x: (N, D) f32, g/b: (1, D) f32 -- matches torch.nn.LayerNorm (biased variance).
    mu = jnp.mean(x, axis=-1, keepdims=True)
    xc = x - mu
    var = jnp.mean(xc * xc, axis=-1, keepdims=True)
    return xc * jax.lax.rsqrt(var + eps) * g + b


def _attention(q, k, v, ow, ob, allow, batch, seq, nhead):
    """Multi-head attention core (q/k/v already projected, (N, D) f32, N = B*S).

    Scores are batched over the batch axis with a single leading batch dim
    (einsum 'bqd,bkd->bqk'); heads are statically unrolled and each head's
    context is folded straight into its row-slice of the output projection.
    Returns (N, D) f32.
    """
    # TODO(synk): head_dim=16 (<128) forces sub-128-lane per-head slices; for real
    # models pick/pad head_dim >= 128 so these slices become lane-aligned.
    N, D = q.shape
    hd = D // nhead
    scale = jnp.float32(1.0 / (hd ** 0.5))
    neg = jnp.float32(-1e30)   # large finite negative: exp underflows to 0, never NaN

    q3 = (q * scale).astype(jnp.bfloat16).reshape(batch, seq, D)
    k3 = k.astype(jnp.bfloat16).reshape(batch, seq, D)
    v3 = v.astype(jnp.bfloat16).reshape(batch, seq, D)

    out = ob                                             # (1, D) f32, broadcasts
    for h in range(nhead):
        sl = slice(h * hd, (h + 1) * hd)
        s = jnp.einsum('bqd,bkd->bqk', q3[:, :, sl], k3[:, :, sl],
                       preferred_element_type=jnp.float32)            # (B, S, S)
        s = jnp.where(allow[None, :, :], s, neg)
        s = s - jnp.max(s, axis=-1, keepdims=True)
        p = jnp.exp(s)
        p = p * pl.reciprocal(jnp.sum(p, axis=-1, keepdims=True), approx=True)
        c = jnp.einsum('bqk,bkd->bqd', p.astype(jnp.bfloat16), v3[:, :, sl],
                       preferred_element_type=jnp.float32)            # (B, S, hd)
        out = out + jnp.dot(c.reshape(N, hd).astype(jnp.bfloat16), ow[sl, :],
                            preferred_element_type=jnp.float32)        # (N, D)
    return out


# -----------------------------------------------------------------------------
# Fused kernel: all decoder layers + vocab-projection epilogue
# -----------------------------------------------------------------------------
def fused_decoder_kernel(
        emb_ref,
        sa_qkv_w, sa_qkv_b, sa_ow, sa_ob,
        ca_q_w, ca_q_b, ca_kv_w, ca_kv_b, ca_ow, ca_ob,
        l1_w, l1_b, l2_w, l2_b,
        ln1_w, ln1_b, ln2_w, ln2_b, ln3_w, ln3_b,
        outw_ref, outb_ref,
        logits_ref,
        x_scr,
        *, nhead, batch, seq):
    """grid = (num_layers,).  The running activation persists in f32 VMEM scratch;
    weights are streamed per layer (double-buffered); memory/embeddings and the
    vocab projection weights are resident; logits are written only at the last step."""
    l = pl.program_id(0)
    N, D = x_scr.shape

    @pl.when(l == 0)
    def _():
        x_scr[...] = emb_ref[...].astype(jnp.float32)

    # Causal "allow" mask (== generate_square_subsequent_mask) from iota compares,
    # applied with jnp.where on the scores -- no additive (S,S) f32 mask material.
    rows = jax.lax.broadcasted_iota(jnp.int32, (seq, seq), 0)
    cols = jax.lax.broadcasted_iota(jnp.int32, (seq, seq), 1)
    allow = cols <= rows

    mem_bf = emb_ref[...]                  # (N, D) bf16, resident across layer steps
    x = x_scr[...]                         # (N, D) f32 running activation

    # ---- self-attention block (fused QKV matmul, post-norm) ----
    xb = x.astype(jnp.bfloat16)
    qkv = jnp.dot(xb, sa_qkv_w[0], preferred_element_type=jnp.float32) + sa_qkv_b[0]
    sa = _attention(qkv[:, :D], qkv[:, D:2 * D], qkv[:, 2 * D:],
                    sa_ow[0], sa_ob[0], allow, batch, seq, nhead)
    x = _layer_norm(x + sa, ln1_w[0], ln1_b[0])

    # ---- cross-attention block (memory == embeddings, causal memory_mask) ----
    xb = x.astype(jnp.bfloat16)
    q = jnp.dot(xb, ca_q_w[0], preferred_element_type=jnp.float32) + ca_q_b[0]
    kv = jnp.dot(mem_bf, ca_kv_w[0], preferred_element_type=jnp.float32) + ca_kv_b[0]
    ca = _attention(q, kv[:, :D], kv[:, D:],
                    ca_ow[0], ca_ob[0], allow, batch, seq, nhead)
    x = _layer_norm(x + ca, ln2_w[0], ln2_b[0])

    # ---- feed-forward block (ReLU); hidden cast to bf16 right after activation ----
    xb = x.astype(jnp.bfloat16)
    h = jnp.dot(xb, l1_w[0], preferred_element_type=jnp.float32) + l1_b[0]
    h = jnp.maximum(h, 0.0).astype(jnp.bfloat16)
    ff = jnp.dot(h, l2_w[0], preferred_element_type=jnp.float32) + l2_b[0]
    x = _layer_norm(x + ff, ln3_w[0], ln3_b[0])

    x_scr[...] = x

    # ---- vocab-projection epilogue fused under the last layer step ----
    @pl.when(l == pl.num_programs(0) - 1)
    def _():
        logits_ref[...] = (jnp.dot(x.astype(jnp.bfloat16), outw_ref[...],
                                   preferred_element_type=jnp.float32)
                           + outb_ref[...])


# -----------------------------------------------------------------------------
# Wrapper
# -----------------------------------------------------------------------------
_DEC_WEIGHT_NAMES = (
    "sa_qkv_w", "sa_qkv_b", "sa_ow", "sa_ob",
    "ca_q_w", "ca_q_b", "ca_kv_w", "ca_kv_b", "ca_ow", "ca_ob",
    "l1_w", "l1_b", "l2_w", "l2_b",
    "ln1_w", "ln1_b", "ln2_w", "ln2_b", "ln3_w", "ln3_b",
)


def run_fused_decoder(emb2d, dec, out_w_t, out_b, *, nhead, batch, seq):
    # TODO(synk): for large B*S / large D,F add a parallel grid axis over token tiles
    # and split the per-layer weight block into attn/FFN sub-steps to fit v7x's 64 MiB.
    N, D = emb2d.shape
    L = dec["sa_qkv_w"].shape[0]
    Vp = out_w_t.shape[1]

    def layer_spec(arr):
        trail = arr.shape[1:]
        return pl.BlockSpec((1,) + trail,
                            lambda l, n=len(trail): (l,) + (0,) * n)

    def resident_spec(arr):
        return pl.BlockSpec(arr.shape, lambda l, n=arr.ndim: (0,) * n)

    weight_args = [dec[n] for n in _DEC_WEIGHT_NAMES]
    in_specs = ([resident_spec(emb2d)]
                + [layer_spec(a) for a in weight_args]
                + [resident_spec(out_w_t), resident_spec(out_b)])

    # Explicit VMEM budget: double-buffered per-layer weight slice + resident blocks.
    per_layer = sum(a.size * a.dtype.itemsize // L for a in weight_args)
    resident = (emb2d.size * emb2d.dtype.itemsize
                + out_w_t.size * out_w_t.dtype.itemsize
                + out_b.size * out_b.dtype.itemsize
                + N * Vp * 4          # logits output block (f32)
                + N * D * 4)          # activation scratch (f32)
    vmem_bytes = int(min(100 << 20, max(8 << 20, 3 * (2 * per_layer + resident))))

    return pl.pallas_call(
        functools.partial(fused_decoder_kernel, nhead=nhead, batch=batch, seq=seq),
        grid=(L,),
        in_specs=in_specs,
        out_specs=pl.BlockSpec((N, Vp), lambda l: (0, 0)),
        out_shape=jax.ShapeDtypeStruct((N, Vp), jnp.float32),
        scratch_shapes=[pltpu.VMEM((N, D), jnp.float32)],
        compiler_params=pltpu.CompilerParams(
            dimension_semantics=("arbitrary",),
            vmem_limit_bytes=vmem_bytes),
    )(emb2d, *weight_args, out_w_t, out_b)


# -----------------------------------------------------------------------------
# Parameter construction + full forward
# -----------------------------------------------------------------------------
def init_params(key, vocab_size, d_model, nhead, num_layers, dim_ff, max_seq_len):
    D, F, L, V = d_model, dim_ff, num_layers, vocab_size
    Vp = _round_up(V, 128)                 # lane-pad the vocab for unmasked stores
    ks = iter(jax.random.split(key, 32))

    def w(shape, dtype=jnp.bfloat16, scale=0.02):
        # Init (and any transpose / QKV-fuse of ported torch f32 weights) in f32;
        # only the final cast is bf16.
        return (scale * jax.random.normal(next(ks), shape, jnp.float32)).astype(dtype)

    dec = {
        "sa_qkv_w": w((L, D, 3 * D)),                       # in_proj.weight.T (q|k|v)
        "sa_qkv_b": jnp.zeros((L, 1, 3 * D), jnp.float32),
        "sa_ow":    w((L, D, D)),                           # out_proj.weight.T
        "sa_ob":    jnp.zeros((L, 1, D), jnp.float32),
        "ca_q_w":   w((L, D, D)),
        "ca_q_b":   jnp.zeros((L, 1, D), jnp.float32),
        "ca_kv_w":  w((L, D, 2 * D)),                       # (k|v) fused
        "ca_kv_b":  jnp.zeros((L, 1, 2 * D), jnp.float32),
        "ca_ow":    w((L, D, D)),
        "ca_ob":    jnp.zeros((L, 1, D), jnp.float32),
        "l1_w":     w((L, D, F)),                           # linear1.weight.T
        "l1_b":     jnp.zeros((L, 1, F), jnp.float32),
        "l2_w":     w((L, F, D)),                           # linear2.weight.T
        "l2_b":     jnp.zeros((L, 1, D), jnp.float32),
        "ln1_w": jnp.ones((L, 1, D), jnp.float32),
        "ln1_b": jnp.zeros((L, 1, D), jnp.float32),
        "ln2_w": jnp.ones((L, 1, D), jnp.float32),
        "ln2_b": jnp.zeros((L, 1, D), jnp.float32),
        "ln3_w": jnp.ones((L, 1, D), jnp.float32),
        "ln3_b": jnp.zeros((L, 1, D), jnp.float32),
    }
    out_w = w((D, V), jnp.float32)
    out_w_t = jnp.zeros((D, Vp), jnp.float32).at[:, :V].set(out_w).astype(jnp.bfloat16)
    return {
        "token_emb": w((V, D), jnp.float32),
        "pos_emb":   w((max_seq_len, D), jnp.float32),
        "out_w_t":   out_w_t,                               # output_projection.weight.T, lane-padded
        "out_b":     jnp.zeros((1, Vp), jnp.float32),
        "dec": dec,
        "nhead": nhead,
        "vocab_size": V,
    }


def decoder_only_transformer_forward(params, tokens):
    """Equivalent of DecoderOnlyTransformer.forward (eval mode; dropout == identity)."""
    # TODO(synk): nn.Dropout is identity here (deterministic eval-mode forward).
    B, S = tokens.shape
    D = params["token_emb"].shape[1]
    V = params["vocab_size"]

    # Embedding gathers + positional add: plain-JAX glue outside the kernel.
    tok_emb = params["token_emb"][tokens]                    # (B, S, D) f32
    pos_emb = params["pos_emb"][:S]                          # (S, D) f32
    emb2d = (tok_emb + pos_emb[None, :, :]).astype(jnp.bfloat16).reshape(B * S, D)

    logits_pad = run_fused_decoder(emb2d, params["dec"], params["out_w_t"],
                                   params["out_b"], nhead=params["nhead"],
                                   batch=B, seq=S)           # (B*S, Vpad) f32
    return logits_pad[:, :V].reshape(B, S, V)


# -----------------------------------------------------------------------------
# Main
# -----------------------------------------------------------------------------
if __name__ == "__main__":
    vocab_size = 32
    d_model = 64
    nhead = 4
    num_layers = 2
    dim_feedforward = 256
    max_seq_len = 1024
    batch, seq_len = 2, 8

    key = jax.random.PRNGKey(0)
    pkey, tkey = jax.random.split(key)

    params = init_params(pkey, vocab_size, d_model, nhead, num_layers,
                         dim_feedforward, max_seq_len)
    tokens = jax.random.randint(tkey, (batch, seq_len), 0, vocab_size, dtype=jnp.int32)

    logits = decoder_only_transformer_forward(params, tokens)
    logits = jax.block_until_ready(logits)

    assert logits.shape == (batch, seq_len, vocab_size)
    assert bool(jnp.all(jnp.isfinite(logits)))
    print("KERNEL_OK")
</pallas_src>

<mosaic_0001>
module attributes {stable_mosaic.version = 11 : i64} {
  func.func @fused_decoder_kernel(%arg0: i32, %arg1: memref<16x64xbf16, #tpu.memory_space<vmem>>, %arg2: memref<1x64x192xbf16, #tpu.memory_space<vmem>>, %arg3: memref<1x1x192xf32, #tpu.memory_space<vmem>>, %arg4: memref<1x64x64xbf16, #tpu.memory_space<vmem>>, %arg5: memref<1x1x64xf32, #tpu.memory_space<vmem>>, %arg6: memref<1x64x64xbf16, #tpu.memory_space<vmem>>, %arg7: memref<1x1x64xf32, #tpu.memory_space<vmem>>, %arg8: memref<1x64x128xbf16, #tpu.memory_space<vmem>>, %arg9: memref<1x1x128xf32, #tpu.memory_space<vmem>>, %arg10: memref<1x64x64xbf16, #tpu.memory_space<vmem>>, %arg11: memref<1x1x64xf32, #tpu.memory_space<vmem>>, %arg12: memref<1x64x256xbf16, #tpu.memory_space<vmem>>, %arg13: memref<1x1x256xf32, #tpu.memory_space<vmem>>, %arg14: memref<1x256x64xbf16, #tpu.memory_space<vmem>>, %arg15: memref<1x1x64xf32, #tpu.memory_space<vmem>>, %arg16: memref<1x1x64xf32, #tpu.memory_space<vmem>>, %arg17: memref<1x1x64xf32, #tpu.memory_space<vmem>>, %arg18: memref<1x1x64xf32, #tpu.memory_space<vmem>>, %arg19: memref<1x1x64xf32, #tpu.memory_space<vmem>>, %arg20: memref<1x1x64xf32, #tpu.memory_space<vmem>>, %arg21: memref<1x1x64xf32, #tpu.memory_space<vmem>>, %arg22: memref<64x128xbf16, #tpu.memory_space<vmem>>, %arg23: memref<1x128xf32, #tpu.memory_space<vmem>>, %arg24: memref<16x128xf32, #tpu.memory_space<vmem>>, %arg25: memref<16x64xf32, #tpu.memory_space<vmem>>) attributes {dimension_semantics = [#tpu.dimension_semantics<arbitrary>], iteration_bounds = array<i64: 2>, scalar_prefetch = 0 : i64, scratch_operands = 1 : i64, tpu.core_type = #tpu.core_type<tc>, window_params = [{pipeline_mode = #tpu.pipeline_mode<synchronous>, transform_indices = @transform_0, window_bounds = array<i64: 16, 64>}, {transform_indices = @transform_1, window_bounds = array<i64: 1, 64, 192>}, {transform_indices = @transform_2, window_bounds = array<i64: 1, 1, 192>}, {transform_indices = @transform_3, window_bounds = array<i64: 1, 64, 64>}, {transform_indices = @transform_4, window_bounds = array<i64: 1, 1, 64>}, {transform_indices = @transform_5, window_bounds = array<i64: 1, 64, 64>}, {transform_indices = @transform_6, window_bounds = array<i64: 1, 1, 64>}, {transform_indices = @transform_7, window_bounds = array<i64: 1, 64, 128>}, {transform_indices = @transform_8, window_bounds = array<i64: 1, 1, 128>}, {transform_indices = @transform_9, window_bounds = array<i64: 1, 64, 64>}, {transform_indices = @transform_10, window_bounds = array<i64: 1, 1, 64>}, {transform_indices = @transform_11, window_bounds = array<i64: 1, 64, 256>}, {transform_indices = @transform_12, window_bounds = array<i64: 1, 1, 256>}, {transform_indices = @transform_13, window_bounds = array<i64: 1, 256, 64>}, {transform_indices = @transform_14, window_bounds = array<i64: 1, 1, 64>}, {transform_indices = @transform_15, window_bounds = array<i64: 1, 1, 64>}, {transform_indices = @transform_16, window_bounds = array<i64: 1, 1, 64>}, {transform_indices = @transform_17, window_bounds = array<i64: 1, 1, 64>}, {transform_indices = @transform_18, window_bounds = array<i64: 1, 1, 64>}, {transform_indices = @transform_19, window_bounds = array<i64: 1, 1, 64>}, {transform_indices = @transform_20, window_bounds = array<i64: 1, 1, 64>}, {pipeline_mode = #tpu.pipeline_mode<synchronous>, transform_indices = @transform_21, window_bounds = array<i64: 64, 128>}, {pipeline_mode = #tpu.pipeline_mode<synchronous>, transform_indices = @transform_22, window_bounds = array<i64: 1, 128>}, {pipeline_mode = #tpu.pipeline_mode<synchronous>, transform_indices = @transform_23, window_bounds = array<i64: 16, 128>}]} {
    %c0_i32 = arith.constant 0 : i32
    %0 = arith.cmpi eq, %arg0, %c0_i32 : i32
    %1 = arith.extui %0 : i1 to i32
    %c0_i32_0 = arith.constant 0 : i32
    %2 = arith.cmpi ne, %1, %c0_i32_0 : i32
    scf.if %2 {
      %c0_137 = arith.constant 0 : index
      %c0_138 = arith.constant 0 : index
      %367 = vector.load %arg1[%c0_137, %c0_138] : memref<16x64xbf16, #tpu.memory_space<vmem>>, vector<16x64xbf16>
      %368 = arith.extf %367 : vector<16x64xbf16> to vector<16x64xf32>
      %c0_139 = arith.constant 0 : index
      %c0_140 = arith.constant 0 : index
      %369 = vector.load %arg25[%c0_139, %c0_140] : memref<16x64xf32, #tpu.memory_space<vmem>>, vector<16x64xf32>
      tpu.vector_store %arg25[%c0_139, %c0_140], %368 {strides = array<i32>} : memref<16x64xf32, #tpu.memory_space<vmem>>, vector<16x64xf32>,
    } else {
    }
    %3 = tpu.iota {dimensions = array<i32: 0>} : vector<8x8xi32>
    %4 = tpu.iota {dimensions = array<i32: 1>} : vector<8x8xi32>
    %5 = arith.cmpi sle, %4, %3 : vector<8x8xi32>
    %c0 = arith.constant 0 : index
    %c0_1 = arith.constant 0 : index
    %6 = vector.load %arg1[%c0, %c0_1] : memref<16x64xbf16, #tpu.memory_space<vmem>>, vector<16x64xbf16>
    %c0_2 = arith.constant 0 : index
    %c0_3 = arith.constant 0 : index
    %7 = vector.load %arg25[%c0_2, %c0_3] : memref<16x64xf32, #tpu.memory_space<vmem>>, vector<16x64xf32>
    %8 = arith.truncf %7 : vector<16x64xf32> to vector<16x64xbf16>
    %c0_4 = arith.constant 0 : index
    %c0_5 = arith.constant 0 : index
    %c0_6 = arith.constant 0 : index
    %9 = vector.load %arg2[%c0_4, %c0_5, %c0_6] : memref<1x64x192xbf16, #tpu.memory_space<vmem>>, vector<1x64x192xbf16>
    %10 = vector.shape_cast %9 : vector<1x64x192xbf16> to vector<64x192xbf16>
    %cst = arith.constant dense<0.000000e+00> : vector<16x192xf32>
    %11 = tpu.matmul %8, %10, %cst {dimension_numbers = #tpu.dot_dimension_numbers<[1], [0], [0], [1], [0, 0, 1, 1], [], []>} : vector<16x64xbf16>, vector<64x192xbf16>, vector<16x192xf32> -> vector<16x192xf32>
    %c0_7 = arith.constant 0 : index
    %c0_8 = arith.constant 0 : index
    %c0_9 = arith.constant 0 : index
    %12 = vector.load %arg3[%c0_7, %c0_8, %c0_9] : memref<1x1x192xf32, #tpu.memory_space<vmem>>, vector<1x1x192xf32>
    %13 = vector.shape_cast %12 : vector<1x1x192xf32> to vector<1x192xf32>
    %14 = vector.broadcast %13 : vector<1x192xf32> to vector<16x192xf32>
    %15 = arith.addf %11, %14 : vector<16x192xf32>
    %16 = vector.extract_strided_slice %15 {offsets = [0, 0], sizes = [16, 64], strides = [1, 1]} : vector<16x192xf32> to vector<16x64xf32>
    %17 = vector.extract_strided_slice %15 {offsets = [0, 64], sizes = [16, 64], strides = [1, 1]} : vector<16x192xf32> to vector<16x64xf32>
    %18 = vector.extract_strided_slice %15 {offsets = [0, 128], sizes = [16, 64], strides = [1, 1]} : vector<16x192xf32> to vector<16x64xf32>
    %c0_10 = arith.constant 0 : index
    %c0_11 = arith.constant 0 : index
    %c0_12 = arith.constant 0 : index
    %19 = vector.load %arg4[%c0_10, %c0_11, %c0_12] : memref<1x64x64xbf16, #tpu.memory_space<vmem>>, vector<1x64x64xbf16>
    %20 = vector.shape_cast %19 : vector<1x64x64xbf16> to vector<64x64xbf16>
    %c0_13 = arith.constant 0 : index
    %c0_14 = arith.constant 0 : index
    %c0_15 = arith.constant 0 : index
    %21 = vector.load %arg5[%c0_13, %c0_14, %c0_15] : memref<1x1x64xf32, #tpu.memory_space<vmem>>, vector<1x1x64xf32>
    %22 = vector.shape_cast %21 : vector<1x1x64xf32> to vector<1x64xf32>
    %cst_16 = arith.constant 2.500000e-01 : f32
    %23 = vector.broadcast %cst_16 : f32 to vector<16x64xf32>
    %24 = arith.mulf %16, %23 : vector<16x64xf32>
    %25 = arith.truncf %24 : vector<16x64xf32> to vector<16x64xbf16>
    %26 = vector.shape_cast %25 : vector<16x64xbf16> to vector<2x8x64xbf16>
    %27 = arith.truncf %17 : vector<16x64xf32> to vector<16x64xbf16>
    %28 = vector.shape_cast %27 : vector<16x64xbf16> to vector<2x8x64xbf16>
    %29 = arith.truncf %18 : vector<16x64xf32> to vector<16x64xbf16>
    %30 = vector.shape_cast %29 : vector<16x64xbf16> to vector<2x8x64xbf16>
    %31 = vector.extract_strided_slice %26 {offsets = [0, 0, 0], sizes = [2, 8, 16], strides = [1, 1, 1]} : vector<2x8x64xbf16> to vector<2x8x16xbf16>
    %32 = vector.extract_strided_slice %28 {offsets = [0, 0, 0], sizes = [2, 8, 16], strides = [1, 1, 1]} : vector<2x8x64xbf16> to vector<2x8x16xbf16>
    "tpu.trace_start"() <{level = 10 : i32, message = "bqd,bkd->bqk"}> : () -> ()
    %cst_17 = arith.constant dense<0.000000e+00> : vector<2x8x8xf32>
    %33 = tpu.matmul %31, %32, %cst_17 {dimension_numbers = #tpu.dot_dimension_numbers<[2], [2], [1], [1], [0, 0, 0, 1, 1, 1], [0], [0]>} : vector<2x8x16xbf16>, vector<2x8x16xbf16>, vector<2x8x8xf32> -> vector<2x8x8xf32>
    "tpu.trace_stop"() : () -> ()
    %34 = vector.shape_cast %5 : vector<8x8xi1> to vector<1x8x8xi1>
    %cst_18 = arith.constant -1.000000e+30 : f32
    %35 = vector.shape_cast %34 : vector<1x8x8xi1> to vector<1x8x8xi1>
    %36 = vector.broadcast %35 : vector<1x8x8xi1> to vector<2x8x8xi1>
    %37 = vector.broadcast %cst_18 : f32 to vector<2x8x8xf32>
    %38 = arith.select %36, %33, %37 : vector<2x8x8xi1>, vector<2x8x8xf32>
    %cst_19 = arith.constant dense<0xFF800000> : vector<2x8xf32>
    %39 = vector.multi_reduction <maximumf>, %38, %cst_19 [2] : vector<2x8x8xf32> to vector<2x8xf32>
    %40 = vector.shape_cast %39 : vector<2x8xf32> to vector<2x8x1xf32>
    %41 = vector.broadcast %40 : vector<2x8x1xf32> to vector<2x8x8xf32>
    %42 = arith.subf %38, %41 : vector<2x8x8xf32>
    %43 = math.exp %42 : vector<2x8x8xf32>
    %cst_20 = arith.constant dense<0.000000e+00> : vector<2x8xf32>
    %44 = vector.multi_reduction <add>, %43, %cst_20 [2] : vector<2x8x8xf32> to vector<2x8xf32>
    %45 = vector.shape_cast %44 : vector<2x8xf32> to vector<2x8x1xf32>
    %46 = tpu.reciprocal %45 {approx = true} : vector<2x8x1xf32> -> vector<2x8x1xf32>
    %47 = vector.broadcast %46 : vector<2x8x1xf32> to vector<2x8x8xf32>
    %48 = arith.mulf %43, %47 : vector<2x8x8xf32>
    %49 = arith.truncf %48 : vector<2x8x8xf32> to vector<2x8x8xbf16>
    %50 = vector.extract_strided_slice %30 {offsets = [0, 0, 0], sizes = [2, 8, 16], strides = [1, 1, 1]} : vector<2x8x64xbf16> to vector<2x8x16xbf16>
    "tpu.trace_start"() <{level = 10 : i32, message = "bqk,bkd->bqd"}> : () -> ()
    %cst_21 = arith.constant dense<0.000000e+00> : vector<2x8x16xf32>
    %51 = tpu.matmul %49, %50, %cst_21 {dimension_numbers = #tpu.dot_dimension_numbers<[2], [1], [1], [2], [0, 0, 0, 1, 1, 2], [0], [0]>} : vector<2x8x8xbf16>, vector<2x8x16xbf16>, vector<2x8x16xf32> -> vector<2x8x16xf32>
    "tpu.trace_stop"() : () -> ()
    %52 = vector.shape_cast %51 : vector<2x8x16xf32> to vector<16x16xf32>
    %53 = arith.truncf %52 : vector<16x16xf32> to vector<16x16xbf16>
    %54 = vector.extract_strided_slice %20 {offsets = [0, 0], sizes = [16, 64], strides = [1, 1]} : vector<64x64xbf16> to vector<16x64xbf16>
    %cst_22 = arith.constant dense<0.000000e+00> : vector<16x64xf32>
    %55 = tpu.matmul %53, %54, %cst_22 {dimension_numbers = #tpu.dot_dimension_numbers<[1], [0], [0], [1], [0, 0, 1, 1], [], []>} : vector<16x16xbf16>, vector<16x64xbf16>, vector<16x64xf32> -> vector<16x64xf32>
    %56 = vector.broadcast %22 : vector<1x64xf32> to vector<16x64xf32>
    %57 = arith.addf %56, %55 : vector<16x64xf32>
    %58 = vector.extract_strided_slice %26 {offsets = [0, 0, 16], sizes = [2, 8, 16], strides = [1, 1, 1]} : vector<2x8x64xbf16> to vector<2x8x16xbf16>
    %59 = vector.extract_strided_slice %28 {offsets = [0, 0, 16], sizes = [2, 8, 16], strides = [1, 1, 1]} : vector<2x8x64xbf16> to vector<2x8x16xbf16>
    "tpu.trace_start"() <{level = 10 : i32, message = "bqd,bkd->bqk"}> : () -> ()
    %cst_23 = arith.constant dense<0.000000e+00> : vector<2x8x8xf32>
    %60 = tpu.matmul %58, %59, %cst_23 {dimension_numbers = #tpu.dot_dimension_numbers<[2], [2], [1], [1], [0, 0, 0, 1, 1, 1], [0], [0]>} : vector<2x8x16xbf16>, vector<2x8x16xbf16>, vector<2x8x8xf32> -> vector<2x8x8xf32>
    "tpu.trace_stop"() : () -> ()
    %61 = vector.shape_cast %5 : vector<8x8xi1> to vector<1x8x8xi1>
    %cst_24 = arith.constant -1.000000e+30 : f32
    %62 = vector.shape_cast %61 : vector<1x8x8xi1> to vector<1x8x8xi1>
    %63 = vector.broadcast %62 : vector<1x8x8xi1> to vector<2x8x8xi1>
    %64 = vector.broadcast %cst_24 : f32 to vector<2x8x8xf32>
    %65 = arith.select %63, %60, %64 : vector<2x8x8xi1>, vector<2x8x8xf32>
    %cst_25 = arith.constant dense<0xFF800000> : vector<2x8xf32>
    %66 = vector.multi_reduction <maximumf>, %65, %cst_25 [2] : vector<2x8x8xf32> to vector<2x8xf32>
    %67 = vector.shape_cast %66 : vector<2x8xf32> to vector<2x8x1xf32>
    %68 = vector.broadcast %67 : vector<2x8x1xf32> to vector<2x8x8xf32>
    %69 = arith.subf %65, %68 : vector<2x8x8xf32>
    %70 = math.exp %69 : vector<2x8x8xf32>
    %cst_26 = arith.constant dense<0.000000e+00> : vector<2x8xf32>
    %71 = vector.multi_reduction <add>, %70, %cst_26 [2] : vector<2x8x8xf32> to vector<2x8xf32>
    %72 = vector.shape_cast %71 : vector<2x8xf32> to vector<2x8x1xf32>
    %73 = tpu.reciprocal %72 {approx = true} : vector<2x8x1xf32> -> vector<2x8x1xf32>
    %74 = vector.broadcast %73 : vector<2x8x1xf32> to vector<2x8x8xf32>
    %75 = arith.mulf %70, %74 : vector<2x8x8xf32>
    %76 = arith.truncf %75 : vector<2x8x8xf32> to vector<2x8x8xbf16>
    %77 = vector.extract_strided_slice %30 {offsets = [0, 0, 16], sizes = [2, 8, 16], strides = [1, 1, 1]} : vector<2x8x64xbf16> to vector<2x8x16xbf16>
    "tpu.trace_start"() <{level = 10 : i32, message = "bqk,bkd->bqd"}> : () -> ()
    %cst_27 = arith.constant dense<0.000000e+00> : vector<2x8x16xf32>
    %78 = tpu.matmul %76, %77, %cst_27 {dimension_numbers = #tpu.dot_dimension_numbers<[2], [1], [1], [2], [0, 0, 0, 1, 1, 2], [0], [0]>} : vector<2x8x8xbf16>, vector<2x8x16xbf16>, vector<2x8x16xf32> -> vector<2x8x16xf32>
    "tpu.trace_stop"() : () -> ()
    %79 = vector.shape_cast %78 : vector<2x8x16xf32> to vector<16x16xf32>
    %80 = arith.truncf %79 : vector<16x16xf32> to vector<16x16xbf16>
    %81 = vector.extract_strided_slice %20 {offsets = [16, 0], sizes = [16, 64], strides = [1, 1]} : vector<64x64xbf16> to vector<16x64xbf16>
    %cst_28 = arith.constant dense<0.000000e+00> : vector<16x64xf32>
    %82 = tpu.matmul %80, %81, %cst_28 {dimension_numbers = #tpu.dot_dimension_numbers<[1], [0], [0], [1], [0, 0, 1, 1], [], []>} : vector<16x16xbf16>, vector<16x64xbf16>, vector<16x64xf32> -> vector<16x64xf32>
    %83 = arith.addf %57, %82 : vector<16x64xf32>
    %84 = vector.extract_strided_slice %26 {offsets = [0, 0, 32], sizes = [2, 8, 16], strides = [1, 1, 1]} : vector<2x8x64xbf16> to vector<2x8x16xbf16>
    %85 = vector.extract_strided_slice %28 {offsets = [0, 0, 32], sizes = [2, 8, 16], strides = [1, 1, 1]} : vector<2x8x64xbf16> to vector<2x8x16xbf16>
    "tpu.trace_start"() <{level = 10 : i32, message = "bqd,bkd->bqk"}> : () -> ()
    %cst_29 = arith.constant dense<0.000000e+00> : vector<2x8x8xf32>
    %86 = tpu.matmul %84, %85, %cst_29 {dimension_numbers = #tpu.dot_dimension_numbers<[2], [2], [1], [1], [0, 0, 0, 1, 1, 1], [0], [0]>} : vector<2x8x16xbf16>, vector<2x8x16xbf16>, vector<2x8x8xf32> -> vector<2x8x8xf32>
    "tpu.trace_stop"() : () -> ()
    %87 = vector.shape_cast %5 : vector<8x8xi1> to vector<1x8x8xi1>
    %cst_30 = arith.constant -1.000000e+30 : f32
    %88 = vector.shape_cast %87 : vector<1x8x8xi1> to vector<1x8x8xi1>
    %89 = vector.broadcast %88 : vector<1x8x8xi1> to vector<2x8x8xi1>
    %90 = vector.broadcast %cst_30 : f32 to vector<2x8x8xf32>
    %91 = arith.select %89, %86, %90 : vector<2x8x8xi1>, vector<2x8x8xf32>
    %cst_31 = arith.constant dense<0xFF800000> : vector<2x8xf32>
    %92 = vector.multi_reduction <maximumf>, %91, %cst_31 [2] : vector<2x8x8xf32> to vector<2x8xf32>
    %93 = vector.shape_cast %92 : vector<2x8xf32> to vector<2x8x1xf32>
    %94 = vector.broadcast %93 : vector<2x8x1xf32> to vector<2x8x8xf32>
    %95 = arith.subf %91, %94 : vector<2x8x8xf32>
    %96 = math.exp %95 : vector<2x8x8xf32>
    %cst_32 = arith.constant dense<0.000000e+00> : vector<2x8xf32>
    %97 = vector.multi_reduction <add>, %96, %cst_32 [2] : vector<2x8x8xf32> to vector<2x8xf32>
    %98 = vector.shape_cast %97 : vector<2x8xf32> to vector<2x8x1xf32>
    %99 = tpu.reciprocal %98 {approx = true} : vector<2x8x1xf32> -> vector<2x8x1xf32>
    %100 = vector.broadcast %99 : vector<2x8x1xf32> to vector<2x8x8xf32>
    %101 = arith.mulf %96, %100 : vector<2x8x8xf32>
    %102 = arith.truncf %101 : vector<2x8x8xf32> to vector<2x8x8xbf16>
    %103 = vector.extract_strided_slice %30 {offsets = [0, 0, 32], sizes = [2, 8, 16], strides = [1, 1, 1]} : vector<2x8x64xbf16> to vector<2x8x16xbf16>
    "tpu.trace_start"() <{level = 10 : i32, message = "bqk,bkd->bqd"}> : () -> ()
    %cst_33 = arith.constant dense<0.000000e+00> : vector<2x8x16xf32>
    %104 = tpu.matmul %102, %103, %cst_33 {dimension_numbers = #tpu.dot_dimension_numbers<[2], [1], [1], [2], [0, 0, 0, 1, 1, 2], [0], [0]>} : vector<2x8x8xbf16>, vector<2x8x16xbf16>, vector<2x8x16xf32> -> vector<2x8x16xf32>
    "tpu.trace_stop"() : () -> ()
    %105 = vector.shape_cast %104 : vector<2x8x16xf32> to vector<16x16xf32>
    %106 = arith.truncf %105 : vector<16x16xf32> to vector<16x16xbf16>
    %107 = vector.extract_strided_slice %20 {offsets = [32, 0], sizes = [16, 64], strides = [1, 1]} : vector<64x64xbf16> to vector<16x64xbf16>
    %cst_34 = arith.constant dense<0.000000e+00> : vector<16x64xf32>
    %108 = tpu.matmul %106, %107, %cst_34 {dimension_numbers = #tpu.dot_dimension_numbers<[1], [0], [0], [1], [0, 0, 1, 1], [], []>} : vector<16x16xbf16>, vector<16x64xbf16>, vector<16x64xf32> -> vector<16x64xf32>
    %109 = arith.addf %83, %108 : vector<16x64xf32>
    %110 = vector.extract_strided_slice %26 {offsets = [0, 0, 48], sizes = [2, 8, 16], strides = [1, 1, 1]} : vector<2x8x64xbf16> to vector<2x8x16xbf16>
    %111 = vector.extract_strided_slice %28 {offsets = [0, 0, 48], sizes = [2, 8, 16], strides = [1, 1, 1]} : vector<2x8x64xbf16> to vector<2x8x16xbf16>
    "tpu.trace_start"() <{level = 10 : i32, message = "bqd,bkd->bqk"}> : () -> ()
    %cst_35 = arith.constant dense<0.000000e+00> : vector<2x8x8xf32>
    %112 = tpu.matmul %110, %111, %cst_35 {dimension_numbers = #tpu.dot_dimension_numbers<[2], [2], [1], [1], [0, 0, 0, 1, 1, 1], [0], [0]>} : vector<2x8x16xbf16>, vector<2x8x16xbf16>, vector<2x8x8xf32> -> vector<2x8x8xf32>
    "tpu.trace_stop"() : () -> ()
    %113 = vector.shape_cast %5 : vector<8x8xi1> to vector<1x8x8xi1>
    %cst_36 = arith.constant -1.000000e+30 : f32
    %114 = vector.shape_cast %113 : vector<1x8x8xi1> to vector<1x8x8xi1>
    %115 = vector.broadcast %114 : vector<1x8x8xi1> to vector<2x8x8xi1>
    %116 = vector.broadcast %cst_36 : f32 to vector<2x8x8xf32>
    %117 = arith.select %115, %112, %116 : vector<2x8x8xi1>, vector<2x8x8xf32>
    %cst_37 = arith.constant dense<0xFF800000> : vector<2x8xf32>
    %118 = vector.multi_reduction <maximumf>, %117, %cst_37 [2] : vector<2x8x8xf32> to vector<2x8xf32>
    %119 = vector.shape_cast %118 : vector<2x8xf32> to vector<2x8x1xf32>
    %120 = vector.broadcast %119 : vector<2x8x1xf32> to vector<2x8x8xf32>
    %121 = arith.subf %117, %120 : vector<2x8x8xf32>
    %122 = math.exp %121 : vector<2x8x8xf32>
    %cst_38 = arith.constant dense<0.000000e+00> : vector<2x8xf32>
    %123 = vector.multi_reduction <add>, %122, %cst_38 [2] : vector<2x8x8xf32> to vector<2x8xf32>
    %124 = vector.shape_cast %123 : vector<2x8xf32> to vector<2x8x1xf32>
    %125 = tpu.reciprocal %124 {approx = true} : vector<2x8x1xf32> -> vector<2x8x1xf32>
    %126 = vector.broadcast %125 : vector<2x8x1xf32> to vector<2x8x8xf32>
    %127 = arith.mulf %122, %126 : vector<2x8x8xf32>
    %128 = arith.truncf %127 : vector<2x8x8xf32> to vector<2x8x8xbf16>
    %129 = vector.extract_strided_slice %30 {offsets = [0, 0, 48], sizes = [2, 8, 16], strides = [1, 1, 1]} : vector<2x8x64xbf16> to vector<2x8x16xbf16>
    "tpu.trace_start"() <{level = 10 : i32, message = "bqk,bkd->bqd"}> : () -> ()
    %cst_39 = arith.constant dense<0.000000e+00> : vector<2x8x16xf32>
    %130 = tpu.matmul %128, %129, %cst_39 {dimension_numbers = #tpu.dot_dimension_numbers<[2], [1], [1], [2], [0, 0, 0, 1, 1, 2], [0], [0]>} : vector<2x8x8xbf16>, vector<2x8x16xbf16>, vector<2x8x16xf32> -> vector<2x8x16xf32>
    "tpu.trace_stop"() : () -> ()
    %131 = vector.shape_cast %130 : vector<2x8x16xf32> to vector<16x16xf32>
    %132 = arith.truncf %131 : vector<16x16xf32> to vector<16x16xbf16>
    %133 = vector.extract_strided_slice %20 {offsets = [48, 0], sizes = [16, 64], strides = [1, 1]} : vector<64x64xbf16> to vector<16x64xbf16>
    %cst_40 = arith.constant dense<0.000000e+00> : vector<16x64xf32>
    %134 = tpu.matmul %132, %133, %cst_40 {dimension_numbers = #tpu.dot_dimension_numbers<[1], [0], [0], [1], [0, 0, 1, 1], [], []>} : vector<16x16xbf16>, vector<16x64xbf16>, vector<16x64xf32> -> vector<16x64xf32>
    %135 = arith.addf %109, %134 : vector<16x64xf32>
    %136 = arith.addf %7, %135 : vector<16x64xf32>
    %c0_41 = arith.constant 0 : index
    %c0_42 = arith.constant 0 : index
    %c0_43 = arith.constant 0 : index
    %137 = vector.load %arg16[%c0_41, %c0_42, %c0_43] : memref<1x1x64xf32, #tpu.memory_space<vmem>>, vector<1x1x64xf32>
    %138 = vector.shape_cast %137 : vector<1x1x64xf32> to vector<1x64xf32>
    %c0_44 = arith.constant 0 : index
    %c0_45 = arith.constant 0 : index
    %c0_46 = arith.constant 0 : index
    %139 = vector.load %arg17[%c0_44, %c0_45, %c0_46] : memref<1x1x64xf32, #tpu.memory_space<vmem>>, vector<1x1x64xf32>
    %140 = vector.shape_cast %139 : vector<1x1x64xf32> to vector<1x64xf32>
    %cst_47 = arith.constant dense<0.000000e+00> : vector<16xf32>
    %141 = vector.multi_reduction <add>, %136, %cst_47 [1] : vector<16x64xf32> to vector<16xf32>
    %142 = vector.shape_cast %141 : vector<16xf32> to vector<16x1xf32>
    %cst_48 = arith.constant 6.400000e+01 : f32
    %143 = vector.broadcast %cst_48 : f32 to vector<16x1xf32>
    %144 = arith.divf %142, %143 : vector<16x1xf32>
    %145 = vector.broadcast %144 : vector<16x1xf32> to vector<16x64xf32>
    %146 = arith.subf %136, %145 : vector<16x64xf32>
    %147 = arith.mulf %146, %146 : vector<16x64xf32>
    %cst_49 = arith.constant dense<0.000000e+00> : vector<16xf32>
    %148 = vector.multi_reduction <add>, %147, %cst_49 [1] : vector<16x64xf32> to vector<16xf32>
    %149 = vector.shape_cast %148 : vector<16xf32> to vector<16x1xf32>
    %cst_50 = arith.constant 6.400000e+01 : f32
    %150 = vector.broadcast %cst_50 : f32 to vector<16x1xf32>
    %151 = arith.divf %149, %150 : vector<16x1xf32>
    %cst_51 = arith.constant 9.99999974E-6 : f32
    %152 = vector.broadcast %cst_51 : f32 to vector<16x1xf32>
    %153 = arith.addf %151, %152 : vector<16x1xf32>
    %154 = math.rsqrt %153 : vector<16x1xf32>
    %155 = vector.broadcast %154 : vector<16x1xf32> to vector<16x64xf32>
    %156 = arith.mulf %146, %155 : vector<16x64xf32>
    %157 = vector.broadcast %138 : vector<1x64xf32> to vector<16x64xf32>
    %158 = arith.mulf %156, %157 : vector<16x64xf32>
    %159 = vector.broadcast %140 : vector<1x64xf32> to vector<16x64xf32>
    %160 = arith.addf %158, %159 : vector<16x64xf32>
    %161 = arith.truncf %160 : vector<16x64xf32> to vector<16x64xbf16>
    %c0_52 = arith.constant 0 : index
    %c0_53 = arith.constant 0 : index
    %c0_54 = arith.constant 0 : index
    %162 = vector.load %arg6[%c0_52, %c0_53, %c0_54] : memref<1x64x64xbf16, #tpu.memory_space<vmem>>, vector<1x64x64xbf16>
    %163 = vector.shape_cast %162 : vector<1x64x64xbf16> to vector<64x64xbf16>
    %cst_55 = arith.constant dense<0.000000e+00> : vector<16x64xf32>
    %164 = tpu.matmul %161, %163, %cst_55 {dimension_numbers = #tpu.dot_dimension_numbers<[1], [0], [0], [1], [0, 0, 1, 1], [], []>} : vector<16x64xbf16>, vector<64x64xbf16>, vector<16x64xf32> -> vector<16x64xf32>
    %c0_56 = arith.constant 0 : index
    %c0_57 = arith.constant 0 : index
    %c0_58 = arith.constant 0 : index
    %165 = vector.load %arg7[%c0_56, %c0_57, %c0_58] : memref<1x1x64xf32, #tpu.memory_space<vmem>>, vector<1x1x64xf32>
    %166 = vector.shape_cast %165 : vector<1x1x64xf32> to vector<1x64xf32>
    %167 = vector.broadcast %166 : vector<1x64xf32> to vector<16x64xf32>
    %168 = arith.addf %164, %167 : vector<16x64xf32>
    %c0_59 = arith.constant 0 : index
    %c0_60 = arith.constant 0 : index
    %c0_61 = arith.constant 0 : index
    %169 = vector.load %arg8[%c0_59, %c0_60, %c0_61] : memref<1x64x128xbf16, #tpu.memory_space<vmem>>, vector<1x64x128xbf16>
    %170 = vector.shape_cast %169 : vector<1x64x128xbf16> to vector<64x128xbf16>
    %cst_62 = arith.constant dense<0.000000e+00> : vector<16x128xf32>
    %171 = tpu.matmul %6, %170, %cst_62 {dimension_numbers = #tpu.dot_dimension_numbers<[1], [0], [0], [1], [0, 0, 1, 1], [], []>} : vector<16x64xbf16>, vector<64x128xbf16>, vector<16x128xf32> -> vector<16x128xf32>
    %c0_63 = arith.constant 0 : index
    %c0_64 = arith.constant 0 : index
    %c0_65 = arith.constant 0 : index
    %172 = vector.load %arg9[%c0_63, %c0_64, %c0_65] : memref<1x1x128xf32, #tpu.memory_space<vmem>>, vector<1x1x128xf32>
    %173 = vector.shape_cast %172 : vector<1x1x128xf32> to vector<1x128xf32>
    %174 = vector.broadcast %173 : vector<1x128xf32> to vector<16x128xf32>
    %175 = arith.addf %171, %174 : vector<16x128xf32>
    %176 = vector.extract_strided_slice %175 {offsets = [0, 0], sizes = [16, 64], strides = [1, 1]} : vector<16x128xf32> to vector<16x64xf32>
    %177 = vector.extract_strided_slice %175 {offsets = [0, 64], sizes = [16, 64], strides = [1, 1]} : vector<16x128xf32> to vector<16x64xf32>
    %c0_66 = arith.constant 0 : index
    %c0_67 = arith.constant 0 : index
    %c0_68 = arith.constant 0 : index
    %178 = vector.load %arg10[%c0_66, %c0_67, %c0_68] : memref<1x64x64xbf16, #tpu.memory_space<vmem>>, vector<1x64x64xbf16>
    %179 = vector.shape_cast %178 : vector<1x64x64xbf16> to vector<64x64xbf16>
    %c0_69 = arith.constant 0 : index
    %c0_70 = arith.constant 0 : index
    %c0_71 = arith.constant 0 : index
    %180 = vector.load %arg11[%c0_69, %c0_70, %c0_71] : memref<1x1x64xf32, #tpu.memory_space<vmem>>, vector<1x1x64xf32>
    %181 = vector.shape_cast %180 : vector<1x1x64xf32> to vector<1x64xf32>
    %cst_72 = arith.constant 2.500000e-01 : f32
    %182 = vector.broadcast %cst_72 : f32 to vector<16x64xf32>
    %183 = arith.mulf %168, %182 : vector<16x64xf32>
    %184 = arith.truncf %183 : vector<16x64xf32> to vector<16x64xbf16>
    %185 = vector.shape_cast %184 : vector<16x64xbf16> to vector<2x8x64xbf16>
    %186 = arith.truncf %176 : vector<16x64xf32> to vector<16x64xbf16>
    %187 = vector.shape_cast %186 : vector<16x64xbf16> to vector<2x8x64xbf16>
    %188 = arith.truncf %177 : vector<16x64xf32> to vector<16x64xbf16>
    %189 = vector.shape_cast %188 : vector<16x64xbf16> to vector<2x8x64xbf16>
    %190 = vector.extract_strided_slice %185 {offsets = [0, 0, 0], sizes = [2, 8, 16], strides = [1, 1, 1]} : vector<2x8x64xbf16> to vector<2x8x16xbf16>
    %191 = vector.extract_strided_slice %187 {offsets = [0, 0, 0], sizes = [2, 8, 16], strides = [1, 1, 1]} : vector<2x8x64xbf16> to vector<2x8x16xbf16>
    "tpu.trace_start"() <{level = 10 : i32, message = "bqd,bkd->bqk"}> : () -> ()
    %cst_73 = arith.constant dense<0.000000e+00> : vector<2x8x8xf32>
    %192 = tpu.matmul %190, %191, %cst_73 {dimension_numbers = #tpu.dot_dimension_numbers<[2], [2], [1], [1], [0, 0, 0, 1, 1, 1], [0], [0]>} : vector<2x8x16xbf16>, vector<2x8x16xbf16>, vector<2x8x8xf32> -> vector<2x8x8xf32>
    "tpu.trace_stop"() : () -> ()
    %193 = vector.shape_cast %5 : vector<8x8xi1> to vector<1x8x8xi1>
    %cst_74 = arith.constant -1.000000e+30 : f32
    %194 = vector.shape_cast %193 : vector<1x8x8xi1> to vector<1x8x8xi1>
    %195 = vector.broadcast %194 : vector<1x8x8xi1> to vector<2x8x8xi1>
    %196 = vector.broadcast %cst_74 : f32 to vector<2x8x8xf32>
    %197 = arith.select %195, %192, %196 : vector<2x8x8xi1>, vector<2x8x8xf32>
    %cst_75 = arith.constant dense<0xFF800000> : vector<2x8xf32>
    %198 = vector.multi_reduction <maximumf>, %197, %cst_75 [2] : vector<2x8x8xf32> to vector<2x8xf32>
    %199 = vector.shape_cast %198 : vector<2x8xf32> to vector<2x8x1xf32>
    %200 = vector.broadcast %199 : vector<2x8x1xf32> to vector<2x8x8xf32>
    %201 = arith.subf %197, %200 : vector<2x8x8xf32>
    %202 = math.exp %201 : vector<2x8x8xf32>
    %cst_76 = arith.constant dense<0.000000e+00> : vector<2x8xf32>
    %203 = vector.multi_reduction <add>, %202, %cst_76 [2] : vector<2x8x8xf32> to vector<2x8xf32>
    %204 = vector.shape_cast %203 : vector<2x8xf32> to vector<2x8x1xf32>
    %205 = tpu.reciprocal %204 {approx = true} : vector<2x8x1xf32> -> vector<2x8x1xf32>
    %206 = vector.broadcast %205 : vector<2x8x1xf32> to vector<2x8x8xf32>
    %207 = arith.mulf %202, %206 : vector<2x8x8xf32>
    %208 = arith.truncf %207 : vector<2x8x8xf32> to vector<2x8x8xbf16>
    %209 = vector.extract_strided_slice %189 {offsets = [0, 0, 0], sizes = [2, 8, 16], strides = [1, 1, 1]} : vector<2x8x64xbf16> to vector<2x8x16xbf16>
    "tpu.trace_start"() <{level = 10 : i32, message = "bqk,bkd->bqd"}> : () -> ()
    %cst_77 = arith.constant dense<0.000000e+00> : vector<2x8x16xf32>
    %210 = tpu.matmul %208, %209, %cst_77 {dimension_numbers = #tpu.dot_dimension_numbers<[2], [1], [1], [2], [0, 0, 0, 1, 1, 2], [0], [0]>} : vector<2x8x8xbf16>, vector<2x8x16xbf16>, vector<2x8x16xf32> -> vector<2x8x16xf32>
    "tpu.trace_stop"() : () -> ()
    %211 = vector.shape_cast %210 : vector<2x8x16xf32> to vector<16x16xf32>
    %212 = arith.truncf %211 : vector<16x16xf32> to vector<16x16xbf16>
    %213 = vector.extract_strided_slice %179 {offsets = [0, 0], sizes = [16, 64], strides = [1, 1]} : vector<64x64xbf16> to vector<16x64xbf16>
    %cst_78 = arith.constant dense<0.000000e+00> : vector<16x64xf32>
    %214 = tpu.matmul %212, %213, %cst_78 {dimension_numbers = #tpu.dot_dimension_numbers<[1], [0], [0], [1], [0, 0, 1, 1], [], []>} : vector<16x16xbf16>, vector<16x64xbf16>, vector<16x64xf32> -> vector<16x64xf32>
    %215 = vector.broadcast %181 : vector<1x64xf32> to vector<16x64xf32>
    %216 = arith.addf %215, %214 : vector<16x64xf32>
    %217 = vector.extract_strided_slice %185 {offsets = [0, 0, 16], sizes = [2, 8, 16], strides = [1, 1, 1]} : vector<2x8x64xbf16> to vector<2x8x16xbf16>
    %218 = vector.extract_strided_slice %187 {offsets = [0, 0, 16], sizes = [2, 8, 16], strides = [1, 1, 1]} : vector<2x8x64xbf16> to vector<2x8x16xbf16>
    "tpu.trace_start"() <{level = 10 : i32, message = "bqd,bkd->bqk"}> : () -> ()
    %cst_79 = arith.constant dense<0.000000e+00> : vector<2x8x8xf32>
    %219 = tpu.matmul %217, %218, %cst_79 {dimension_numbers = #tpu.dot_dimension_numbers<[2], [2], [1], [1], [0, 0, 0, 1, 1, 1], [0], [0]>} : vector<2x8x16xbf16>, vector<2x8x16xbf16>, vector<2x8x8xf32> -> vector<2x8x8xf32>
    "tpu.trace_stop"() : () -> ()
    %220 = vector.shape_cast %5 : vector<8x8xi1> to vector<1x8x8xi1>
    %cst_80 = arith.constant -1.000000e+30 : f32
    %221 = vector.shape_cast %220 : vector<1x8x8xi1> to vector<1x8x8xi1>
    %222 = vector.broadcast %221 : vector<1x8x8xi1> to vector<2x8x8xi1>
    %223 = vector.broadcast %cst_80 : f32 to vector<2x8x8xf32>
    %224 = arith.select %222, %219, %223 : vector<2x8x8xi1>, vector<2x8x8xf32>
    %cst_81 = arith.constant dense<0xFF800000> : vector<2x8xf32>
    %225 = vector.multi_reduction <maximumf>, %224, %cst_81 [2] : vector<2x8x8xf32> to vector<2x8xf32>
    %226 = vector.shape_cast %225 : vector<2x8xf32> to vector<2x8x1xf32>
    %227 = vector.broadcast %226 : vector<2x8x1xf32> to vector<2x8x8xf32>
    %228 = arith.subf %224, %227 : vector<2x8x8xf32>
    %229 = math.exp %228 : vector<2x8x8xf32>
    %cst_82 = arith.constant dense<0.000000e+00> : vector<2x8xf32>
    %230 = vector.multi_reduction <add>, %229, %cst_82 [2] : vector<2x8x8xf32> to vector<2x8xf32>
    %231 = vector.shape_cast %230 : vector<2x8xf32> to vector<2x8x1xf32>
    %232 = tpu.reciprocal %231 {approx = true} : vector<2x8x1xf32> -> vector<2x8x1xf32>
    %233 = vector.broadcast %232 : vector<2x8x1xf32> to vector<2x8x8xf32>
    %234 = arith.mulf %229, %233 : vector<2x8x8xf32>
    %235 = arith.truncf %234 : vector<2x8x8xf32> to vector<2x8x8xbf16>
    %236 = vector.extract_strided_slice %189 {offsets = [0, 0, 16], sizes = [2, 8, 16], strides = [1, 1, 1]} : vector<2x8x64xbf16> to vector<2x8x16xbf16>
    "tpu.trace_start"() <{level = 10 : i32, message = "bqk,bkd->bqd"}> : () -> ()
    %cst_83 = arith.constant dense<0.000000e+00> : vector<2x8x16xf32>
    %237 = tpu.matmul %235, %236, %cst_83 {dimension_numbers = #tpu.dot_dimension_numbers<[2], [1], [1], [2], [0, 0, 0, 1, 1, 2], [0], [0]>} : vector<2x8x8xbf16>, vector<2x8x16xbf16>, vector<2x8x16xf32> -> vector<2x8x16xf32>
    "tpu.trace_stop"() : () -> ()
    %238 = vector.shape_cast %237 : vector<2x8x16xf32> to vector<16x16xf32>
    %239 = arith.truncf %238 : vector<16x16xf32> to vector<16x16xbf16>
    %240 = vector.extract_strided_slice %179 {offsets = [16, 0], sizes = [16, 64], strides = [1, 1]} : vector<64x64xbf16> to vector<16x64xbf16>
    %cst_84 = arith.constant dense<0.000000e+00> : vector<16x64xf32>
    %241 = tpu.matmul %239, %240, %cst_84 {dimension_numbers = #tpu.dot_dimension_numbers<[1], [0], [0], [1], [0, 0, 1, 1], [], []>} : vector<16x16xbf16>, vector<16x64xbf16>, vector<16x64xf32> -> vector<16x64xf32>
    %242 = arith.addf %216, %241 : vector<16x64xf32>
    %243 = vector.extract_strided_slice %185 {offsets = [0, 0, 32], sizes = [2, 8, 16], strides = [1, 1, 1]} : vector<2x8x64xbf16> to vector<2x8x16xbf16>
    %244 = vector.extract_strided_slice %187 {offsets = [0, 0, 32], sizes = [2, 8, 16], strides = [1, 1, 1]} : vector<2x8x64xbf16> to vector<2x8x16xbf16>
    "tpu.trace_start"() <{level = 10 : i32, message = "bqd,bkd->bqk"}> : () -> ()
    %cst_85 = arith.constant dense<0.000000e+00> : vector<2x8x8xf32>
    %245 = tpu.matmul %243, %244, %cst_85 {dimension_numbers = #tpu.dot_dimension_numbers<[2], [2], [1], [1], [0, 0, 0, 1, 1, 1], [0], [0]>} : vector<2x8x16xbf16>, vector<2x8x16xbf16>, vector<2x8x8xf32> -> vector<2x8x8xf32>
    "tpu.trace_stop"() : () -> ()
    %246 = vector.shape_cast %5 : vector<8x8xi1> to vector<1x8x8xi1>
    %cst_86 = arith.constant -1.000000e+30 : f32
    %247 = vector.shape_cast %246 : vector<1x8x8xi1> to vector<1x8x8xi1>
    %248 = vector.broadcast %247 : vector<1x8x8xi1> to vector<2x8x8xi1>
    %249 = vector.broadcast %cst_86 : f32 to vector<2x8x8xf32>
    %250 = arith.select %248, %245, %249 : vector<2x8x8xi1>, vector<2x8x8xf32>
    %cst_87 = arith.constant dense<0xFF800000> : vector<2x8xf32>
    %251 = vector.multi_reduction <maximumf>, %250, %cst_87 [2] : vector<2x8x8xf32> to vector<2x8xf32>
    %252 = vector.shape_cast %251 : vector<2x8xf32> to vector<2x8x1xf32>
    %253 = vector.broadcast %252 : vector<2x8x1xf32> to vector<2x8x8xf32>
    %254 = arith.subf %250, %253 : vector<2x8x8xf32>
    %255 = math.exp %254 : vector<2x8x8xf32>
    %cst_88 = arith.constant dense<0.000000e+00> : vector<2x8xf32>
    %256 = vector.multi_reduction <add>, %255, %cst_88 [2] : vector<2x8x8xf32> to vector<2x8xf32>
    %257 = vector.shape_cast %256 : vector<2x8xf32> to vector<2x8x1xf32>
    %258 = tpu.reciprocal %257 {approx = true} : vector<2x8x1xf32> -> vector<2x8x1xf32>
    %259 = vector.broadcast %258 : vector<2x8x1xf32> to vector<2x8x8xf32>
    %260 = arith.mulf %255, %259 : vector<2x8x8xf32>
    %261 = arith.truncf %260 : vector<2x8x8xf32> to vector<2x8x8xbf16>
    %262 = vector.extract_strided_slice %189 {offsets = [0, 0, 32], sizes = [2, 8, 16], strides = [1, 1, 1]} : vector<2x8x64xbf16> to vector<2x8x16xbf16>
    "tpu.trace_start"() <{level = 10 : i32, message = "bqk,bkd->bqd"}> : () -> ()
    %cst_89 = arith.constant dense<0.000000e+00> : vector<2x8x16xf32>
    %263 = tpu.matmul %261, %262, %cst_89 {dimension_numbers = #tpu.dot_dimension_numbers<[2], [1], [1], [2], [0, 0, 0, 1, 1, 2], [0], [0]>} : vector<2x8x8xbf16>, vector<2x8x16xbf16>, vector<2x8x16xf32> -> vector<2x8x16xf32>
    "tpu.trace_stop"() : () -> ()
    %264 = vector.shape_cast %263 : vector<2x8x16xf32> to vector<16x16xf32>
    %265 = arith.truncf %264 : vector<16x16xf32> to vector<16x16xbf16>
    %266 = vector.extract_strided_slice %179 {offsets = [32, 0], sizes = [16, 64], strides = [1, 1]} : vector<64x64xbf16> to vector<16x64xbf16>
    %cst_90 = arith.constant dense<0.000000e+00> : vector<16x64xf32>
    %267 = tpu.matmul %265, %266, %cst_90 {dimension_numbers = #tpu.dot_dimension_numbers<[1], [0], [0], [1], [0, 0, 1, 1], [], []>} : vector<16x16xbf16>, vector<16x64xbf16>, vector<16x64xf32> -> vector<16x64xf32>
    %268 = arith.addf %242, %267 : vector<16x64xf32>
    %269 = vector.extract_strided_slice %185 {offsets = [0, 0, 48], sizes = [2, 8, 16], strides = [1, 1, 1]} : vector<2x8x64xbf16> to vector<2x8x16xbf16>
    %270 = vector.extract_strided_slice %187 {offsets = [0, 0, 48], sizes = [2, 8, 16], strides = [1, 1, 1]} : vector<2x8x64xbf16> to vector<2x8x16xbf16>
    "tpu.trace_start"() <{level = 10 : i32, message = "bqd,bkd->bqk"}> : () -> ()
    %cst_91 = arith.constant dense<0.000000e+00> : vector<2x8x8xf32>
    %271 = tpu.matmul %269, %270, %cst_91 {dimension_numbers = #tpu.dot_dimension_numbers<[2], [2], [1], [1], [0, 0, 0, 1, 1, 1], [0], [0]>} : vector<2x8x16xbf16>, vector<2x8x16xbf16>, vector<2x8x8xf32> -> vector<2x8x8xf32>
    "tpu.trace_stop"() : () -> ()
    %272 = vector.shape_cast %5 : vector<8x8xi1> to vector<1x8x8xi1>
    %cst_92 = arith.constant -1.000000e+30 : f32
    %273 = vector.shape_cast %272 : vector<1x8x8xi1> to vector<1x8x8xi1>
    %274 = vector.broadcast %273 : vector<1x8x8xi1> to vector<2x8x8xi1>
    %275 = vector.broadcast %cst_92 : f32 to vector<2x8x8xf32>
    %276 = arith.select %274, %271, %275 : vector<2x8x8xi1>, vector<2x8x8xf32>
    %cst_93 = arith.constant dense<0xFF800000> : vector<2x8xf32>
    %277 = vector.multi_reduction <maximumf>, %276, %cst_93 [2] : vector<2x8x8xf32> to vector<2x8xf32>
    %278 = vector.shape_cast %277 : vector<2x8xf32> to vector<2x8x1xf32>
    %279 = vector.broadcast %278 : vector<2x8x1xf32> to vector<2x8x8xf32>
    %280 = arith.subf %276, %279 : vector<2x8x8xf32>
    %281 = math.exp %280 : vector<2x8x8xf32>
    %cst_94 = arith.constant dense<0.000000e+00> : vector<2x8xf32>
    %282 = vector.multi_reduction <add>, %281, %cst_94 [2] : vector<2x8x8xf32> to vector<2x8xf32>
    %283 = vector.shape_cast %282 : vector<2x8xf32> to vector<2x8x1xf32>
    %284 = tpu.reciprocal %283 {approx = true} : vector<2x8x1xf32> -> vector<2x8x1xf32>
    %285 = vector.broadcast %284 : vector<2x8x1xf32> to vector<2x8x8xf32>
    %286 = arith.mulf %281, %285 : vector<2x8x8xf32>
    %287 = arith.truncf %286 : vector<2x8x8xf32> to vector<2x8x8xbf16>
    %288 = vector.extract_strided_slice %189 {offsets = [0, 0, 48], sizes = [2, 8, 16], strides = [1, 1, 1]} : vector<2x8x64xbf16> to vector<2x8x16xbf16>
    "tpu.trace_start"() <{level = 10 : i32, message = "bqk,bkd->bqd"}> : () -> ()
    %cst_95 = arith.constant dense<0.000000e+00> : vector<2x8x16xf32>
    %289 = tpu.matmul %287, %288, %cst_95 {dimension_numbers = #tpu.dot_dimension_numbers<[2], [1], [1], [2], [0, 0, 0, 1, 1, 2], [0], [0]>} : vector<2x8x8xbf16>, vector<2x8x16xbf16>, vector<2x8x16xf32> -> vector<2x8x16xf32>
    "tpu.trace_stop"() : () -> ()
    %290 = vector.shape_cast %289 : vector<2x8x16xf32> to vector<16x16xf32>
    %291 = arith.truncf %290 : vector<16x16xf32> to vector<16x16xbf16>
    %292 = vector.extract_strided_slice %179 {offsets = [48, 0], sizes = [16, 64], strides = [1, 1]} : vector<64x64xbf16> to vector<16x64xbf16>
    %cst_96 = arith.constant dense<0.000000e+00> : vector<16x64xf32>
    %293 = tpu.matmul %291, %292, %cst_96 {dimension_numbers = #tpu.dot_dimension_numbers<[1], [0], [0], [1], [0, 0, 1, 1], [], []>} : vector<16x16xbf16>, vector<16x64xbf16>, vector<16x64xf32> -> vector<16x64xf32>
    %294 = arith.addf %268, %293 : vector<16x64xf32>
    %295 = arith.addf %160, %294 : vector<16x64xf32>
    %c0_97 = arith.constant 0 : index
    %c0_98 = arith.constant 0 : index
    %c0_99 = arith.constant 0 : index
    %296 = vector.load %arg18[%c0_97, %c0_98, %c0_99] : memref<1x1x64xf32, #tpu.memory_space<vmem>>, vector<1x1x64xf32>
    %297 = vector.shape_cast %296 : vector<1x1x64xf32> to vector<1x64xf32>
    %c0_100 = arith.constant 0 : index
    %c0_101 = arith.constant 0 : index
    %c0_102 = arith.constant 0 : index
    %298 = vector.load %arg19[%c0_100, %c0_101, %c0_102] : memref<1x1x64xf32, #tpu.memory_space<vmem>>, vector<1x1x64xf32>
    %299 = vector.shape_cast %298 : vector<1x1x64xf32> to vector<1x64xf32>
    %cst_103 = arith.constant dense<0.000000e+00> : vector<16xf32>
    %300 = vector.multi_reduction <add>, %295, %cst_103 [1] : vector<16x64xf32> to vector<16xf32>
    %301 = vector.shape_cast %300 : vector<16xf32> to vector<16x1xf32>
    %cst_104 = arith.constant 6.400000e+01 : f32
    %302 = vector.broadcast %cst_104 : f32 to vector<16x1xf32>
    %303 = arith.divf %301, %302 : vector<16x1xf32>
    %304 = vector.broadcast %303 : vector<16x1xf32> to vector<16x64xf32>
    %305 = arith.subf %295, %304 : vector<16x64xf32>
    %306 = arith.mulf %305, %305 : vector<16x64xf32>
    %cst_105 = arith.constant dense<0.000000e+00> : vector<16xf32>
    %307 = vector.multi_reduction <add>, %306, %cst_105 [1] : vector<16x64xf32> to vector<16xf32>
    %308 = vector.shape_cast %307 : vector<16xf32> to vector<16x1xf32>
    %cst_106 = arith.constant 6.400000e+01 : f32
    %309 = vector.broadcast %cst_106 : f32 to vector<16x1xf32>
    %310 = arith.divf %308, %309 : vector<16x1xf32>
    %cst_107 = arith.constant 9.99999974E-6 : f32
    %311 = vector.broadcast %cst_107 : f32 to vector<16x1xf32>
    %312 = arith.addf %310, %311 : vector<16x1xf32>
    %313 = math.rsqrt %312 : vector<16x1xf32>
    %314 = vector.broadcast %313 : vector<16x1xf32> to vector<16x64xf32>
    %315 = arith.mulf %305, %314 : vector<16x64xf32>
    %316 = vector.broadcast %297 : vector<1x64xf32> to vector<16x64xf32>
    %317 = arith.mulf %315, %316 : vector<16x64xf32>
    %318 = vector.broadcast %299 : vector<1x64xf32> to vector<16x64xf32>
    %319 = arith.addf %317, %318 : vector<16x64xf32>
    %320 = arith.truncf %319 : vector<16x64xf32> to vector<16x64xbf16>
    %c0_108 = arith.constant 0 : index
    %c0_109 = arith.constant 0 : index
    %c0_110 = arith.constant 0 : index
    %321 = vector.load %arg12[%c0_108, %c0_109, %c0_110] : memref<1x64x256xbf16, #tpu.memory_space<vmem>>, vector<1x64x256xbf16>
    %322 = vector.shape_cast %321 : vector<1x64x256xbf16> to vector<64x256xbf16>
    %cst_111 = arith.constant dense<0.000000e+00> : vector<16x256xf32>
    %323 = tpu.matmul %320, %322, %cst_111 {dimension_numbers = #tpu.dot_dimension_numbers<[1], [0], [0], [1], [0, 0, 1, 1], [], []>} : vector<16x64xbf16>, vector<64x256xbf16>, vector<16x256xf32> -> vector<16x256xf32>
    %c0_112 = arith.constant 0 : index
    %c0_113 = arith.constant 0 : index
    %c0_114 = arith.constant 0 : index
    %324 = vector.load %arg13[%c0_112, %c0_113, %c0_114] : memref<1x1x256xf32, #tpu.memory_space<vmem>>, vector<1x1x256xf32>
    %325 = vector.shape_cast %324 : vector<1x1x256xf32> to vector<1x256xf32>
    %326 = vector.broadcast %325 : vector<1x256xf32> to vector<16x256xf32>
    %327 = arith.addf %323, %326 : vector<16x256xf32>
    %cst_115 = arith.constant 0.000000e+00 : f32
    %328 = vector.broadcast %cst_115 : f32 to vector<16x256xf32>
    %329 = arith.maximumf %327, %328 : vector<16x256xf32>
    %330 = arith.truncf %329 : vector<16x256xf32> to vector<16x256xbf16>
    %c0_116 = arith.constant 0 : index
    %c0_117 = arith.constant 0 : index
    %c0_118 = arith.constant 0 : index
    %331 = vector.load %arg14[%c0_116, %c0_117, %c0_118] : memref<1x256x64xbf16, #tpu.memory_space<vmem>>, vector<1x256x64xbf16>
    %332 = vector.shape_cast %331 : vector<1x256x64xbf16> to vector<256x64xbf16>
    %cst_119 = arith.constant dense<0.000000e+00> : vector<16x64xf32>
    %333 = tpu.matmul %330, %332, %cst_119 {dimension_numbers = #tpu.dot_dimension_numbers<[1], [0], [0], [1], [0, 0, 1, 1], [], []>} : vector<16x256xbf16>, vector<256x64xbf16>, vector<16x64xf32> -> vector<16x64xf32>
    %c0_120 = arith.constant 0 : index
    %c0_121 = arith.constant 0 : index
    %c0_122 = arith.constant 0 : index
    %334 = vector.load %arg15[%c0_120, %c0_121, %c0_122] : memref<1x1x64xf32, #tpu.memory_space<vmem>>, vector<1x1x64xf32>
    %335 = vector.shape_cast %334 : vector<1x1x64xf32> to vector<1x64xf32>
    %336 = vector.broadcast %335 : vector<1x64xf32> to vector<16x64xf32>
    %337 = arith.addf %333, %336 : vector<16x64xf32>
    %338 = arith.addf %319, %337 : vector<16x64xf32>
    %c0_123 = arith.constant 0 : index
    %c0_124 = arith.constant 0 : index
    %c0_125 = arith.constant 0 : index
    %339 = vector.load %arg20[%c0_123, %c0_124, %c0_125] : memref<1x1x64xf32, #tpu.memory_space<vmem>>, vector<1x1x64xf32>
    %340 = vector.shape_cast %339 : vector<1x1x64xf32> to vector<1x64xf32>
    %c0_126 = arith.constant 0 : index
    %c0_127 = arith.constant 0 : index
    %c0_128 = arith.constant 0 : index
    %341 = vector.load %arg21[%c0_126, %c0_127, %c0_128] : memref<1x1x64xf32, #tpu.memory_space<vmem>>, vector<1x1x64xf32>
    %342 = vector.shape_cast %341 : vector<1x1x64xf32> to vector<1x64xf32>
    %cst_129 = arith.constant dense<0.000000e+00> : vector<16xf32>
    %343 = vector.multi_reduction <add>, %338, %cst_129 [1] : vector<16x64xf32> to vector<16xf32>
    %344 = vector.shape_cast %343 : vector<16xf32> to vector<16x1xf32>
    %cst_130 = arith.constant 6.400000e+01 : f32
    %345 = vector.broadcast %cst_130 : f32 to vector<16x1xf32>
    %346 = arith.divf %344, %345 : vector<16x1xf32>
    %347 = vector.broadcast %346 : vector<16x1xf32> to vector<16x64xf32>
    %348 = arith.subf %338, %347 : vector<16x64xf32>
    %349 = arith.mulf %348, %348 : vector<16x64xf32>
    %cst_131 = arith.constant dense<0.000000e+00> : vector<16xf32>
    %350 = vector.multi_reduction <add>, %349, %cst_131 [1] : vector<16x64xf32> to vector<16xf32>
    %351 = vector.shape_cast %350 : vector<16xf32> to vector<16x1xf32>
    %cst_132 = arith.constant 6.400000e+01 : f32
    %352 = vector.broadcast %cst_132 : f32 to vector<16x1xf32>
    %353 = arith.divf %351, %352 : vector<16x1xf32>
    %cst_133 = arith.constant 9.99999974E-6 : f32
    %354 = vector.broadcast %cst_133 : f32 to vector<16x1xf32>
    %355 = arith.addf %353, %354 : vector<16x1xf32>
    %356 = math.rsqrt %355 : vector<16x1xf32>
    %357 = vector.broadcast %356 : vector<16x1xf32> to vector<16x64xf32>
    %358 = arith.mulf %348, %357 : vector<16x64xf32>
    %359 = vector.broadcast %340 : vector<1x64xf32> to vector<16x64xf32>
    %360 = arith.mulf %358, %359 : vector<16x64xf32>
    %361 = vector.broadcast %342 : vector<1x64xf32> to vector<16x64xf32>
    %362 = arith.addf %360, %361 : vector<16x64xf32>
    %c0_134 = arith.constant 0 : index
    %c0_135 = arith.constant 0 : index
    %363 = vector.load %arg25[%c0_134, %c0_135] : memref<16x64xf32, #tpu.memory_space<vmem>>, vector<16x64xf32>
    tpu.vector_store %arg25[%c0_134, %c0_135], %362 {strides = array<i32>} : memref<16x64xf32, #tpu.memory_space<vmem>>, vector<16x64xf32>,
    %c1_i32 = arith.constant 1 : i32
    %364 = arith.cmpi eq, %arg0, %c1_i32 : i32
    %365 = arith.extui %364 : i1 to i32
    %c0_i32_136 = arith.constant 0 : i32
    %366 = arith.cmpi ne, %365, %c0_i32_136 : i32
    scf.if %366 {
      %367 = arith.truncf %362 : vector<16x64xf32> to vector<16x64xbf16>
      %c0_137 = arith.constant 0 : index
      %c0_138 = arith.constant 0 : index
      %368 = vector.load %arg22[%c0_137, %c0_138] : memref<64x128xbf16, #tpu.memory_space<vmem>>, vector<64x128xbf16>
      %cst_139 = arith.constant dense<0.000000e+00> : vector<16x128xf32>
      %369 = tpu.matmul %367, %368, %cst_139 {dimension_numbers = #tpu.dot_dimension_numbers<[1], [0], [0], [1], [0, 0, 1, 1], [], []>} : vector<16x64xbf16>, vector<64x128xbf16>, vector<16x128xf32> -> vector<16x128xf32>
      %c0_140 = arith.constant 0 : index
      %c0_141 = arith.constant 0 : index
      %370 = vector.load %arg23[%c0_140, %c0_141] : memref<1x128xf32, #tpu.memory_space<vmem>>, vector<1x128xf32>
      %371 = vector.broadcast %370 : vector<1x128xf32> to vector<16x128xf32>
      %372 = arith.addf %369, %371 : vector<16x128xf32>
      %c0_142 = arith.constant 0 : index
      %c0_143 = arith.constant 0 : index
      %373 = vector.load %arg24[%c0_142, %c0_143] : memref<16x128xf32, #tpu.memory_space<vmem>>, vector<16x128xf32>
      tpu.vector_store %arg24[%c0_142, %c0_143], %372 {strides = array<i32>} : memref<16x128xf32, #tpu.memory_space<vmem>>, vector<16x128xf32>,
    } else {
    }
    return
  }
  func.func @transform_0(%arg0: i32) -> (i32, i32) {
    %c0_i32 = arith.constant 0 : i32
    %c0_i32_0 = arith.constant 0 : i32
    %c0_i32_1 = arith.constant 0 : i32
    return %c0_i32, %c0_i32_0 : i32, i32
  }
  func.func @transform_1(%arg0: i32) -> (i32, i32, i32) {
    %c0_i32 = arith.constant 0 : i32
    %c0_i32_0 = arith.constant 0 : i32
    %c0_i32_1 = arith.constant 0 : i32
    return %arg0, %c0_i32, %c0_i32_0 : i32, i32, i32
  }
  func.func @transform_2(%arg0: i32) -> (i32, i32, i32) {
    %c0_i32 = arith.constant 0 : i32
    %c0_i32_0 = arith.constant 0 : i32
    %c0_i32_1 = arith.constant 0 : i32
    return %arg0, %c0_i32, %c0_i32_0 : i32, i32, i32
  }
  func.func @transform_3(%arg0: i32) -> (i32, i32, i32) {
    %c0_i32 = arith.constant 0 : i32
    %c0_i32_0 = arith.constant 0 : i32
    %c0_i32_1 = arith.constant 0 : i32
    return %arg0, %c0_i32, %c0_i32_0 : i32, i32, i32
  }
  func.func @transform_4(%arg0: i32) -> (i32, i32, i32) {
    %c0_i32 = arith.constant 0 : i32
    %c0_i32_0 = arith.constant 0 : i32
    %c0_i32_1 = arith.constant 0 : i32
    return %arg0, %c0_i32, %c0_i32_0 : i32, i32, i32
  }
  func.func @transform_5(%arg0: i32) -> (i32, i32, i32) {
    %c0_i32 = arith.constant 0 : i32
    %c0_i32_0 = arith.constant 0 : i32
    %c0_i32_1 = arith.constant 0 : i32
    return %arg0, %c0_i32, %c0_i32_0 : i32, i32, i32
  }
  func.func @transform_6(%arg0: i32) -> (i32, i32, i32) {
    %c0_i32 = arith.constant 0 : i32
    %c0_i32_0 = arith.constant 0 : i32
    %c0_i32_1 = arith.constant 0 : i32
    return %arg0, %c0_i32, %c0_i32_0 : i32, i32, i32
  }
  func.func @transform_7(%arg0: i32) -> (i32, i32, i32) {
    %c0_i32 = arith.constant 0 : i32
    %c0_i32_0 = arith.constant 0 : i32
    %c0_i32_1 = arith.constant 0 : i32
    return %arg0, %c0_i32, %c0_i32_0 : i32, i32, i32
  }
  func.func @transform_8(%arg0: i32) -> (i32, i32, i32) {
    %c0_i32 = arith.constant 0 : i32
    %c0_i32_0 = arith.constant 0 : i32
    %c0_i32_1 = arith.constant 0 : i32
    return %arg0, %c0_i32, %c0_i32_0 : i32, i32, i32
  }
  func.func @transform_9(%arg0: i32) -> (i32, i32, i32) {
    %c0_i32 = arith.constant 0 : i32
    %c0_i32_0 = arith.constant 0 : i32
    %c0_i32_1 = arith.constant 0 : i32
    return %arg0, %c0_i32, %c0_i32_0 : i32, i32, i32
  }
  func.func @transform_10(%arg0: i32) -> (i32, i32, i32) {
    %c0_i32 = arith.constant 0 : i32
    %c0_i32_0 = arith.constant 0 : i32
    %c0_i32_1 = arith.constant 0 : i32
    return %arg0, %c0_i32, %c0_i32_0 : i32, i32, i32
  }
  func.func @transform_11(%arg0: i32) -> (i32, i32, i32) {
    %c0_i32 = arith.constant 0 : i32
    %c0_i32_0 = arith.constant 0 : i32
    %c0_i32_1 = arith.constant 0 : i32
    return %arg0, %c0_i32, %c0_i32_0 : i32, i32, i32
  }
  func.func @transform_12(%arg0: i32) -> (i32, i32, i32) {
    %c0_i32 = arith.constant 0 : i32
    %c0_i32_0 = arith.constant 0 : i32
    %c0_i32_1 = arith.constant 0 : i32
    return %arg0, %c0_i32, %c0_i32_0 : i32, i32, i32
  }
  func.func @transform_13(%arg0: i32) -> (i32, i32, i32) {
    %c0_i32 = arith.constant 0 : i32
    %c0_i32_0 = arith.constant 0 : i32
    %c0_i32_1 = arith.constant 0 : i32
    return %arg0, %c0_i32, %c0_i32_0 : i32, i32, i32
  }
  func.func @transform_14(%arg0: i32) -> (i32, i32, i32) {
    %c0_i32 = arith.constant 0 : i32
    %c0_i32_0 = arith.constant 0 : i32
    %c0_i32_1 = arith.constant 0 : i32
    return %arg0, %c0_i32, %c0_i32_0 : i32, i32, i32
  }
  func.func @transform_15(%arg0: i32) -> (i32, i32, i32) {
    %c0_i32 = arith.constant 0 : i32
    %c0_i32_0 = arith.constant 0 : i32
    %c0_i32_1 = arith.constant 0 : i32
    return %arg0, %c0_i32, %c0_i32_0 : i32, i32, i32
  }
  func.func @transform_16(%arg0: i32) -> (i32, i32, i32) {
    %c0_i32 = arith.constant 0 : i32
    %c0_i32_0 = arith.constant 0 : i32
    %c0_i32_1 = arith.constant 0 : i32
    return %arg0, %c0_i32, %c0_i32_0 : i32, i32, i32
  }
  func.func @transform_17(%arg0: i32) -> (i32, i32, i32) {
    %c0_i32 = arith.constant 0 : i32
    %c0_i32_0 = arith.constant 0 : i32
    %c0_i32_1 = arith.constant 0 : i32
    return %arg0, %c0_i32, %c0_i32_0 : i32, i32, i32
  }
  func.func @transform_18(%arg0: i32) -> (i32, i32, i32) {
    %c0_i32 = arith.constant 0 : i32
    %c0_i32_0 = arith.constant 0 : i32
    %c0_i32_1 = arith.constant 0 : i32
    return %arg0, %c0_i32, %c0_i32_0 : i32, i32, i32
  }
  func.func @transform_19(%arg0: i32) -> (i32, i32, i32) {
    %c0_i32 = arith.constant 0 : i32
    %c0_i32_0 = arith.constant 0 : i32
    %c0_i32_1 = arith.constant 0 : i32
    return %arg0, %c0_i32, %c0_i32_0 : i32, i32, i32
  }
  func.func @transform_20(%arg0: i32) -> (i32, i32, i32) {
    %c0_i32 = arith.constant 0 : i32
    %c0_i32_0 = arith.constant 0 : i32
    %c0_i32_1 = arith.constant 0 : i32
    return %arg0, %c0_i32, %c0_i32_0 : i32, i32, i32
  }
  func.func @transform_21(%arg0: i32) -> (i32, i32) {
    %c0_i32 = arith.constant 0 : i32
    %c0_i32_0 = arith.constant 0 : i32
    %c0_i32_1 = arith.constant 0 : i32
    return %c0_i32, %c0_i32_0 : i32, i32
  }
  func.func @transform_22(%arg0: i32) -> (i32, i32) {
    %c0_i32 = arith.constant 0 : i32
    %c0_i32_0 = arith.constant 0 : i32
    %c0_i32_1 = arith.constant 0 : i32
    return %c0_i32, %c0_i32_0 : i32, i32
  }
  func.func @transform_23(%arg0: i32) -> (i32, i32) {
    %c0_i32 = arith.constant 0 : i32
    %c0_i32_0 = arith.constant 0 : i32
    %c0_i32_1 = arith.constant 0 : i32
    return %c0_i32, %c0_i32_0 : i32, i32
  }
}

</mosaic_0001>

<bundles_post_ra>
// kernel: tpu_custom_call.1
= control target key start
LH: loop header
LB: loop body
LE: loop exit
PB: predicated region body
PF: predicated region fallthrough
CT: control target
= control target key end

     0   :  { %s5298_s0 = inlined_call_operand.hbm [shape: bf16[16,64], index: 0, kind: input, shape index: {}]   ;;  %s5299_s1 = inlined_call_operand.vmem [shape: bf16[2,64,192], index: 1, kind: input, shape index: {}]   ;;  %s5300_s2 = inlined_call_operand.hbm [shape: f32[2,1,192], index: 2, kind: input, shape index: {}]   ;;  %s5301_s3 = inlined_call_operand.vmem [shape: bf16[2,64,64], index: 3, kind: input, shape index: {}]   ;;  %s5302_s4 = inlined_call_operand.hbm [shape: f32[2,1,64], index: 4, kind: input, shape index: {}]   ;;  %s5303_s5 = inlined_call_operand.vmem [shape: bf16[2,64,64], index: 5, kind: input, shape index: {}]   ;;  %s5304_s6 = inlined_call_operand.hbm [shape: f32[2,1,64], index: 6, kind: input, shape index: {}]   ;;  %s5305_s7 = inlined_call_operand.hbm [shape: bf16[2,64,128], index: 7, kind: input, shape index: {}]   ;;  %s5306_s8 = inlined_call_operand.hbm [shape: f32[2,1,128], index: 8, kind: input, shape index: {}]   ;;  %s5307_s9 = inlined_call_operand.hbm [shape: bf16[2,64,64], index: 9, kind: input, shape index: {}]   ;;  %s5308_s10 = inlined_call_operand.vmem [shape: f32[2,1,64], index: 10, kind: input, shape index: {}]   ;;  %s5309_s11 = inlined_call_operand.vmem [shape: bf16[2,64,256], index: 11, kind: input, shape index: {}]   ;;  %s5310_s12 = inlined_call_operand.vmem [shape: f32[2,1,256], index: 12, kind: input, shape index: {}]   ;;  %s5311_s13 = inlined_call_operand.vmem [shape: bf16[2,256,64], index: 13, kind: input, shape index: {}]   ;;  %s5312_s14 = inlined_call_operand.vmem [shape: f32[2,1,64], index: 14, kind: input, shape index: {}]   ;;  %s5313_s15 = inlined_call_operand.vmem [shape: f32[2,1,64], index: 15, kind: input, shape index: {}]   ;;  %s5314_s16 = inlined_call_operand.vmem [shape: f32[2,1,64], index: 16, kind: input, shape index: {}]   ;;  %s5315_s17 = inlined_call_operand.vmem [shape: f32[2,1,64], index: 17, kind: input, shape index: {}]   ;;  %s5316_s18 = inlined_call_operand.hbm [shape: f32[2,1,64], index: 18, kind: input, shape index: {}]   ;;  %s5317_s19 = inlined_call_operand.hbm [shape: f32[2,1,64], index: 19, kind: input, shape index: {}]   ;;  %s5318_s20 = inlined_call_operand.vmem [shape: f32[2,1,64], index: 20, kind: input, shape index: {}]   ;;  %s5319_s21 = inlined_call_operand.hbm [shape: bf16[64,128], index: 21, kind: input, shape index: {}]   ;;  %s5320_s22 = inlined_call_operand.vmem [shape: f32[1,128], index: 22, kind: input, shape index: {}]   ;;  %s5321_s23 = inlined_call_operand.hbm [shape: f32[16,128], index: 23, kind: output, shape index: {}]  }
   0x1   :  { %5343 = sst [smem:[#allocation34_spill]] %s5298_s0 }
   0x2   :  { %5344 = sst [smem:[#allocation35_spill]] %s5299_s1 }
   0x3   :  { %5345 = sst [smem:[#allocation36_spill]] %s5300_s2 }
   0x4   :  { %5346 = sst [smem:[#allocation37_spill]] %s5301_s3 }
   0x5   :  { %5347 = sst [smem:[#allocation38_spill]] %s5302_s4 }
   0x6   :  { %5348 = sst [smem:[#allocation39_spill]] %s5303_s5 }
   0x7   :  { %5349 = sst [smem:[#allocation40_spill]] %s5304_s6 }
   0x8   :  { %5350 = sst [smem:[#allocation41_spill]] %s5305_s7 }
   0x9   :  { %5351 = sst [smem:[#allocation42_spill]] %s5306_s8 }
   0xa   :  { %5352 = sst [smem:[#allocation43_spill]] %s5307_s9 }
   0xb   :  { %5353 = sst [smem:[#allocation44_spill]] %s5308_s10 }
   0xc   :  { %5354 = sst [smem:[#allocation45_spill]] %s5309_s11 }
   0xd   :  { %5355 = sst [smem:[#allocation46_spill]] %s5310_s12 }
   0xe   :  { %5356 = sst [smem:[#allocation47_spill]] %s5311_s13 }
   0xf   :  { %5357 = sst [smem:[#allocation48_spill]] %s5312_s14 }
  0x10   :  { %5358 = sst [smem:[#allocation49_spill]] %s5313_s15 }
  0x11   :  { %5359 = sst [smem:[#allocation50_spill]] %s5314_s16 }
  0x12   :  { %5360 = sst [smem:[#allocation51_spill]] %s5315_s17 }
  0x13   :  { %5361 = sst [smem:[#allocation52_spill]] %s5316_s18 }
  0x14   :  { %5362 = sst [smem:[#allocation53_spill]] %s5317_s19 }
  0x15   :  { %5363 = sst [smem:[#allocation54_spill]] %s5318_s20 }
  0x16   :  { %5364 = sst [smem:[#allocation55_spill]] %s5319_s21 }
  0x17   :  { %5365 = sst [smem:[#allocation56_spill]] %s5320_s22 }
  0x18   :  { %5366 = sst [smem:[#allocation57_spill]] %s5321_s23 }
  0x19   :  { %28 = vsyncpa [#allocation4], 0 }
  0x1a   :  { %29 = vsyncpa [#allocation7], 0 }
  0x1b   :  { %31 = vsyncpa [#allocation7 + $0x1], 0 }
  0x1c   :  { %32 = vsyncpa [#allocation10], 0 }
  0x1d   :  { %34 = vsyncpa [#allocation10 + $0x1], 0 }
  0x1e   :  { %35 = vsyncpa [#allocation13], 0 }
  0x1f   :  { %37 = vsyncpa [#allocation13 + $0x1], 0 }
  0x20   :  { %38 = vsyncpa [#allocation16], 0 }
  0x21   :  { %40 = vsyncpa [#allocation16 + $0x1], 0 }
  0x22   :  { %41 = vsyncpa [#allocation19], 0 }
  0x23   :  { %42 = vsyncpa [#allocation5], 0  ;;  %s4514_s4 = smov 0   ;;  %s4516_s30 = smov 0  }
  0x24   :  { %s4518_s24 = smov 0   ;;  %s4520_s25 = smov 0  }
  0x25 LB: > { %5367 = sst [smem:[#allocation28_spill]] %s4369_s30  ;;  %s4535_s5 = sadd.s32 1, %s4377_s25   ;;  %s4377_s25 = sphi %s4520_s25, %s5423_s25   ;;  %s4373_s24 = sphi %s4518_s24, %s5426_s24   ;;  %s4369_s30 = sphi %s4516_s30, %s5425_s30   ;;  %s4365_s4 = sphi %s4514_s4, %s5424_s4  }
  0x26   : > { %5368 = sst [smem:[#allocation29_spill]] %s4373_s24  ;;  %s102_s1 = sadd.s32 1, %s4373_s24 }
  0x27   : > { %5369 = sst [smem:[#allocation30_spill]] %s4535_s5  ;;  %s99_s26 = ssub.s32 %s4377_s25, %s4535_s5 }
  0x28   : > { %p109_p0 = scmp.ne.s32.totalorder %s4373_s24, %s4369_s30  ;;  %p100_p1 = scmp.eq.s32.totalorder %s99_s26, 0 }
  0x29   : > { %p110_p2 = scmp.eq.s32.totalorder %s4377_s25, 0  ;;  %p3849_p3 = scmp.lt.s32.totalorder %s4377_s25, 2 }
  0x2a   : > { %s4545_s2 = scalar_select %p100_p1, %s4373_s24, %s102_s1  }
  0x2b   : > { %p111_p4 = por %p110_p2, %p109_p0  ;;  %s4548_s6 = sand.u32 1, %s4377_s25  }
  0x2c   : > { %5370 = sst [smem:[#allocation31_spill]] %s4545_s2  ;;  %s4551_s27 = sand.u32 1, %s4373_s24  }
  0x2d   : > { %s3433_s7 = sshll.u32 %s4551_s27, 1  ;;  %s3434_s28 = sshll.u32 %s4377_s25, 1 }
  0x2e   : > { %s5371_s0 = sld [smem:[#allocation36_spill]]  ;;  %s713_s26 = scalar_lea.vmem [#allocation6], %s3433_s7 }
  0x2f   : > { %s721_s22 = sshll.u32 %s713_s26, 4  ;;  %p4560_p5 = pnand %p3849_p3, %p111_p4  ;;  %s722_s22 = int_to_ptr.vmem [resolvable:$true] %s721_s22 }
  0x30   : > { %s5373_s20 = sld [smem:[#allocation40_spill]]  ;;  %s5330_s15 = scalar_lea.sflag [#allocation7], %s4548_s6 }
  0x31   : > { %p4573_p7 = pneg %p4560_p5 }
  0x34   : > { %s717_s5 = scalar_lea.hbm %s5371_s0, %s3434_s28  ;;  %s3998_s2 = scalar_lea.hbm %s5371_s0, 4 }
  0x35   : > { %s719_s23 = sshll.u32 %s717_s5, 4  ;;  %s720_s23 = int_to_ptr.hbm [resolvable:$true] %s719_s23 }
  0x36   : > { %s767_s17 = scalar_lea.hbm %s5373_s20, %s4377_s25  ;;  %s3991_s29 = sshra.s32 %s720_s23, 4  ;;  %s3992_s29 = int_to_ptr.hbm [resolvable:$true] %s3991_s29 }
  0x37   : > { %s4568_s16 = sshll.u32 %s767_s17, 4  ;;  %s3993_s5 = scalar_lea.hbm %s3992_s29, 2  ;;  %s770_s16 = int_to_ptr.hbm [resolvable:$true] %s4568_s16 }
  0x38   : > { %p3994_p6 = scmp.ne.s32.totalorder %s3992_s29, %s3993_s5  ;;  %p3999_p10 = scmp.lt.s32.totalorder %s3992_s29, %s5371_s0 }
  0x39   : > { %p4000_p11 = scmp.lt.s32.totalorder %s3998_s2, %s3993_s5 }
  0x3a   : > { %p3996_p8 = pnand %p4573_p7, %p3994_p6 }
  0x3b   : > { %p4001_p12 = por %p4000_p11, %p3999_p10 }
  0x3c   : > { %p3997_p9 = pneg %p3996_p8 }
  0x3e   : > { %p4002_p13 = pnand %p4001_p12, %p3997_p9 }
  0x40   : > { %4005 = shalt.err (!%p4002_p13)
}
  0x41   : > { %3825 = dma.hbm_to_vmem [thread:$0]  (!%p4560_p5), %s720_s23, 32, %s722_s22, %s5330_s15  }
  0x42   : > { %s764_s26 = scalar_lea.vmem [#allocation9], %s4551_s27  ;;  %s5331_s24 = scalar_lea.sflag [#allocation10], %s4548_s6 }
  0x43   : > { %s771_s28 = sshll.u32 %s764_s26, 4  ;;  %s4021_s17 = sshra.s32 %s770_s16, 4  ;;  %s772_s28 = int_to_ptr.vmem [resolvable:$true] %s771_s28  ;;  %s4022_s17 = int_to_ptr.hbm [resolvable:$true] %s4021_s17 }
  0x44   : > { %s4023_s29 = scalar_lea.hbm %s4022_s17, 1  ;;  %s4028_s3 = scalar_lea.hbm %s5373_s20, 2 }
  0x45   : > { %p4024_p0 = scmp.ne.s32.totalorder %s4022_s17, %s4023_s29  ;;  %p4029_p3 = scmp.lt.s32.totalorder %s4022_s17, %s5373_s20 }
  0x46   : > { %p4030_p4 = scmp.lt.s32.totalorder %s4028_s3, %s4023_s29 }
  0x47   : > { %p4026_p1 = pnand %p4024_p0, %p4573_p7 }
  0x48   : > { %p4031_p6 = por %p4030_p4, %p4029_p3 }
  0x49   : > { %p4027_p2 = pneg %p4026_p1 }
  0x4b   : > { %p4032_p8 = pnand %p4031_p6, %p4027_p2 }
  0x4d   : > { %4035 = shalt.err (!%p4032_p8)
}
  0x4e   : > { %3831 = dma.hbm_to_vmem [thread:$0]  (!%p4560_p5), %s770_s16, 16, %s772_s28, %s5331_s24  }
  0x4f   : > { %s5375_s8 = sld [smem:[#allocation42_spill]]  ;;  %s803_s14 = scalar_lea.vmem [#allocation12], %s4551_s27 }
  0x50   : > { %s810_s0 = sshll.u32 %s803_s14, 4  ;;  %s5333_s17 = scalar_lea.sflag [#allocation13], %s4548_s6  ;;  %s811_s0 = int_to_ptr.vmem [resolvable:$true] %s810_s0 }
  0x55   : > { %s806_s26 = scalar_lea.hbm %s5375_s8, %s4377_s25  ;;  %s4058_s16 = scalar_lea.hbm %s5375_s8, 2 }
  0x56   : > { %s808_s5 = sshll.u32 %s806_s26, 4  ;;  %s809_s5 = int_to_ptr.hbm [resolvable:$true] %s808_s5 }
  0x57   : > { %s4051_s29 = sshra.s32 %s809_s5, 4  ;;  %s4052_s29 = int_to_ptr.hbm [resolvable:$true] %s4051_s29 }
  0x58   : > { %s4053_s2 = scalar_lea.hbm %s4052_s29, 1  ;;  %p4059_p12 = scmp.lt.s32.totalorder %s4052_s29, %s5375_s8 }
  0x59   : > { %p4054_p9 = scmp.ne.s32.totalorder %s4052_s29, %s4053_s2  ;;  %p4060_p13 = scmp.lt.s32.totalorder %s4058_s16, %s4053_s2 }
  0x5b   : > { %p4056_p10 = pnand %p4054_p9, %p4573_p7  ;;  %p4061_p0 = por %p4060_p13, %p4059_p12 }
  0x5d   : > { %p4057_p11 = pneg %p4056_p10 }
  0x5f   : > { %p4062_p1 = pnand %p4061_p0, %p4057_p11 }
  0x61   : > { %4065 = shalt.err (!%p4062_p1)
}
  0x62   : > { %3837 = dma.hbm_to_vmem [thread:$0]  (!%p4560_p5), %s809_s5, 16, %s811_s0, %s5333_s17  }
  0x63   : > { %s5376_s18 = sld [smem:[#allocation52_spill]]  ;;  %s895_s14 = scalar_lea.vmem [#allocation15], %s4551_s27 }
  0x64   : > { %s902_s3 = sshll.u32 %s895_s14, 4  ;;  %s5332_s2 = scalar_lea.sflag [#allocation16], %s4548_s6  ;;  %s903_s3 = int_to_ptr.vmem [resolvable:$true] %s902_s3 }
  0x69   : > { %s898_s26 = scalar_lea.hbm %s5376_s18, %s4377_s25  ;;  %s4088_s5 = scalar_lea.hbm %s5376_s18, 2 }
  0x6a   : > { %s900_s29 = sshll.u32 %s898_s26, 4  ;;  %s901_s29 = int_to_ptr.hbm [resolvable:$true] %s900_s29 }
  0x6b   : > { %s4081_s16 = sshra.s32 %s901_s29, 4  ;;  %s4082_s16 = int_to_ptr.hbm [resolvable:$true] %s4081_s16 }
  0x6c   : > { %s4083_s28 = scalar_lea.hbm %s4082_s16, 1  ;;  %p4089_p6 = scmp.lt.s32.totalorder %s4082_s16, %s5376_s18 }
  0x6d   : > { %p4084_p2 = scmp.ne.s32.totalorder %s4082_s16, %s4083_s28  ;;  %p4090_p8 = scmp.lt.s32.totalorder %s4088_s5, %s4083_s28 }
  0x6f   : > { %p4086_p3 = pnand %p4084_p2, %p4573_p7  ;;  %p4091_p9 = por %p4090_p8, %p4089_p6 }
  0x71   : > { %p4087_p4 = pneg %p4086_p3 }
  0x73   : > { %p4092_p10 = pnand %p4091_p9, %p4087_p4 }
  0x75   : > { %4095 = shalt.err (!%p4092_p10)
}
  0x76   : > { %3843 = dma.hbm_to_vmem [thread:$0]  (!%p4560_p5), %s901_s29, 16, %s903_s3, %s5332_s2  }
  0x77   : > { %s4641_s24 = sadd.s32 4294967295, %s4377_s25   ;;  %p115_p11 = scmp.ne.s32.totalorder %s4369_s30, %s4365_s4 }
  0x78   : > { %p116_p12 = scmp.eq.s32.totalorder %s4641_s24, 0  ;;  %p3429_p13 = scmp.ge.s32.totalorder %s4377_s25, 1 }
  0x79   : > { %p657_p0 = scmp.lt.s32.totalorder %s4377_s25, 3  ;;  %p3430_p2 = scmp.ne.s32.totalorder %s4641_s24, 0 }
  0x7a   : > { %p4650_p1 = por %p116_p12, %p115_p11  ;;  %s5379_s29 = sld [smem:[#allocation34_spill]] }
  0x7b   : > { %p4655_p3 = pnand %p3429_p13, %p657_p0  ;;  %s4379_s4 = smov [#allocation3]  }
  0x7c   : > { %s670_s28 = sshll.u32 %s4379_s4, 4  ;;  %s5380_s21 = sld [smem:[#allocation55_spill]]  ;;  %s671_s28 = int_to_ptr.vmem [resolvable:$true] %s670_s28 }
  0x7d   : > { %p3815_p4 = pneg %p4655_p3  ;;  %s5335_s23 = smov 64  }
  0x7e   : > { %s5337_s2 = smov 4   ;;  %s4382_s14 = smov [#allocation18]  }
  0x7f   : > { %p3816_p6 = pnand %p3815_p4, %p116_p12  ;;  %s684_s3 = sshll.u32 %s4382_s14, 4  ;;  %s685_s3 = int_to_ptr.vmem [resolvable:$true] %s684_s3 }
  0x80   : > { %s668_s16 = sshll.u32 %s5379_s29, 4  ;;  %s5381_s17 = sld [smem:[#allocation38_spill]]  ;;  %s669_s16 = int_to_ptr.hbm [resolvable:$true] %s668_s16 }
  0x81   : > { %3818 = dma.hbm_to_vmem [thread:$0]  (!%p3816_p6), %s669_s16, 128, %s671_s28, [#allocation4], %s5335_s23, %s5335_s23, %s5337_s2  }
  0x82   : > { %s682_s0 = sshll.u32 %s5380_s21, 4  ;;  %s739_s5 = scalar_lea.vmem [#allocation8], %s4551_s27  ;;  %s683_s0 = int_to_ptr.hbm [resolvable:$true] %s682_s0 }
  0x83   : > { %3821 = dma.hbm_to_vmem [thread:$0]  (!%p3816_p6), %s683_s0, 512, %s685_s3, [#allocation19], %s5335_s23, %s5335_s23, %s5337_s2  }
  0x84   : > { %s746_s18 = sshll.u32 %s739_s5, 4  ;;  %s747_s18 = int_to_ptr.vmem [resolvable:$true] %s746_s18 }
  0x86   : > { %s742_s8 = scalar_lea.hbm %s5381_s17, %s4377_s25  ;;  %s4178_s14 = scalar_lea.hbm %s5381_s17, 2 }
  0x87   : > { %s744_s22 = sshll.u32 %s742_s8, 4  ;;  %s745_s22 = int_to_ptr.hbm [resolvable:$true] %s744_s22 }
  0x88   : > { %s4171_s20 = sshra.s32 %s745_s22, 4  ;;  %s4172_s20 = int_to_ptr.hbm [resolvable:$true] %s4171_s20 }
  0x89   : > { %s4173_s21 = scalar_lea.hbm %s4172_s20, 1  ;;  %p4179_p11 = scmp.lt.s32.totalorder %s4172_s20, %s5381_s17 }
  0x8a   : > { %p4174_p8 = scmp.ne.s32.totalorder %s4172_s20, %s4173_s21  ;;  %p4180_p13 = scmp.lt.s32.totalorder %s4178_s14, %s4173_s21 }
  0x8c   : > { %p4176_p9 = pnand %p4174_p8, %p4573_p7  ;;  %p4181_p0 = por %p4180_p13, %p4179_p11 }
  0x8e   : > { %p4177_p10 = pneg %p4176_p9 }
  0x90   : > { %p4182_p4 = pnand %p4181_p0, %p4177_p10 }
  0x92   : > { %4185 = shalt.err (!%p4182_p4)
}
  0x93   : > { %s5382_s8 = scalar_lea.sflag [#allocation7], %s4548_s6  ;;  %s3435_s0 = sshll.u32 %s4551_s27, 5 }
  0x94   : > { %3828 = dma.hbm_to_vmem [thread:$0]  (!%p4560_p5), %s745_s22, 16, %s747_s18, %s5382_s8  }
  0x95   : > { %s3723_s3 = sshll.u32 %s4377_s25, 5  ;;  %s5383_s28 = sld [smem:[#allocation41_spill]] }
  0x96   : > { %s782_s20 = scalar_lea.vmem [#allocation11], %s3435_s0 }
  0x97   : > { %s790_s21 = sshll.u32 %s782_s20, 4  ;;  %s791_s21 = int_to_ptr.vmem [resolvable:$true] %s790_s21 }
  0x9b   : > { %s787_s23 = scalar_lea.hbm %s5383_s28, %s3723_s3  ;;  %s4208_s22 = scalar_lea.hbm %s5383_s28, 64 }
  0x9c   : > { %s788_s29 = sshll.u32 %s787_s23, 4  ;;  %s789_s29 = int_to_ptr.hbm [resolvable:$true] %s788_s29 }
  0x9d   : > { %s4201_s14 = sshra.s32 %s789_s29, 4  ;;  %s4202_s14 = int_to_ptr.hbm [resolvable:$true] %s4201_s14 }
  0x9e   : > { %s4203_s4 = scalar_lea.hbm %s4202_s14, 32  ;;  %p4209_p10 = scmp.lt.s32.totalorder %s4202_s14, %s5383_s28 }
  0x9f   : > { %p4204_p6 = scmp.ne.s32.totalorder %s4202_s14, %s4203_s4  ;;  %p4210_p11 = scmp.lt.s32.totalorder %s4208_s22, %s4203_s4 }
  0xa1   : > { %p4206_p8 = pnand %p4204_p6, %p4573_p7  ;;  %p4211_p13 = por %p4210_p11, %p4209_p10 }
  0xa3   : > { %p4207_p9 = pneg %p4206_p8 }
  0xa5   : > { %p4212_p0 = pnand %p4211_p13, %p4207_p9 }
  0xa7   : > { %4215 = shalt.err (!%p4212_p0)
}
  0xa8   : > { %s5384_s23 = smov 4   ;;  %s5385_s5 = smov 64  }
  0xa9   : > { %s5386_s16 = scalar_lea.sflag [#allocation10], %s4548_s6  ;;  %s5387_s9 = sld [smem:[#allocation43_spill]] }
  0xaa   : > { %3834 = dma.hbm_to_vmem [thread:$0]  (!%p4560_p5), %s789_s29, 512, %s791_s21, %s5386_s16, %s5385_s5, %s5385_s5, %s5384_s23  }
  0xab   : > { %s821_s17 = scalar_lea.vmem [#allocation14], %s3435_s0 }
  0xac   : > { %s829_s14 = sshll.u32 %s821_s17, 4  ;;  %s830_s14 = int_to_ptr.vmem [resolvable:$true] %s829_s14 }
  0xaf   : > { %s826_s18 = scalar_lea.hbm %s5387_s9, %s3723_s3  ;;  %s4238_s29 = scalar_lea.hbm %s5387_s9, 64 }
  0xb0   : > { %s827_s13 = sshll.u32 %s826_s18, 4  ;;  %s828_s13 = int_to_ptr.hbm [resolvable:$true] %s827_s13 }
  0xb1   : > { %s4231_s4 = sshra.s32 %s828_s13, 4  ;;  %s4232_s4 = int_to_ptr.hbm [resolvable:$true] %s4231_s4 }
  0xb2   : > { %s4233_s22 = scalar_lea.hbm %s4232_s4, 32  ;;  %p4239_p9 = scmp.lt.s32.totalorder %s4232_s4, %s5387_s9 }
  0xb3   : > { %p4234_p4 = scmp.ne.s32.totalorder %s4232_s4, %s4233_s22  ;;  %p4240_p10 = scmp.lt.s32.totalorder %s4238_s29, %s4233_s22 }
  0xb5   : > { %p4236_p6 = pnand %p4234_p4, %p4573_p7  ;;  %p4241_p11 = por %p4240_p10, %p4239_p9 }
  0xb7   : > { %p4237_p8 = pneg %p4236_p6 }
  0xb9   : > { %p4242_p13 = pnand %p4241_p11, %p4237_p8 }
  0xbb   : > { %4245 = shalt.err (!%p4242_p13)
}
  0xbc   : > { %s5388_s0 = scalar_lea.sflag [#allocation13], %s4548_s6  ;;  %s5389_s19 = sld [smem:[#allocation53_spill]] }
  0xbd   : > { %3840 = dma.hbm_to_vmem [thread:$0]  (!%p4560_p5), %s828_s13, 512, %s830_s14, %s5388_s0, %s5385_s5, %s5385_s5, %s5384_s23  }
  0xbe   : > { %s912_s18 = scalar_lea.vmem [#allocation17], %s4551_s27 }
  0xbf   : > { %s919_s17 = sshll.u32 %s912_s18, 4  ;;  %s920_s17 = int_to_ptr.vmem [resolvable:$true] %s919_s17 }
  0xc2   : > { %s915_s20 = scalar_lea.hbm %s5389_s19, %s4377_s25  ;;  %s4268_s13 = scalar_lea.hbm %s5389_s19, 2 }
  0xc3   : > { %s917_s2 = sshll.u32 %s915_s20, 4  ;;  %s918_s2 = int_to_ptr.hbm [resolvable:$true] %s917_s2 }
  0xc4   : > { %s4261_s4 = sshra.s32 %s918_s2, 4  ;;  %s4262_s4 = int_to_ptr.hbm [resolvable:$true] %s4261_s4 }
  0xc5   : > { %s4263_s22 = scalar_lea.hbm %s4262_s4, 1  ;;  %p4269_p8 = scmp.lt.s32.totalorder %s4262_s4, %s5389_s19 }
  0xc6   : > { %p4264_p0 = scmp.ne.s32.totalorder %s4262_s4, %s4263_s22  ;;  %p4270_p9 = scmp.lt.s32.totalorder %s4268_s13, %s4263_s22 }
  0xc8   : > { %p4266_p4 = pnand %p4264_p0, %p4573_p7  ;;  %p4271_p10 = por %p4270_p9, %p4269_p8 }
  0xca   : > { %p4267_p6 = pneg %p4266_p4 }
  0xcc   : > { %p4272_p11 = pnand %p4271_p10, %p4267_p6 }
  0xce   : > { %4275 = shalt.err (!%p4272_p11)
}
  0xcf   : > { %s5390_s25 = scalar_lea.sflag [#allocation16], %s4548_s6  ;;  %934 = sbr.rel (%p4655_p3) target bundleno = 5098 (0x13ea), region = 112 }
  0xd0   : > { %3846 = dma.hbm_to_vmem [thread:$0]  (!%p4560_p5), %s918_s2, 16, %s920_s17, %s5390_s25  }
  0xd4   : > { %4336 = dma.done.wait (%p116_p12), [#allocation4], 128  }
  0xd5   : > { %4338 = vsyncadd (%p116_p12), [#allocation4], 4294967168  ;;  %s941_s27 = sand.u32 1, %s4641_s24   ;;  %s4755_s7 = sand.u32 1, %s4369_s30  }
  0xd6   : > { %s3443_s1 = sshll.u32 %s4755_s7, 1  ;;  %s942_s14 = scalar_lea.sflag [#allocation7], %s941_s27 }
  0xd7   : > { %s4758_s6 = scalar_lea.vmem [#allocation6], %s3443_s1 }
  0xd8   : > { %4340 = dma.done.wait (%p4650_p1), %s942_s14, 48  }
  0xd9   : > { %4342 = vsyncadd (%p4650_p1), %s942_s14, 4294967248  ;;  %s961_s21 = scalar_lea.sflag [#allocation10], %s941_s27 }
  0xda   : > { %4344 = dma.done.wait (%p4650_p1), %s961_s21, 528  }
  0xdb   : > { %4346 = vsyncadd (%p4650_p1), %s961_s21, 4294966768  ;;  %s3444_s0 = sshll.u32 %s4755_s7, 5  ;;  %s980_s28 = scalar_lea.sflag [#allocation13], %s941_s27 }
  0xdc   : > { %s4771_s3 = scalar_lea.vmem [#allocation11], %s3444_s0 }
  0xdd   : > { %4348 = dma.done.wait (%p4650_p1), %s980_s28, 528  }
  0xde   : > { %4350 = vsyncadd (%p4650_p1), %s980_s28, 4294966768  ;;  %s4778_s2 = scalar_lea.vmem [#allocation14], %s3444_s0  ;;  %s999_s18 = scalar_lea.sflag [#allocation16], %s941_s27 }
  0xdf   : > { %4352 = dma.done.wait (%p4650_p1), %s999_s18, 32  }
  0xe0   : > { %4354 = vsyncadd (%p4650_p1), %s999_s18, 4294967264 }
  0xe1   : > { %4356 = dma.done.wait (%p116_p12), [#allocation19], 512  }
  0xe2   : > { %4358 = vsyncadd (%p116_p12), [#allocation19], 4294966784  ;;  %p1151_p5 = scmp.lt.s32.totalorder %s4641_s24, 1  ;;  %s5391_s23 = sld [smem:[#allocation35_spill]] }
  0xe3   : > { %s5392_s1 = sld [smem:[#allocation37_spill]] }
  0xe4   : > { %s4792_s22 = scalar_select %p1151_p5, %s4641_s24, 1 }
  0xe5   : > { %s5393_s28 = sld [smem:[#allocation39_spill]] }
  0xe6   : > { %s3725_s15 = sshll.u32 %s4792_s22, 6  ;;  %s3726_s8 = sshll.u32 %s4792_s22, 5 }
  0xe7   : > { %s5395_s11 = sld [smem:[#allocation45_spill]]  ;;  %s3455_s13 = sshll.u32 %s4792_s22, 1 }
  0xe8   : > { %s4799_s5 = scalar_lea.vmem %s5391_s23, %s3725_s15  ;;  %s5397_s12 = sld [smem:[#allocation46_spill]] }
  0xe9   : > { %s4804_s14 = scalar_lea.vmem %s5392_s1, %s3726_s8  ;;  %s3729_s27 = sshll.u32 %s4792_s22, 7 }
  0xea   : > { %s5400_s4 = sld [smem:[#allocation48_spill]] }
  0xeb   : > { %s4809_s18 = scalar_lea.vmem %s5393_s28, %s3726_s8  ;;  %s5399_s8 = sld [smem:[#allocation47_spill]] }
  0xec   : > { %s5401_s20 = sld [smem:[#allocation49_spill]] }
  0xed   : > { %s4818_s29 = scalar_lea.vmem %s5395_s11, %s3725_s15 }
  0xee   : > { %5396 = sst [smem:[#allocation32_spill]] %s4818_s29  ;;  %s4824_s25 = scalar_lea.vmem %s5397_s12, %s3455_s13 }
  0xef   : > { %5398 = sst [smem:[#allocation33_spill]] %s4824_s25 }
  0xf0   : > { %s1185_s16 = scalar_lea.vmem %s5400_s4, %s4792_s22  ;;  %s5402_s29 = sld [smem:[#allocation50_spill]] }
  0xf1   : > { %s4830_s0 = scalar_lea.vmem %s5399_s8, %s3729_s27  ;;  %s5403_s12 = sld [smem:[#allocation51_spill]] }
  0xf2   : > { %s1188_s15 = scalar_lea.vmem %s5401_s20, %s4792_s22  ;;  %s5404_s27 = sld [smem:[#allocation54_spill]] }
  0xf4   : > { %1202 = sbr.rel (%p3430_p2) target bundleno = 254 (0xfe), region = 156 }
  0xf6   : > { %s1191_s9 = scalar_lea.vmem %s5402_s29, %s4792_s22 }
  0xf7   : > { %s1194_s25 = scalar_lea.vmem %s5403_s12, %s4792_s22 }
  0xf8   : > { %s1197_s21 = scalar_lea.vmem %s5404_s27, %s4792_s22 }
  0xf9   : > { %v3784_v0 = vld [vmem:[#allocation3] sm:$0xff]   ;;  %vm1207_vm0 = vcmask 523264  }
  0xfa   : > { %v3785_v1 = vunpack.c.l.bf16 %v3784_v0  ;;  %v3786_v2 = vunpack.c.h.bf16 %v3784_v0 }
  0xfc   : > { %1208 = vst.msk [vmem:[#allocation2] sm:$0xff] %vm1207_vm0, %v3785_v1 }
  0xfd   : > { %1209 = vst.msk [vmem:[#allocation2 + $0x8] sm:$0xff] %vm1207_vm0, %v3786_v2 }
  0xfe PF: > { %v3485_v3 = vld [vmem:[%s4799_s5 + $0x30] sm:$0xf]  ;;  %v3738_v4 = vld [vmem:[%s4799_s5 + $0x34] sm:$0xf0]  ;;  %v3477_v5 = vld [vmem:[%s4799_s5 + $0x20] sm:$0xf]  ;;  %v1210_v2 = vlaneseq }
  0xff   : > { %v3486_v6 = vor.u32 %v3738_v4, %v3485_v3  ;;  %v3736_v7 = vld [vmem:[%s4799_s5 + $0x24] sm:$0xf0]  ;;  %v3469_v9 = vld [vmem:[%s4799_s5 + $0x10] sm:$0xf]  ;;  %v3737_v10 = vld [vmem:[%s4799_s5 + $0x34] sm:$0xf] }
 0x100   : > { %v3478_v8 = vor.u32 %v3736_v7, %v3477_v5  ;;  %v3487_v11 = vld [vmem:[%s4799_s5 + $0x38] sm:$0xf0]  ;;  %v3734_v12 = vld [vmem:[%s4799_s5 + $0x14] sm:$0xf0]  ;;  %v3735_v14 = vld [vmem:[%s4799_s5 + $0x24] sm:$0xf] }
 0x101   : > { %1282 = vmatpush.bf16.msra.mxu0 %v3486_v6  ;;  %v3490_v13 = vor.u32 %v3737_v10, %v3487_v11  ;;  %v3479_v15 = vld [vmem:[%s4799_s5 + $0x28] sm:$0xf0]  ;;  %v3461_v16 = vld [vmem:[%s4799_s5] sm:$0xf]  ;;  %v3732_v17 = vld [vmem:[%s4799_s5 + $0x4] sm:$0xf0]  ;;  %v3470_v20 = vor.u32 %v3734_v12, %v3469_v9 }
 0x102   : > { %v3482_v18 = vor.u32 %v3735_v14, %v3479_v15  ;;  %v3733_v19 = vld [vmem:[%s4799_s5 + $0x14] sm:$0xf]  ;;  %v3471_v21 = vld [vmem:[%s4799_s5 + $0x18] sm:$0xf0]  ;;  %v3462_v24 = vor.u32 %v3732_v17, %v3461_v16  ;;  %v3731_v26 = vld [vmem:[%s4799_s5 + $0x4] sm:$0xf] }
 0x103   : > { %1296 = vmatpush.bf16.msra.mxu1 %v3490_v13  ;;  %v4868_v22 = vld [vmem:[#allocation2] sm:$0xff]  ;;  %v3474_v23 = vor.u32 %v3733_v19, %v3471_v21  ;;  %v3463_v27 = vld [vmem:[%s4799_s5 + $0x8] sm:$0xf0]  ;;  %vm1274_vm1 = vcmask 523264   ;;  %v1228_v30 = vld [vmem:[%s4758_s6] sm:$0x3] }
 0x104   : > { %v4870_v25 = vld [vmem:[#allocation2 + $0x8] sm:$0xff]  ;;  %v3466_v29 = vor.u32 %v3731_v26, %v3463_v27  ;;  %v1230_v31 = vperm.slane %v1228_v30, 0  ;;  %s4383_s10 = smov 64   ;;  %s4384_s11 = smov 48   ;;  %v1231_v47 = vperm.slane %v1228_v30, 1  ;;  %vm1328_vm2 = vcmask 130048  }
 0x105   : > { %1283 = vmatpush.bf16.msra.mxu0 %v3478_v8  ;;  %v1219_v28 = vpack.c.bf16 %v4870_v25, %v4868_v22  ;;  %s4385_s12 = smov 112   ;;  %s4386_s19 = smov 32   ;;  %vm1404_vm3 = vcmask 1043456   ;;  %v1211_v3 = vshrl.u32 %v1210_v2, 7  ;;  %v1213_v4 = vand.u32 127, %v1210_v2  ;;  %v3739_v27 = vld [vmem:[%s4804_s14] sm:$0xff] }
 0x106   : > { %s4387_s30 = smov 96   ;;  %vm1376_vm5 = vcmask 64512   ;;  %s4388_s6 = smov 16  }
 0x107   : > { %1297 = vmatpush.bf16.msra.mxu1 %v3482_v18  ;;  %vm4916_vm4 = vcmp.le.s32.totalorder %v1213_v4, %v1211_v3  ;;  %s4389_s5 = smov 80   ;;  %s5407_s29 = scalar_lea.vmem [#allocation8], %s4755_s7 }
 0x108   : > { %s5410_s4 = scalar_lea.vmem [#allocation12], %s4755_s7  ;;  %s5411_s26 = scalar_lea.vmem [#allocation9], %s4755_s7 }
 0x109   : > { %1284 = vmatpush.bf16.msra.mxu0 %v3470_v20  ;;  %p3701_p7 = scmp.ne.s32.totalorder %s4641_s24, 1 }
 0x10b   : > { %1298 = vmatpush.bf16.msra.mxu1 %v3474_v23 }
 0x10d   : > { %1285 = vmatpush.bf16.msra.mxu0 %v3462_v24 }
 0x10f   : > { %1299 = vmatpush.bf16.msra.mxu1 %v3466_v29 }
 0x110   : > { %3491 = vmatmul.msk.bf16.vlgmr.msra.gmra.mxu0 %vm1274_vm1, %v1219_v28 }
 0x112   : > { %3492 = vmatmul.msk.bf16.vlgmr.msra.gmra.mxu1 %vm1274_vm1, %v1219_v28 }
 0x18d   : > { %v1287_v32 = vpop.f32.mrf.mxu0 }
 0x18e   : > { %v1288_v33 = vadd.f32 %v1287_v32, %v1230_v31 }
 0x18f   : > { %v1301_v48 = vpop.f32.mrf.mxu1 }
 0x190   : > { %v1319_v34 = vpack.c.bf16 %v1288_v33, %v1288_v33  ;;  %v1315_v46 = vmul.f32 0.25, %v1288_v33  ;;  %v1302_v50 = vadd.f32 %v1301_v48, %v1231_v47 }
 0x192   : > { %v1324_v35 = vunpack.c.l.b16 %v1319_v34  ;;  %v1317_v49 = vpack.c.bf16 %v1315_v46, %v1315_v46  ;;  %v1321_v52 = vpack.c.bf16 %v1302_v50, %v1302_v50 }
 0x194   : > { %v4879_v36 = vpack.c.b16 %v1324_v35, %v1324_v35  ;;  %v1470_v51 = vunpack.c.l.b16 %v1317_v49  ;;  %v1548_v54 = vunpack.c.l.b16 %v1321_v52  ;;  %v1406_v26 = vsel %vm1404_vm3, %v1321_v52, 0 }
 0x195   : > { %v1289_v37 = vpop.f32.mrf.mxu0 }
 0x196   : > { %v1290_v38 = vadd.f32 %v1289_v37, %v1230_v31  ;;  %1326 = vrot.lane.b32.xlu0 %v4879_v36, %s4383_s10  ;;  %v4895_v53 = vpack.c.b16 %v1470_v51, %v1470_v51  ;;  %v4899_v55 = vpack.c.b16 %v1548_v54, %v1548_v54 }
 0x197   : > { %v1303_v56 = vpop.f32.mrf.mxu1 }
 0x198   : > { %v1320_v39 = vpack.c.bf16 %v1290_v38, %v1290_v38  ;;  %v1316_v42 = vmul.f32 0.25, %v1290_v38  ;;  %v1304_v58 = vadd.f32 %v1303_v56, %v1231_v47 }
 0x19a   : > { %v1349_v40 = vunpack.c.l.b16 %v1320_v39  ;;  %v1318_v43 = vpack.c.bf16 %v1316_v42, %v1316_v42  ;;  %v4908_v60 = vpack.c.bf16 %v1304_v58, %v1304_v58 }
 0x19c   : > { %v4883_v41 = vpack.c.b16 %v1349_v40, %v1349_v40  ;;  %v1496_v44 = vunpack.c.l.b16 %v1318_v43  ;;  %v1425_v62 = vsel %vm1404_vm3, %v4908_v60, 0 }
 0x19e   : > { %1351 = vrot.lane.b32.xlu0 %v4883_v41, %s4383_s10  ;;  %v4889_v45 = vpack.c.b16 %v1496_v44, %v1496_v44 }
 0x1a6   : > { %1474 = vrot.lane.b32.xlu0 %v4879_v36, %s4384_s11 }
 0x1ae   : > { %1498 = vrot.lane.b32.xlu0 %v4889_v45, %s4385_s12 }
 0x1b6   : > { %1623 = vrot.lane.b32.xlu0 %v4879_v36, %s4386_s19 }
 0x1be   : > { %1621 = vrot.lane.b32.xlu0 %v4895_v53, %s4387_s30 }
 0x1c6   : > { %1550 = vrot.lane.b32.xlu0 %v4899_v55, %s4385_s12 }
 0x1ce   : > { %1646 = vrot.lane.b32.xlu0 %v4883_v41, %s4386_s19 }
 0x1d6   : > { %1644 = vrot.lane.b32.xlu0 %v4889_v45, %s4387_s30 }
 0x208   : > { %v1327_v57 = vpop.permute.xlu0 %1326 }
 0x209   : > { %v1333_v59 = vsel %vm1328_vm2, %v1327_v57, 0 }
 0x20a   : > { %1342 = vmatpush.bf16.xpose.msra.mxu2 %v1333_v59 }
 0x210   : > { %v1352_v61 = vpop.permute.xlu0 %1351 }
 0x211   : > { %3493 = vmatmul.msk.bf16.vlgmr.msra.gmra.mxu2 %vm1328_vm2, %v1317_v49  ;;  %v1357_v63 = vsel %vm1328_vm2, %v1352_v61, 0 }
 0x212   : > { %1366 = vmatpush.bf16.xpose.msra.mxu3 %v1357_v63  ;;  %1415 = vmatpush.bf16.msrb.mxu2 %v1406_v26 }
 0x216   : > { %1457 = vmatpush.bf16.msra.mxu2 %v3739_v27 }
 0x218   : > { %v1475_v0 = vpop.permute.xlu0 %1474 }
 0x219   : > { %v1480_v1 = vsel %vm1328_vm2, %v1475_v0, 0  ;;  %3494 = vmatmul.msk.bf16.vlgmr.msra.gmra.mxu3 %vm1328_vm2, %v1318_v43 }
 0x21a   : > { %1434 = vmatpush.bf16.msrb.mxu3 %v1425_v62 }
 0x21e   : > { %1489 = vmatpush.bf16.xpose.msra.mxu3 %v1480_v1 }
 0x220   : > { %v1499_v28 = vpop.permute.xlu0 %1498 }
 0x228   : > { %v1624_v29 = vpop.permute.xlu0 %1623 }
 0x229   : > { %v1629_v54 = vsel %vm1328_vm2, %v1624_v29, 0 }
 0x230   : > { %v1622_v32 = vpop.permute.xlu0 %1621 }
 0x238   : > { %v1551_v40 = vpop.permute.xlu0 %1550 }
 0x239   : > { %v1556_v43 = vsel %vm1404_vm3, %v1551_v40, 0 }
 0x240   : > { %v1647_v46 = vpop.permute.xlu0 %1646 }
 0x241   : > { %v1652_v48 = vsel %vm1328_vm2, %v1647_v46, 0 }
 0x294   : > { %v1344_v6 = vpop.f32.mrf.mxu2 }
 0x295   : > { %v1374_v7 = vsel %vm4916_vm4, %v1344_v6, -1e+30 }
 0x296   : > { %v1377_v8 = vsel %vm1376_vm5, %v1374_v7, -inf }
 0x297   : > { %1378 = vmax.xlane.f32.xlu1 %v1377_v8 }
 0x29c   : > { %v1346_v9 = vpop.f32.mrf.mxu2  ;;  %v1368_v10 = vpop.f32.mrf.mxu3 }
 0x29d   : > { %v1375_v11 = vsel %vm4916_vm4, %v1368_v10, -1e+30 }
 0x29e   : > { %v1380_v12 = vsel %vm1376_vm5, %v1375_v11, -inf }
 0x29f   : > { %1381 = vmax.xlane.f32.xlu1 %v1380_v12 }
 0x2a4   : > { %v1370_v13 = vpop.f32.mrf.mxu3 }
 0x2b8   : > { %1472 = vrot.lane.b32.xlu1 %v4895_v53, %s4385_s12 }
 0x30a   : > { %v1379_v14 = vpop.xlane.xlu1 %1378 }
 0x30b   : > { %v1383_v15 = vsub.f32 %v1374_v7, %v1379_v14  ;;  %v1572_v14 = vunpack.c.l.b16 %v4908_v60 }
 0x30d   : > { %v1385_v16 = vmul.f32 1.442695, %v1383_v15  ;;  %v4961_v15 = vpack.c.b16 %v1572_v14, %v1572_v14 }
 0x30f   : > { %3912 = vpow2.f32 %v1385_v16  ;;  %v1645_v16 = vpop.permute.xlu0 %1644 }
 0x312   : > { %v1382_v17 = vpop.xlane.xlu1 %1381 }
 0x313   : > { %v1384_v18 = vsub.f32 %v1375_v11, %v1382_v17  ;;  %v3740_v17 = vld [vmem:[%s4804_s14 + $0x8] sm:$0xff] }
 0x314   : > { %1612 = vmatpush.bf16.msrb.mxu1 %v3740_v17 }
 0x315   : > { %v3913_v19 = vpop.eup %3912  ;;  %v1387_v20 = vmul.f32 1.442695, %v1384_v18 }
 0x316   : > { %v1389_v21 = vsel %vm1376_vm5, %v3913_v19, 0.0 }
 0x317   : > { %3914 = vpow2.f32 %v1387_v20  ;;  %1390 = vadd.xlane.f32.xlu2 %v1389_v21 }
 0x31d   : > { %v3915_v23 = vpop.eup %3914 }
 0x31e   : > { %v1392_v24 = vsel %vm1376_vm5, %v3915_v23, 0.0 }
 0x31f   : > { %1393 = vadd.xlane.f32.xlu2 %v1392_v24 }
 0x32a   : > { %v1473_v47 = vpop.permute.xlu1 %1472 }
 0x337   : > { %1500 = vrot.lane.b32.xlu2 %v4883_v41, %s4384_s11 }
 0x38a   : > { %v1391_v30 = vpop.xlane.xlu2 %1390 }
 0x38b   : > { %3916 = vrcp.f32 %v1391_v30 }
 0x391   : > { %v3917_v31 = vpop.eup %3916 }
 0x392   : > { %v1397_v33 = vmul.f32 %v3917_v31, %v3913_v19  ;;  %v1394_v34 = vpop.xlane.xlu2 %1393 }
 0x393   : > { %3918 = vrcp.f32 %v1394_v34 }
 0x394   : > { %v1399_v35 = vpack.c.bf16 %v1397_v33, %v1397_v33 }
 0x396   : > { %3495 = vmatmul.msk.bf16.vlgmr.msrb.gmra.mxu2 %vm1376_vm5, %v1399_v35 }
 0x399   : > { %v3919_v37 = vpop.eup %3918 }
 0x39a   : > { %v1398_v38 = vmul.f32 %v3919_v37, %v3915_v23  ;;  %v1501_v39 = vpop.permute.xlu2 %1500 }
 0x39b   : > { %v1506_v42 = vsel %vm1328_vm2, %v1501_v39, 0 }
 0x39c   : > { %1515 = vmatpush.bf16.xpose.msrb.mxu2 %v1506_v42  ;;  %v1400_v44 = vpack.c.bf16 %v1398_v38, %v1398_v38 }
 0x39e   : > { %3496 = vmatmul.msk.bf16.vlgmr.msrb.gmra.mxu3 %vm1376_vm5, %v1400_v44 }
 0x39f   : > { %1565 = vmatpush.bf16.msrb.mxu3 %v1556_v43 }
 0x3ae   : > { %3502 = vmatmul.msk.bf16.vlgmr.msra.gmra.mxu3 %vm1328_vm2, %v1473_v47 }
 0x3af   : > { %1661 = vmatpush.bf16.xpose.msra.mxu3 %v1652_v48 }
 0x419   : > { %v1417_v49 = vpop.f32.mrf.mxu2 }
 0x421   : > { %v1419_v50 = vpop.f32.mrf.mxu2  ;;  %v1436_v51 = vpop.f32.mrf.mxu3 }
 0x422   : > { %v1440_v52 = vpack.c.bf16 %v1436_v51, %v1417_v49 }
 0x424   : > { %3501 = vmatmul.msk.bf16.vlgmr.msra.gmra.mxu2 %vm1328_vm2, %v1440_v52 }
 0x425   : > { %1638 = vmatpush.bf16.xpose.msra.mxu2 %v1629_v54 }
 0x429   : > { %v1438_v56 = vpop.f32.mrf.mxu3 }
 0x431   : > { %v1491_v57 = vpop.f32.mrf.mxu3 }
 0x432   : > { %v1521_v58 = vsel %vm4916_vm4, %v1491_v57, -1e+30 }
 0x433   : > { %v1523_v59 = vsel %vm1376_vm5, %v1521_v58, -inf }
 0x434   : > { %3503 = vmatmul.msk.bf16.vlgmr.msrb.gmra.mxu2 %vm1328_vm2, %v1499_v28  ;;  %1524 = vmax.xlane.f32.xlu2 %v1523_v59 }
 0x439   : > { %v1493_v61 = vpop.f32.mrf.mxu3 }
 0x444   : > { %3511 = vmatmul.msk.bf16.vlgmr.msra.gmra.mxu2 %vm1328_vm2, %v1622_v32 }
 0x4a7   : > { %v4947_v62 = vpop.f32.mrf.mxu2  ;;  %v1525_v63 = vpop.xlane.xlu2 %1524 }
 0x4a8   : > { %v1529_v0 = vsub.f32 %v1521_v58, %v1525_v63 }
 0x4aa   : > { %v1531_v1 = vmul.f32 1.442695, %v1529_v0 }
 0x4ac   : > { %3920 = vpow2.f32 %v1531_v1 }
 0x4af   : > { %v4949_v2 = vpop.f32.mrf.mxu2 }
 0x4b2   : > { %v3921_v3 = vpop.eup %3920 }
 0x4b3   : > { %v1535_v4 = vsel %vm1376_vm5, %v3921_v3, 0.0 }
 0x4b4   : > { %1536 = vadd.xlane.f32.xlu1 %v1535_v4 }
 0x4b7   : > { %v1517_v6 = vpop.f32.mrf.mxu2 }
 0x4b8   : > { %v1522_v7 = vsel %vm4916_vm4, %v1517_v6, -1e+30 }
 0x4b9   : > { %v1526_v8 = vsel %vm1376_vm5, %v1522_v7, -inf }
 0x4ba   : > { %1527 = vmax.xlane.f32.xlu0 %v1526_v8 }
 0x4bf   : > { %v1519_v9 = vpop.f32.mrf.mxu2 }
 0x4c7   : > { %v1640_v10 = vpop.f32.mrf.mxu2 }
 0x4c8   : > { %v1667_v11 = vsel %vm4916_vm4, %v1640_v10, -1e+30 }
 0x4c9   : > { %v1669_v12 = vsel %vm1376_vm5, %v1667_v11, -inf }
 0x4ca   : > { %1670 = vmax.xlane.f32.xlu2 %v1669_v12 }
 0x4ce   : > { %1786 = vrot.lane.b32.xlu0 %v4883_v41, %s4388_s6 }
 0x4cf   : > { %v1642_v13 = vpop.f32.mrf.mxu2 }
 0x4d6   : > { %1714 = vrot.lane.b32.xlu0 %v4961_v15, %s4387_s30 }
 0x4e2   : > { %1574 = vrot.lane.b32.xlu2 %v4961_v15, %s4385_s12 }
 0x4ea   : > { %1763 = vrot.lane.b32.xlu2 %v4879_v36, %s4388_s6 }
 0x4f2   : > { %1761 = vrot.lane.b32.xlu2 %v4895_v53, %s4389_s5 }
 0x527   : > { %v1537_v41 = vpop.xlane.xlu1 %1536 }
 0x528   : > { %3922 = vrcp.f32 %v1537_v41 }
 0x52d   : > { %v1528_v60 = vpop.xlane.xlu0 %1527 }
 0x52e   : > { %v3923_v18 = vpop.eup %3922  ;;  %v1530_v19 = vsub.f32 %v1522_v7, %v1528_v60 }
 0x52f   : > { %v1543_v20 = vmul.f32 %v3923_v18, %v3921_v3 }
 0x530   : > { %v1533_v21 = vmul.f32 1.442695, %v1530_v19 }
 0x531   : > { %v1545_v23 = vpack.c.bf16 %v1543_v20, %v1543_v20 }
 0x532   : > { %3924 = vpow2.f32 %v1533_v21 }
 0x533   : > { %3504 = vmatmul.msk.bf16.vlgmr.msrb.gmra.mxu3 %vm1376_vm5, %v1545_v23  ;;  %v3901_v23 = vld [vmem:[%s5407_s29] ss:$0 sm:$0xff] }
 0x538   : > { %v3925_v24 = vpop.eup %3924 }
 0x539   : > { %v1538_v36 = vsel %vm1376_vm5, %v3925_v24, 0.0 }
 0x53a   : > { %1539 = vadd.xlane.f32.xlu1 %v1538_v36 }
 0x53d   : > { %v1671_v26 = vpop.xlane.xlu2 %1670 }
 0x53e   : > { %v1675_v34 = vsub.f32 %v1667_v11, %v1671_v26 }
 0x540   : > { %v1787_v53 = vpop.permute.xlu0 %1786  ;;  %v1677_v35 = vmul.f32 1.442695, %v1675_v34 }
 0x541   : > { %v1792_v50 = vsel %vm1328_vm2, %v1787_v53, 0 }
 0x542   : > { %3926 = vpow2.f32 %v1677_v35 }
 0x543   : > { %3512 = vmatmul.msk.bf16.vlgmr.msra.gmra.mxu3 %vm1328_vm2, %v1645_v16 }
 0x545   : > { %v1575_v27 = vpop.permute.xlu2 %1574 }
 0x546   : > { %v1580_v28 = vsel %vm1404_vm3, %v1575_v27, 0 }
 0x547   : > { %1589 = vmatpush.bf16.msrb.mxu0 %v1580_v28 }
 0x548   : > { %v1715_v29 = vpop.permute.xlu0 %1714  ;;  %v3927_v37 = vpop.eup %3926 }
 0x549   : > { %v1720_v30 = vsel %vm1404_vm3, %v1715_v29, 0  ;;  %v1681_v38 = vsel %vm1376_vm5, %v3927_v37, 0.0 }
 0x54a   : > { %1729 = vmatpush.bf16.msra.mxu1 %v1720_v30 }
 0x54d   : > { %v1764_v31 = vpop.permute.xlu2 %1763 }
 0x54e   : > { %v1769_v32 = vsel %vm1328_vm2, %v1764_v31, 0 }
 0x54f   : > { %1778 = vmatpush.bf16.xpose.msrb.mxu3 %v1769_v32 }
 0x553   : > { %1693 = vrot.lane.b32.xlu1 %v4899_v55, %s4387_s30 }
 0x555   : > { %v1762_v33 = vpop.permute.xlu2 %1761 }
 0x556   : > { %3520 = vmatmul.msk.bf16.vlgmr.msrb.gmra.mxu3 %vm1328_vm2, %v1762_v33 }
 0x57d   : > { %1682 = vadd.xlane.f32.xlu1 %v1681_v38 }
 0x596   : > { %1784 = vrot.lane.b32.xlu1 %v4889_v45, %s4389_s5 }
 0x5ad   : > { %v1540_v39 = vpop.xlane.xlu1 %1539 }
 0x5ae   : > { %3928 = vrcp.f32 %v1540_v39 }
 0x5b4   : > { %v3929_v40 = vpop.eup %3928 }
 0x5b5   : > { %v1544_v42 = vmul.f32 %v3929_v40, %v3925_v24  ;;  %v1467_v24 = vadd.f32 %v3901_v23, %v4947_v62  ;;  %v3741_v40 = vld [vmem:[%s4804_s14 + $0x10] sm:$0xff] }
 0x5b6   : > { %v1567_v43 = vpop.f32.mrf.mxu3  ;;  %1752 = vmatpush.bf16.msrb.mxu2 %v3741_v40 }
 0x5b7   : > { %v1546_v44 = vpack.c.bf16 %v1544_v42, %v1544_v42 }
 0x5b9   : > { %3505 = vmatmul.msk.bf16.vlgmr.msrb.gmra.mxu0 %vm1376_vm5, %v1546_v44 }
 0x5be   : > { %v1569_v46 = vpop.f32.mrf.mxu3 }
 0x5c5   : > { %v1694_v47 = vpop.permute.xlu1 %1693 }
 0x5c6   : > { %v1699_v48 = vsel %vm1404_vm3, %v1694_v47, 0  ;;  %v1663_v49 = vpop.f32.mrf.mxu3 }
 0x5c7   : > { %v1668_v51 = vsel %vm4916_vm4, %v1663_v49, -1e+30  ;;  %1708 = vmatpush.bf16.msra.mxu0 %v1699_v48 }
 0x5c8   : > { %v1672_v45 = vsel %vm1376_vm5, %v1668_v51, -inf }
 0x5c9   : > { %1673 = vmax.xlane.f32.xlu2 %v1672_v45 }
 0x5cb   : > { %1801 = vmatpush.bf16.xpose.msrb.mxu0 %v1792_v50 }
 0x5ce   : > { %v1665_v52 = vpop.f32.mrf.mxu3 }
 0x5d9   : > { %v1780_v54 = vpop.f32.mrf.mxu3 }
 0x5da   : > { %v1807_v56 = vsel %vm4916_vm4, %v1780_v54, -1e+30 }
 0x5db   : > { %v1809_v57 = vsel %vm1376_vm5, %v1807_v56, -inf }
 0x5dc   : > { %1810 = vmax.xlane.f32.xlu2 %v1809_v57  ;;  %v3742_v57 = vld [vmem:[%s4804_s14 + $0x18] sm:$0xff] }
 0x5dd   : > { %1892 = vmatpush.bf16.msra.mxu3 %v3742_v57 }
 0x5e1   : > { %v1782_v58 = vpop.f32.mrf.mxu3 }
 0x5f0   : > { %v1683_v59 = vpop.xlane.xlu1 %1682 }
 0x5f1   : > { %3930 = vrcp.f32 %v1683_v59 }
 0x5f7   : > { %v3931_v61 = vpop.eup %3930 }
 0x5f8   : > { %v1689_v63 = vmul.f32 %v3931_v61, %v3927_v37 }
 0x5fa   : > { %v1691_v0 = vpack.c.bf16 %v1689_v63, %v1689_v63 }
 0x5fc   : > { %3513 = vmatmul.msk.bf16.vlgmr.msra.gmra.mxu0 %vm1376_vm5, %v1691_v0 }
 0x608   : > { %v1785_v1 = vpop.permute.xlu1 %1784 }
 0x60c   : > { %3521 = vmatmul.msk.bf16.vlgmr.msrb.gmra.mxu0 %vm1328_vm2, %v1785_v1 }
 0x636   : > { %v1591_v3 = vpop.f32.mrf.mxu0 }
 0x637   : > { %v1595_v4 = vpack.c.bf16 %v1591_v3, %v1567_v43  ;;  %v1468_v3 = vadd.f32 %v3901_v23, %v4949_v2  ;;  %v3750_v2 = vld [vmem:[%s4771_s3 + $0x18] sm:$0xff] }
 0x639   : > { %3510 = vmatmul.msk.bf16.vlgmr.msrb.gmra.mxu1 %vm1328_vm2, %v1595_v4 }
 0x63c   : > { %v1674_v6 = vpop.xlane.xlu2 %1673 }
 0x63d   : > { %v1676_v7 = vsub.f32 %v1668_v51, %v1674_v6 }
 0x63e   : > { %v1593_v8 = vpop.f32.mrf.mxu0 }
 0x63f   : > { %v1679_v9 = vmul.f32 1.442695, %v1676_v7 }
 0x641   : > { %3932 = vpow2.f32 %v1679_v9 }
 0x647   : > { %v3933_v10 = vpop.eup %3932 }
 0x648   : > { %v1684_v11 = vsel %vm1376_vm5, %v3933_v10, 0.0 }
 0x649   : > { %1685 = vadd.xlane.f32.xlu1 %v1684_v11 }
 0x64f   : > { %v1811_v12 = vpop.xlane.xlu2 %1810 }
 0x650   : > { %v1815_v13 = vsub.f32 %v1807_v56, %v1811_v12 }
 0x652   : > { %v1817_v14 = vmul.f32 1.442695, %v1815_v13  ;;  %v4390_v13 = vmov 64.0  }
 0x654   : > { %3934 = vpow2.f32 %v1817_v14 }
 0x65a   : > { %v3935_v16 = vpop.eup %3934 }
 0x65b   : > { %v1821_v41 = vsel %vm1376_vm5, %v3935_v16, 0.0 }
 0x65c   : > { %1822 = vadd.xlane.f32.xlu2 %v1821_v41 }
 0x679   : > { %v1710_v17 = vpop.f32.mrf.mxu0 }
 0x681   : > { %v1712_v60 = vpop.f32.mrf.mxu0 }
 0x689   : > { %v1803_v18 = vpop.f32.mrf.mxu0 }
 0x68a   : > { %v1808_v19 = vsel %vm4916_vm4, %v1803_v18, -1e+30 }
 0x68b   : > { %v1812_v20 = vsel %vm1376_vm5, %v1808_v19, -inf }
 0x68c   : > { %1813 = vmax.xlane.f32.xlu0 %v1812_v20 }
 0x691   : > { %v1805_v21 = vpop.f32.mrf.mxu0 }
 0x6a0   : > { %1833 = vrot.lane.b32.xlu0 %v4899_v55, %s4389_s5 }
 0x6b6   : > { %v1614_v36 = vpop.f32.mrf.mxu1 }
 0x6b7   : > { %v1619_v26 = vadd.f32 %v1614_v36, %v1467_v24 }
 0x6bc   : > { %v1686_v53 = vpop.xlane.xlu1 %1685 }
 0x6bd   : > { %3936 = vrcp.f32 %v1686_v53 }
 0x6be   : > { %v1616_v42 = vpop.f32.mrf.mxu1 }
 0x6bf   : > { %v1620_v6 = vadd.f32 %v1616_v42, %v1468_v3 }
 0x6c3   : > { %v3937_v27 = vpop.eup %3936 }
 0x6c4   : > { %v1690_v28 = vmul.f32 %v3937_v27, %v3933_v10 }
 0x6c6   : > { %v1692_v29 = vpack.c.bf16 %v1690_v28, %v1690_v28  ;;  %v3748_v28 = vld [vmem:[%s4771_s3 + $0x8] sm:$0xff] }
 0x6c8   : > { %3514 = vmatmul.msk.bf16.vlgmr.msra.gmra.mxu1 %vm1376_vm5, %v1692_v29  ;;  %v3747_v29 = vld [vmem:[%s4771_s3] sm:$0xff] }
 0x6cf   : > { %v1823_v33 = vpop.xlane.xlu2 %1822 }
 0x6ff   : > { %v1814_v30 = vpop.xlane.xlu0 %1813 }
 0x700   : > { %v1816_v31 = vsub.f32 %v1808_v19, %v1814_v30  ;;  %v3730_v30 = vld [vmem:[#allocation3] sm:$0xff] }
 0x702   : > { %v1819_v32 = vmul.f32 1.442695, %v1816_v31  ;;  %v3746_v31 = vld [vmem:[%s4809_s18 + $0x18] sm:$0xff] }
 0x703   : > { %2010 = vmatpush.bf16.msra.mxu0 %v3746_v31 }
 0x704   : > { %3938 = vpow2.f32 %v1819_v32  ;;  %v3745_v32 = vld [vmem:[%s4809_s18 + $0x10] sm:$0xff] }
 0x705   : > { %3940 = vrcp.f32 %v1823_v33  ;;  %v3744_v33 = vld [vmem:[%s4809_s18 + $0x8] sm:$0xff] }
 0x707   : > { %2011 = vmatpush.bf16.msra.mxu0 %v3745_v32 }
 0x70a   : > { %v3939_v55 = vpop.eup %3938 }
 0x70b   : > { %v1824_v34 = vsel %vm1376_vm5, %v3939_v55, 0.0  ;;  %v3941_v62 = vpop.eup %3940  ;;  %2012 = vmatpush.bf16.msra.mxu0 %v3744_v33 }
 0x70c   : > { %1825 = vadd.xlane.f32.xlu1 %v1824_v34  ;;  %v1829_v35 = vmul.f32 %v3941_v62, %v3935_v16 }
 0x70e   : > { %v1831_v39 = vpack.c.bf16 %v1829_v35, %v1829_v35  ;;  %v3743_v35 = vld [vmem:[%s4809_s18] sm:$0xff] }
 0x70f   : > { %2013 = vmatpush.bf16.msra.mxu0 %v3743_v35 }
 0x712   : > { %v1834_v37 = vpop.permute.xlu0 %1833 }
 0x713   : > { %v1839_v38 = vsel %vm1404_vm3, %v1834_v37, 0 }
 0x714   : > { %1848 = vmatpush.bf16.msrb.mxu1 %v1839_v38 }
 0x717   : > { %3522 = vmatmul.msk.bf16.vlgmr.msrb.gmra.mxu1 %vm1376_vm5, %v1831_v39 }
 0x718   : > { %2068 = vmatpush.bf16.msra.mxu1 %v3750_v2  ;;  %v3905_v2 = vld [vmem:[%s5411_s26] ss:$0 sm:$0xff] }
 0x725   : > { %1854 = vrot.lane.b32.xlu1 %v4961_v15, %s4389_s5 }
 0x745   : > { %v1731_v43 = vpop.f32.mrf.mxu1 }
 0x746   : > { %v1735_v44 = vpack.c.bf16 %v1731_v43, %v1710_v17 }
 0x748   : > { %3519 = vmatmul.msk.bf16.vlgmr.msrb.gmra.mxu2 %vm1328_vm2, %v1735_v44 }
 0x74d   : > { %v1733_v46 = vpop.f32.mrf.mxu1 }
 0x77f   : > { %v1826_v47 = vpop.xlane.xlu1 %1825 }
 0x780   : > { %3942 = vrcp.f32 %v1826_v47 }
 0x781   : > { %3944 = vrcp.f32 %v4390_v13 }
 0x786   : > { %v3943_v48 = vpop.eup %3942 }
 0x787   : > { %v1830_v50 = vmul.f32 %v3943_v48, %v3939_v55  ;;  %v3945_v14 = vpop.eup %3944 }
 0x788   : > { %v1912_v16 = vmul.f32 64.0, %v3945_v14  ;;  %vm1916_vm6 = vweird.f32 %v3945_v14 }
 0x789   : > { %v1832_v52 = vpack.c.bf16 %v1830_v50, %v1830_v50 }
 0x78a   : > { %v1913_v41 = vsub.f32 1.0, %v1912_v16 }
 0x78c   : > { %v1914_v17 = vmul.f32 %v3945_v14, %v1913_v41 }
 0x78e   : > { %v1915_v60 = vadd.f32 %v3945_v14, %v1914_v17 }
 0x790   : > { %v5025_v18 = vsel %vm1916_vm6, %v3945_v14, %v1915_v60 }
 0x794   : > { %v1850_v49 = vpop.f32.mrf.mxu1 }
 0x797   : > { %v1855_v51 = vpop.permute.xlu1 %1854 }
 0x798   : > { %v1860_v45 = vsel %vm1404_vm3, %v1855_v51, 0 }
 0x799   : > { %1869 = vmatpush.bf16.msra.mxu2 %v1860_v45 }
 0x79c   : > { %v1852_v54 = vpop.f32.mrf.mxu1  ;;  %3523 = vmatmul.msk.bf16.vlgmr.msra.gmra.mxu2 %vm1376_vm5, %v1832_v52 }
 0x79d   : > { %v3902_v54 = vld [vmem:[%s1188_s15] ss:$0 sm:$0xff] }
 0x7cb   : > { %v1754_v15 = vpop.f32.mrf.mxu2 }
 0x7cc   : > { %v1759_v56 = vadd.f32 %v1754_v15, %v1619_v26 }
 0x7d3   : > { %v1756_v58 = vpop.f32.mrf.mxu2 }
 0x7d4   : > { %v1760_v8 = vadd.f32 %v1756_v58, %v1620_v6  ;;  %v3903_v58 = vld [vmem:[%s1191_s9] ss:$0 sm:$0xff]  ;;  %s5412_s9 = sld [smem:[#allocation44_spill]] }
 0x7da   : > { %s5413_s13 = scalar_lea.vmem %s5412_s9, %s4792_s22 }
 0x81f   : > { %v1871_v59 = vpop.f32.mrf.mxu2 }
 0x820   : > { %v1875_v61 = vpack.c.bf16 %v1871_v59, %v1850_v49 }
 0x822   : > { %3528 = vmatmul.msk.bf16.vlgmr.msra.gmra.mxu3 %vm1328_vm2, %v1875_v61 }
 0x827   : > { %v1873_v63 = vpop.f32.mrf.mxu2 }
 0x8a5   : > { %v1894_v0 = vpop.f32.mrf.mxu3 }
 0x8a6   : > { %v1899_v1 = vadd.f32 %v1894_v0, %v1759_v56 }
 0x8a8   : > { %v1901_v4 = vadd.f32 %v1899_v1, %v4868_v22  ;;  %v3749_v22 = vld [vmem:[%s4771_s3 + $0x10] sm:$0xff] }
 0x8a9   : > { %2069 = vmatpush.bf16.msra.mxu1 %v3749_v22 }
 0x8aa   : > { %v1905_v7 = vsel %vm1274_vm1, %v1901_v4, 0.0 }
 0x8ab   : > { %1906 = vadd.xlane.f32.xlu2 %v1905_v7 }
 0x8ad   : > { %v1896_v9 = vpop.f32.mrf.mxu3  ;;  %2070 = vmatpush.bf16.msra.mxu1 %v3748_v28 }
 0x8ae   : > { %v1900_v10 = vadd.f32 %v1896_v9, %v1760_v8 }
 0x8b0   : > { %v1902_v11 = vadd.f32 %v1900_v10, %v4870_v25 }
 0x8b1   : > { %2071 = vmatpush.bf16.msra.mxu1 %v3747_v29 }
 0x8b2   : > { %v1908_v12 = vsel %vm1274_vm1, %v1902_v11, 0.0 }
 0x8b3   : > { %1909 = vadd.xlane.f32.xlu2 %v1908_v12 }
 0x8b4   : > { %3566 = vmatmul.msk.bf16.vlgmr.msra.gmra.mxu1 %vm1274_vm1, %v3730_v30 }
 0x91e   : > { %v1907_v25 = vpop.xlane.xlu2 %1906 }
 0x91f   : > { %v1918_v19 = vmul.f32 %v5025_v18, %v1907_v25 }
 0x921   : > { %v1920_v20 = vsub.f32 %v1901_v4, %v1918_v19  ;;  %v3904_v4 = vld [vmem:[%s5410_s4] ss:$0 sm:$0xff] }
 0x923   : > { %v1922_v21 = vmul.f32 %v1920_v20, %v1920_v20 }
 0x925   : > { %v1924_v23 = vsel %vm1274_vm1, %v1922_v21, 0.0 }
 0x926   : > { %1925 = vadd.xlane.f32.xlu2 %v1924_v23  ;;  %v1910_v24 = vpop.xlane.xlu2 %1909 }
 0x927   : > { %v1919_v36 = vmul.f32 %v5025_v18, %v1910_v24 }
 0x929   : > { %v1921_v26 = vsub.f32 %v1902_v11, %v1919_v36 }
 0x92b   : > { %v1923_v53 = vmul.f32 %v1921_v26, %v1921_v26 }
 0x92d   : > { %v1927_v27 = vsel %vm1274_vm1, %v1923_v53, 0.0 }
 0x92e   : > { %1928 = vadd.xlane.f32.xlu0 %v1927_v27 }
 0x931   : > { %v2073_v6 = vpop.f32.mrf.mxu1 }
 0x932   : > { %v2074_v7 = vadd.f32 %v3904_v4, %v2073_v6 }
 0x934   : > { %v2091_v8 = vpack.c.bf16 %v2074_v7, %v2074_v7 }
 0x936   : > { %v2097_v9 = vsel %vm1328_vm2, %v2091_v8, 0  ;;  %v2158_v10 = vunpack.c.l.b16 %v2091_v8 }
 0x937   : > { %2106 = vmatpush.bf16.xpose.msrb.mxu2 %v2097_v9 }
 0x938   : > { %v5060_v11 = vpack.c.b16 %v2158_v10, %v2158_v10 }
 0x939   : > { %v2075_v12 = vpop.f32.mrf.mxu1 }
 0x93a   : > { %2239 = vrot.lane.b32.xlu1 %v5060_v11, %s4385_s12  ;;  %v2076_v13 = vadd.f32 %v3904_v4, %v2075_v12 }
 0x93c   : > { %v2092_v14 = vpack.c.bf16 %v2076_v13, %v2076_v13 }
 0x93e   : > { %v2116_v16 = vsel %vm1328_vm2, %v2092_v14, 0 }
 0x93f   : > { %2125 = vmatpush.bf16.xpose.msrb.mxu3 %v2116_v16 }
 0x942   : > { %2160 = vrot.lane.b32.xlu0 %v5060_v11, %s4383_s10 }
 0x999   : > { %v1926_v55 = vpop.xlane.xlu2 %1925 }
 0x99a   : > { %v1930_v34 = vmul.f32 %v1926_v55, %v5025_v18 }
 0x99c   : > { %v1932_v62 = vadd.f32 1e-05, %v1930_v34 }
 0x99e   : > { %3946 = vrsqrt.f32 %v1932_v62  ;;  %vm1940_vm8 = vweird.f32 %v1932_v62 }
 0x9a1   : > { %v1929_v37 = vpop.xlane.xlu0 %1928 }
 0x9a2   : > { %v1931_v38 = vmul.f32 %v1929_v37, %v5025_v18 }
 0x9a4   : > { %v3947_v39 = vpop.eup %3946  ;;  %v1933_v40 = vadd.f32 1e-05, %v1931_v38  ;;  %v2182_v38 = vunpack.c.l.b16 %v2092_v14 }
 0x9a5   : > { %v1935_v42 = vmul.f32 %v3947_v39, %v1932_v62  ;;  %vm1941_vm7 = vweird.f32 %v3947_v39 }
 0x9a6   : > { %3948 = vrsqrt.f32 %v1933_v40  ;;  %vm1942_vm9 = vmor %vm1940_vm8, %vm1941_vm7  ;;  %vm1950_vm11 = vweird.f32 %v1933_v40 }
 0x9a7   : > { %v1936_v43 = vmul.f32 %v3947_v39, %v1935_v42 }
 0x9a9   : > { %v1937_v44 = vmul.f32 0.5, %v1936_v43 }
 0x9ab   : > { %v1938_v46 = vsub.f32 1.5, %v1937_v44 }
 0x9ac   : > { %v3949_v47 = vpop.eup %3948  ;;  %v2240_v53 = vpop.permute.xlu1 %2239 }
 0x9ad   : > { %v1939_v48 = vmul.f32 %v3947_v39, %v1938_v46  ;;  %v1945_v49 = vmul.f32 %v3949_v47, %v1933_v40  ;;  %vm1951_vm10 = vweird.f32 %v3949_v47  ;;  %v2245_v27 = vsel %vm1328_vm2, %v2240_v53, 0 }
 0x9ae   : > { %vm1952_vm12 = vmor %vm1950_vm11, %vm1951_vm10  ;;  %2254 = vmatpush.bf16.xpose.msra.mxu3 %v2245_v27 }
 0x9af   : > { %v1946_v50 = vmul.f32 %v3949_v47, %v1945_v49  ;;  %v1943_v51 = vsel %vm1942_vm9, %v3947_v39, %v1939_v48  ;;  %v5088_v39 = vpack.c.b16 %v2182_v38, %v2182_v38 }
 0x9b0   : > { %v1954_v15 = vmul.f32 %v1943_v51, %v1920_v20 }
 0x9b1   : > { %v1947_v45 = vmul.f32 0.5, %v1946_v50 }
 0x9b2   : > { %v1959_v59 = vmul.f32 %v3902_v54, %v1954_v15 }
 0x9b3   : > { %v1948_v52 = vsub.f32 1.5, %v1947_v45 }
 0x9b4   : > { %v5050_v0 = vadd.f32 %v3903_v58, %v1959_v59  ;;  %v2161_v28 = vpop.permute.xlu0 %2160 }
 0x9b5   : > { %v1949_v56 = vmul.f32 %v3949_v47, %v1948_v52  ;;  %v2166_v29 = vsel %vm1404_vm3, %v2161_v28, 0 }
 0x9b6   : > { %2175 = vmatpush.bf16.msrb.mxu0 %v2166_v29 }
 0x9b7   : > { %v1953_v57 = vsel %vm1952_vm12, %v3949_v47, %v1949_v56 }
 0x9b8   : > { %v1955_v61 = vmul.f32 %v1953_v57, %v1921_v26 }
 0x9ba   : > { %v1960_v63 = vmul.f32 %v3902_v54, %v1955_v61 }
 0x9bc   : > { %v5052_v1 = vadd.f32 %v3903_v58, %v1960_v63 }
 0x9be   : > { %v1966_v3 = vpack.c.bf16 %v5052_v1, %v5050_v0 }
 0x9c0   : > { %3545 = vmatmul.msk.bf16.vlgmr.msra.gmra.mxu0 %vm1274_vm1, %v1966_v3 }
 0xa3d   : > { %v2015_v41 = vpop.f32.mrf.mxu0 }
 0xa3e   : > { %v2016_v22 = vadd.f32 %v3905_v2, %v2015_v41 }
 0xa40   : > { %v2087_v17 = vmul.f32 0.25, %v2016_v22 }
 0xa42   : > { %v2089_v60 = vpack.c.bf16 %v2087_v17, %v2087_v17 }
 0xa44   : > { %v2235_v25 = vunpack.c.l.b16 %v2089_v60  ;;  %3567 = vmatmul.msk.bf16.vlgmr.msrb.gmra.mxu2 %vm1328_vm2, %v2089_v60 }
 0xa45   : > { %v2017_v19 = vpop.f32.mrf.mxu0 }
 0xa46   : > { %v2018_v20 = vadd.f32 %v3905_v2, %v2017_v19  ;;  %v5070_v21 = vpack.c.b16 %v2235_v25, %v2235_v25 }
 0xa48   : > { %v2088_v23 = vmul.f32 0.25, %v2018_v20  ;;  %2237 = vrot.lane.b32.xlu2 %v5070_v21, %s4385_s12 }
 0xa4a   : > { %v2090_v24 = vpack.c.bf16 %v2088_v23, %v2088_v23 }
 0xa4c   : > { %v2261_v36 = vunpack.c.l.b16 %v2090_v24  ;;  %3568 = vmatmul.msk.bf16.vlgmr.msrb.gmra.mxu3 %vm1328_vm2, %v2090_v24 }
 0xa4e   : > { %v5075_v26 = vpack.c.b16 %v2261_v36, %v2261_v36 }
 0xa50   : > { %2263 = vrot.lane.b32.xlu0 %v5075_v26, %s4385_s12 }
 0xaa2   : > { %v2238_v30 = vpop.permute.xlu2 %2237 }
 0xaa3   : > { %3576 = vmatmul.msk.bf16.vlgmr.msra.gmra.mxu3 %vm1328_vm2, %v2238_v30 }
 0xac2   : > { %v2264_v50 = vpop.permute.xlu0 %2263 }
 0xac7   : > { %v2108_v31 = vpop.f32.mrf.mxu2 }
 0xac8   : > { %v2131_v32 = vsel %vm4916_vm4, %v2108_v31, -1e+30 }
 0xac9   : > { %v2133_v33 = vsel %vm1376_vm5, %v2131_v32, -inf }
 0xaca   : > { %2134 = vmax.xlane.f32.xlu1 %v2133_v33 }
 0xacf   : > { %v2110_v55 = vpop.f32.mrf.mxu2  ;;  %v2127_v34 = vpop.f32.mrf.mxu3 }
 0xad0   : > { %v2132_v62 = vsel %vm4916_vm4, %v2127_v34, -1e+30  ;;  %v3751_v34 = vld [vmem:[%s4778_s2] sm:$0xff] }
 0xad1   : > { %v2136_v35 = vsel %vm1376_vm5, %v2132_v62, -inf  ;;  %2222 = vmatpush.bf16.msra.mxu2 %v3751_v34 }
 0xad2   : > { %2137 = vmax.xlane.f32.xlu0 %v2136_v35 }
 0xad7   : > { %v2129_v37 = vpop.f32.mrf.mxu3 }
 0xae3   : > { %2265 = vrot.lane.b32.xlu1 %v5088_v39, %s4385_s12 }
 0xae6   : > { %2184 = vrot.lane.b32.xlu0 %v5088_v39, %s4383_s10  ;;  %s5416_s10 = scalar_lea.vmem [#allocation15], %s4755_s7 }
 0xaeb   : > { %2380 = vrot.lane.b32.xlu1 %v5070_v21, %s4387_s30 }
 0xaee   : > { %2312 = vrot.lane.b32.xlu0 %v5060_v11, %s4384_s11 }
 0xb26   : > { %v2256_v40 = vpop.f32.mrf.mxu3 }
 0xb27   : > { %v2286_v42 = vsel %vm4916_vm4, %v2256_v40, -1e+30 }
 0xb28   : > { %v2288_v43 = vsel %vm1376_vm5, %v2286_v42, -inf }
 0xb29   : > { %2289 = vmax.xlane.f32.xlu1 %v2288_v43 }
 0xb2e   : > { %v2258_v44 = vpop.f32.mrf.mxu3 }
 0xb3d   : > { %v2135_v46 = vpop.xlane.xlu1 %2134 }
 0xb3e   : > { %v2139_v47 = vsub.f32 %v2131_v32, %v2135_v46 }
 0xb40   : > { %v2141_v48 = vmul.f32 1.442695, %v2139_v47 }
 0xb42   : > { %3950 = vpow2.f32 %v2141_v48 }
 0xb45   : > { %v2138_v45 = vpop.xlane.xlu0 %2137 }
 0xb46   : > { %v2140_v59 = vsub.f32 %v2132_v62, %v2138_v45 }
 0xb48   : > { %v3951_v49 = vpop.eup %3950  ;;  %v2143_v61 = vmul.f32 1.442695, %v2140_v59 }
 0xb49   : > { %v2145_v51 = vsel %vm1376_vm5, %v3951_v49, 0.0 }
 0xb4a   : > { %2146 = vadd.xlane.f32.xlu2 %v2145_v51  ;;  %3952 = vpow2.f32 %v2143_v61 }
 0xb50   : > { %v3953_v63 = vpop.eup %3952 }
 0xb51   : > { %v2148_v3 = vsel %vm1376_vm5, %v3953_v63, 0.0 }
 0xb55   : > { %v2266_v52 = vpop.permute.xlu1 %2265 }
 0xb56   : > { %v2271_v54 = vsel %vm1328_vm2, %v2266_v52, 0 }
 0xb57   : > { %2280 = vmatpush.bf16.xpose.msra.mxu0 %v2271_v54 }
 0xb58   : > { %v2185_v15 = vpop.permute.xlu0 %2184 }
 0xb59   : > { %v2190_v56 = vsel %vm1404_vm3, %v2185_v15, 0 }
 0xb5a   : > { %2199 = vmatpush.bf16.msrb.mxu1 %v2190_v56 }
 0xb5d   : > { %v2381_v4 = vpop.permute.xlu1 %2380 }
 0xb60   : > { %v2313_v57 = vpop.permute.xlu0 %2312 }
 0xb61   : > { %v2318_v58 = vsel %vm1404_vm3, %v2313_v57, 0 }
 0xb62   : > { %2327 = vmatpush.bf16.msra.mxu1 %v2318_v58  ;;  %2382 = vrot.lane.b32.xlu2 %v5060_v11, %s4387_s30 }
 0xb8b   : > { %2149 = vadd.xlane.f32.xlu2 %v2148_v3 }
 0xb9c   : > { %v2290_v6 = vpop.xlane.xlu1 %2289 }
 0xb9d   : > { %v2294_v7 = vsub.f32 %v2286_v42, %v2290_v6 }
 0xb9f   : > { %v2296_v8 = vmul.f32 1.442695, %v2294_v7 }
 0xba1   : > { %3954 = vpow2.f32 %v2296_v8 }
 0xba3   : > { %2403 = vrot.lane.b32.xlu2 %v5075_v26, %s4387_s30 }
 0xba7   : > { %v3955_v9 = vpop.eup %3954 }
 0xba8   : > { %v2300_v10 = vsel %vm1376_vm5, %v3955_v9, 0.0 }
 0xba9   : > { %2301 = vadd.xlane.f32.xlu1 %v2300_v10 }
 0xbbd   : > { %v2147_v12 = vpop.xlane.xlu2 %2146 }
 0xbbe   : > { %3956 = vrcp.f32 %v2147_v12 }
 0xbc2   : > { %2405 = vrot.lane.b32.xlu1 %v5088_v39, %s4387_s30 }
 0xbc4   : > { %v3957_v13 = vpop.eup %3956 }
 0xbc5   : > { %v2153_v14 = vmul.f32 %v3957_v13, %v3951_v49  ;;  %v2383_v16 = vpop.permute.xlu2 %2382  ;;  %v3752_v13 = vld [vmem:[%s4778_s2 + $0x8] sm:$0xff] }
 0xbc6   : > { %v2388_v41 = vsel %vm1328_vm2, %v2383_v16, 0  ;;  %2371 = vmatpush.bf16.msrb.mxu3 %v3752_v13 }
 0xbc7   : > { %v2155_v2 = vpack.c.bf16 %v2153_v14, %v2153_v14 }
 0xbc9   : > { %3569 = vmatmul.msk.bf16.vlgmr.msrb.gmra.mxu0 %vm1376_vm5, %v2155_v2 }
 0xbca   : > { %2397 = vmatpush.bf16.xpose.msrb.mxu0 %v2388_v41 }
 0xbd9   : > { %3577 = vmatmul.msk.bf16.vlgmr.msra.gmra.mxu0 %vm1328_vm2, %v2264_v50 }
 0xbe9   : > { %3585 = vmatmul.msk.bf16.vlgmr.msrb.gmra.mxu0 %vm1328_vm2, %v2381_v4 }
 0xbfe   : > { %v2150_v22 = vpop.xlane.xlu2 %2149 }
 0xbff   : > { %3958 = vrcp.f32 %v2150_v22 }
 0xc05   : > { %v3959_v17 = vpop.eup %3958 }
 0xc06   : > { %v2154_v60 = vmul.f32 %v3959_v17, %v3953_v63  ;;  %v2404_v27 = vpop.permute.xlu2 %2403 }
 0xc08   : > { %v2156_v25 = vpack.c.bf16 %v2154_v60, %v2154_v60 }
 0xc0a   : > { %3570 = vmatmul.msk.bf16.vlgmr.msrb.gmra.mxu1 %vm1376_vm5, %v2156_v25 }
 0xc1c   : > { %v2302_v19 = vpop.xlane.xlu1 %2301 }
 0xc1d   : > { %3960 = vrcp.f32 %v2302_v19 }
 0xc23   : > { %v3961_v20 = vpop.eup %3960 }
 0xc24   : > { %v2308_v23 = vmul.f32 %v3961_v20, %v3955_v9 }
 0xc26   : > { %v2310_v24 = vpack.c.bf16 %v2308_v23, %v2308_v23 }
 0xc28   : > { %3578 = vmatmul.msk.bf16.vlgmr.msra.gmra.mxu1 %vm1376_vm5, %v2310_v24 }
 0xc34   : > { %v2406_v36 = vpop.permute.xlu1 %2405 }
 0xc35   : > { %v2411_v53 = vsel %vm1328_vm2, %v2406_v36, 0 }
 0xc36   : > { %2420 = vmatpush.bf16.xpose.msrb.mxu1 %v2411_v53 }
 0xc3d   : > { %3586 = vmatmul.msk.bf16.vlgmr.msrb.gmra.mxu1 %vm1328_vm2, %v2404_v27 }
 0xc46   : > { %v2177_v28 = vpop.f32.mrf.mxu0 }
 0xc4e   : > { %v2179_v29 = vpop.f32.mrf.mxu0 }
 0xc56   : > { %v2282_v30 = vpop.f32.mrf.mxu0 }
 0xc57   : > { %v2287_v31 = vsel %vm4916_vm4, %v2282_v30, -1e+30 }
 0xc58   : > { %v2291_v32 = vsel %vm1376_vm5, %v2287_v31, -inf }
 0xc59   : > { %2292 = vmax.xlane.f32.xlu0 %v2291_v32 }
 0xc5e   : > { %v2284_v33 = vpop.f32.mrf.mxu0 }
 0xc66   : > { %v2399_v55 = vpop.f32.mrf.mxu0 }
 0xc67   : > { %v2426_v62 = vsel %vm4916_vm4, %v2399_v55, -1e+30 }
 0xc68   : > { %v2428_v35 = vsel %vm1376_vm5, %v2426_v62, -inf }
 0xc69   : > { %2429 = vmax.xlane.f32.xlu2 %v2428_v35 }
 0xc6d   : > { %2333 = vrot.lane.b32.xlu0 %v5088_v39, %s4384_s11 }
 0xc6e   : > { %v2401_v37 = vpop.f32.mrf.mxu0 }
 0xc75   : > { %2452 = vrot.lane.b32.xlu0 %v5060_v11, %s4386_s19 }
 0xc7d   : > { %2520 = vrot.lane.b32.xlu0 %v5070_v21, %s4389_s5 }
 0xc85   : > { %2543 = vrot.lane.b32.xlu0 %v5075_v26, %s4389_s5 }
 0xc87   : > { %v2201_v38 = vpop.f32.mrf.mxu1 }
 0xc88   : > { %v2205_v40 = vpack.c.bf16 %v2201_v38, %v2177_v28 }
 0xc8a   : > { %3575 = vmatmul.msk.bf16.vlgmr.msra.gmra.mxu2 %vm1328_vm2, %v2205_v40 }
 0xc8f   : > { %v2203_v42 = vpop.f32.mrf.mxu1 }
 0xca5   : > { %v5137_v43 = vpop.f32.mrf.mxu1 }
 0xcad   : > { %v2331_v44 = vpop.f32.mrf.mxu1 }
 0xcba   : > { %v2422_v46 = vpop.f32.mrf.mxu1 }
 0xcbb   : > { %v2427_v47 = vsel %vm4916_vm4, %v2422_v46, -1e+30 }
 0xcbc   : > { %v2431_v48 = vsel %vm1376_vm5, %v2427_v47, -inf }
 0xcbd   : > { %2432 = vmax.xlane.f32.xlu0 %v2431_v48  ;;  %v3906_v48 = vld [vmem:[%s5413_s13] ss:$0 sm:$0xff] }
 0xcc2   : > { %v2424_v49 = vpop.f32.mrf.mxu1 }
 0xccc   : > { %v2293_v21 = vpop.xlane.xlu0 %2292 }
 0xccd   : > { %v2295_v50 = vsub.f32 %v2287_v31, %v2293_v21 }
 0xccf   : > { %v2298_v51 = vmul.f32 1.442695, %v2295_v50 }
 0xcd1   : > { %3962 = vpow2.f32 %v2298_v51 }
 0xcd7   : > { %v3963_v26 = vpop.eup %3962 }
 0xcd8   : > { %v2303_v45 = vsel %vm1376_vm5, %v3963_v26, 0.0 }
 0xcd9   : > { %2304 = vadd.xlane.f32.xlu1 %v2303_v45 }
 0xcdc   : > { %v2430_v52 = vpop.xlane.xlu2 %2429 }
 0xcdd   : > { %v2434_v54 = vsub.f32 %v2426_v62, %v2430_v52 }
 0xcdf   : > { %v2436_v15 = vmul.f32 1.442695, %v2434_v54  ;;  %v2334_v56 = vpop.permute.xlu0 %2333 }
 0xce0   : > { %v2339_v57 = vsel %vm1404_vm3, %v2334_v56, 0 }
 0xce1   : > { %3964 = vpow2.f32 %v2436_v15  ;;  %2348 = vmatpush.bf16.msrb.mxu2 %v2339_v57 }
 0xce7   : > { %v3965_v58 = vpop.eup %3964  ;;  %v2453_v59 = vpop.permute.xlu0 %2452 }
 0xce8   : > { %v2458_v61 = vsel %vm1404_vm3, %v2453_v59, 0  ;;  %v2440_v63 = vsel %vm1376_vm5, %v3965_v58, 0.0 }
 0xce9   : > { %2467 = vmatpush.bf16.msra.mxu2 %v2458_v61  ;;  %2441 = vadd.xlane.f32.xlu2 %v2440_v63 }
 0xcef   : > { %v2521_v3 = vpop.permute.xlu0 %2520 }
 0xcf2   : > { %2522 = vrot.lane.b32.xlu1 %v5060_v11, %s4389_s5 }
 0xcf7   : > { %v2544_v4 = vpop.permute.xlu0 %2543 }
 0xd01   : > { %2545 = vrot.lane.b32.xlu2 %v5088_v39, %s4389_s5 }
 0xd09   : > { %2473 = vrot.lane.b32.xlu2 %v5088_v39, %s4386_s19 }
 0xd0d   : > { %v2224_v53 = vpop.f32.mrf.mxu2 }
 0xd0e   : > { %v2232_v49 = vadd.f32 %v3906_v48, %v2224_v53 }
 0xd15   : > { %v5161_v27 = vpop.f32.mrf.mxu2 }
 0xd16   : > { %v2233_v53 = vadd.f32 %v3906_v48, %v5161_v27 }
 0xd30   : > { %v2433_v6 = vpop.xlane.xlu0 %2432 }
 0xd31   : > { %v2435_v7 = vsub.f32 %v2427_v47, %v2433_v6  ;;  %v3753_v47 = vld [vmem:[%s4778_s2 + $0x10] sm:$0xff] }
 0xd32   : > { %2511 = vmatpush.bf16.msra.mxu0 %v3753_v47 }
 0xd33   : > { %v2438_v8 = vmul.f32 1.442695, %v2435_v7 }
 0xd35   : > { %3966 = vpow2.f32 %v2438_v8 }
 0xd3b   : > { %v3967_v9 = vpop.eup %3966 }
 0xd3c   : > { %v2443_v10 = vsel %vm1376_vm5, %v3967_v9, 0.0 }
 0xd3d   : > { %2444 = vadd.xlane.f32.xlu1 %v2443_v10 }
 0xd4c   : > { %v2305_v12 = vpop.xlane.xlu1 %2304 }
 0xd4d   : > { %3968 = vrcp.f32 %v2305_v12 }
 0xd53   : > { %v3969_v14 = vpop.eup %3968 }
 0xd54   : > { %v2309_v16 = vmul.f32 %v3969_v14, %v3963_v26 }
 0xd56   : > { %v2311_v2 = vpack.c.bf16 %v2309_v16, %v2309_v16 }
 0xd58   : > { %3579 = vmatmul.msk.bf16.vlgmr.msrb.gmra.mxu2 %vm1376_vm5, %v2311_v2 }
 0xd5c   : > { %v2442_v41 = vpop.xlane.xlu2 %2441 }
 0xd5d   : > { %3970 = vrcp.f32 %v2442_v41 }
 0xd63   : > { %v3971_v22 = vpop.eup %3970 }
 0xd64   : > { %v2448_v17 = vmul.f32 %v3971_v22, %v3965_v58  ;;  %v2546_v60 = vpop.permute.xlu2 %2545  ;;  %v2523_v25 = vpop.permute.xlu1 %2522 }
 0xd65   : > { %v2551_v19 = vsel %vm1328_vm2, %v2546_v60, 0  ;;  %v2528_v20 = vsel %vm1328_vm2, %v2523_v25, 0 }
 0xd66   : > { %v2450_v23 = vpack.c.bf16 %v2448_v17, %v2448_v17  ;;  %2537 = vmatpush.bf16.xpose.msra.mxu1 %v2528_v20  ;;  %2560 = vmatpush.bf16.xpose.msrb.mxu2 %v2551_v19 }
 0xd68   : > { %3587 = vmatmul.msk.bf16.vlgmr.msra.gmra.mxu2 %vm1376_vm5, %v2450_v23 }
 0xd6c   : > { %v2474_v24 = vpop.permute.xlu2 %2473 }
 0xd6d   : > { %v2479_v36 = vsel %vm1404_vm3, %v2474_v24, 0  ;;  %3594 = vmatmul.msk.bf16.vlgmr.msra.gmra.mxu1 %vm1328_vm2, %v2521_v3 }
 0xd6e   : > { %2488 = vmatpush.bf16.msra.mxu3 %v2479_v36 }
 0xd78   : > { %3595 = vmatmul.msk.bf16.vlgmr.msrb.gmra.mxu2 %vm1328_vm2, %v2544_v4 }
 0xdb0   : > { %v2445_v29 = vpop.xlane.xlu1 %2444 }
 0xdb1   : > { %3972 = vrcp.f32 %v2445_v29 }
 0xdb7   : > { %v3973_v32 = vpop.eup %3972 }
 0xdb8   : > { %v2449_v33 = vmul.f32 %v3973_v32, %v3967_v9 }
 0xdba   : > { %v2451_v35 = vpack.c.bf16 %v2449_v33, %v2449_v33 }
 0xddb   : > { %v2350_v28 = vpop.f32.mrf.mxu2 }
 0xddc   : > { %v2354_v30 = vpack.c.bf16 %v2350_v28, %v5137_v43 }
 0xdde   : > { %3584 = vmatmul.msk.bf16.vlgmr.msrb.gmra.mxu3 %vm1328_vm2, %v2354_v30 }
 0xde3   : > { %v2352_v31 = vpop.f32.mrf.mxu2 }
 0xdea   : > { %v2539_v55 = vpop.f32.mrf.mxu1 }
 0xdeb   : > { %v2566_v34 = vsel %vm4916_vm4, %v2539_v55, -1e+30  ;;  %v2469_v62 = vpop.f32.mrf.mxu2 }
 0xdec   : > { %v2568_v37 = vsel %vm1376_vm5, %v2566_v34, -inf }
 0xded   : > { %2569 = vmax.xlane.f32.xlu2 %v2568_v37 }
 0xdee   : > { %3588 = vmatmul.msk.bf16.vlgmr.msra.gmra.mxu3 %vm1376_vm5, %v2451_v35 }
 0xdf2   : > { %v2541_v38 = vpop.f32.mrf.mxu1 }
 0xdf3   : > { %v2471_v40 = vpop.f32.mrf.mxu2 }
 0xdfb   : > { %v2562_v42 = vpop.f32.mrf.mxu2 }
 0xdfc   : > { %v2567_v43 = vsel %vm4916_vm4, %v2562_v42, -1e+30 }
 0xdfd   : > { %v2571_v44 = vsel %vm1376_vm5, %v2567_v43, -inf }
 0xdfe   : > { %2572 = vmax.xlane.f32.xlu0 %v2571_v44 }
 0xe03   : > { %v2564_v46 = vpop.f32.mrf.mxu2 }
 0xe05   : > { %2613 = vrot.lane.b32.xlu2 %v5088_v39, %s4388_s6 }
 0xe60   : > { %v2570_v21 = vpop.xlane.xlu2 %2569 }
 0xe61   : > { %v2574_v50 = vsub.f32 %v2566_v34, %v2570_v21  ;;  %v2373_v51 = vpop.f32.mrf.mxu3 }
 0xe62   : > { %v2378_v5 = vadd.f32 %v2373_v51, %v2232_v49 }
 0xe63   : > { %v2576_v26 = vmul.f32 1.442695, %v2574_v50 }
 0xe65   : > { %3974 = vpow2.f32 %v2576_v26 }
 0xe68   : > { %v2614_v45 = vpop.permute.xlu2 %2613 }
 0xe69   : > { %v2619_v52 = vsel %vm1404_vm3, %v2614_v45, 0  ;;  %v2375_v54 = vpop.f32.mrf.mxu3 }
 0xe6a   : > { %2628 = vmatpush.bf16.msrb.mxu0 %v2619_v52  ;;  %v2379_v29 = vadd.f32 %v2375_v54, %v2233_v53 }
 0xe6b   : > { %v3975_v39 = vpop.eup %3974 }
 0xe6c   : > { %v2580_v15 = vsel %vm1376_vm5, %v3975_v39, 0.0 }
 0xe6d   : > { %2581 = vadd.xlane.f32.xlu1 %v2580_v15 }
 0xe71   : > { %v2490_v56 = vpop.f32.mrf.mxu3  ;;  %v2573_v57 = vpop.xlane.xlu0 %2572 }
 0xe72   : > { %v2494_v58 = vpack.c.bf16 %v2490_v56, %v2469_v62  ;;  %v2575_v59 = vsub.f32 %v2567_v43, %v2573_v57 }
 0xe74   : > { %v2578_v61 = vmul.f32 1.442695, %v2575_v59  ;;  %3593 = vmatmul.msk.bf16.vlgmr.msra.gmra.mxu0 %vm1328_vm2, %v2494_v58 }
 0xe76   : > { %3976 = vpow2.f32 %v2578_v61 }
 0xe79   : > { %v2492_v63 = vpop.f32.mrf.mxu3 }
 0xe7c   : > { %v3977_v3 = vpop.eup %3976 }
 0xe7d   : > { %v2583_v4 = vsel %vm1376_vm5, %v3977_v3, 0.0 }
 0xe7e   : > { %2584 = vadd.xlane.f32.xlu0 %v2583_v4 }
 0xe86   : > { %2592 = vrot.lane.b32.xlu1 %v5060_v11, %s4388_s6  ;;  %v3754_v11 = vld [vmem:[%s4778_s2 + $0x18] sm:$0xff]  ;;  %s5414_s2 = sld [smem:[#allocation32_spill]] }
 0xe87   : > { %2651 = vmatpush.bf16.msrb.mxu1 %v3754_v11 }
 0xe8c   : > { %v3629_v44 = vld [vmem:[%s5414_s2 + $0x30] sm:$0xf]  ;;  %v3762_v46 = vld [vmem:[%s5414_s2 + $0x34] sm:$0xf0]  ;;  %v3761_v47 = vld [vmem:[%s5414_s2 + $0x34] sm:$0xf] }
 0xe8d   : > { %v3630_v48 = vor.u32 %v3762_v46, %v3629_v44  ;;  %v3631_v49 = vld [vmem:[%s5414_s2 + $0x38] sm:$0xf0]  ;;  %v3621_v50 = vld [vmem:[%s5414_s2 + $0x20] sm:$0xf]  ;;  %v3760_v51 = vld [vmem:[%s5414_s2 + $0x24] sm:$0xf0] }
 0xe8e   : > { %v3634_v21 = vor.u32 %v3761_v47, %v3631_v49  ;;  %v3622_v26 = vor.u32 %v3760_v51, %v3621_v50  ;;  %v3623_v45 = vld [vmem:[%s5414_s2 + $0x28] sm:$0xf0]  ;;  %v3613_v54 = vld [vmem:[%s5414_s2 + $0x10] sm:$0xf]  ;;  %v3757_v15 = vld [vmem:[%s5414_s2 + $0x14] sm:$0xf] }
 0xe8f   : > { %2780 = vmatpush.bf16.msra.mxu2 %v3630_v48  ;;  %v3615_v57 = vld [vmem:[%s5414_s2 + $0x18] sm:$0xf0]  ;;  %v3605_v63 = vld [vmem:[%s5414_s2] sm:$0xf]  ;;  %v3755_v4 = vld [vmem:[%s5414_s2 + $0x4] sm:$0xf] }
 0xe90   : > { %v3618_v59 = vor.u32 %v3757_v15, %v3615_v57  ;;  %v3774_v44 = vld [vmem:[%s4830_s0 + $0x58] sm:$0xff]  ;;  %v3765_v46 = vld [vmem:[%s4830_s0 + $0x10] sm:$0xff]  ;;  %v3772_v48 = vld [vmem:[%s4830_s0 + $0x48] sm:$0xff] }
 0xe91   : > { %v3773_v47 = vld [vmem:[%s4830_s0 + $0x50] sm:$0xff]  ;;  %v3763_v49 = vld [vmem:[%s4830_s0] sm:$0xff] }
 0xe93   : > { %2781 = vmatpush.bf16.msra.mxu2 %v3622_v26 }
 0xee0   : > { %v2582_v6 = vpop.xlane.xlu1 %2581 }
 0xee1   : > { %3978 = vrcp.f32 %v2582_v6 }
 0xee7   : > { %v3979_v10 = vpop.eup %3978 }
 0xee8   : > { %v2588_v12 = vmul.f32 %v3979_v10, %v3975_v39  ;;  %v3758_v39 = vld [vmem:[%s5414_s2 + $0x14] sm:$0xf0] }
 0xee9   : > { %v3614_v56 = vor.u32 %v3758_v39, %v3613_v54  ;;  %v3770_v10 = vld [vmem:[%s4830_s0 + $0x38] sm:$0xff] }
 0xeea   : > { %v2590_v41 = vpack.c.bf16 %v2588_v12, %v2588_v12  ;;  %v3778_v12 = vld [vmem:[%s4830_s0 + $0x78] sm:$0xff]  ;;  %2942 = vmatpush.bf16.msra.mxu0 %v3770_v10 }
 0xeeb   : > { %2782 = vmatpush.bf16.msra.mxu2 %v3614_v56  ;;  %2956 = vmatpush.bf16.msra.mxu1 %v3778_v12 }
 0xef1   : > { %v2513_v7 = vpop.f32.mrf.mxu0  ;;  %v2585_v8 = vpop.xlane.xlu0 %2584 }
 0xef2   : > { %v2518_v9 = vadd.f32 %v2513_v7, %v2378_v5  ;;  %3980 = vrcp.f32 %v2585_v8  ;;  %v3759_v5 = vld [vmem:[%s5414_s2 + $0x24] sm:$0xf]  ;;  %v3607_v8 = vld [vmem:[%s5414_s2 + $0x8] sm:$0xf0] }
 0xef3   : > { %v3626_v52 = vor.u32 %v3759_v5, %v3623_v45 }
 0xef8   : > { %v3981_v13 = vpop.eup %3980  ;;  %v2593_v14 = vpop.permute.xlu1 %2592 }
 0xef9   : > { %v2589_v16 = vmul.f32 %v3981_v13, %v3977_v3  ;;  %v2598_v2 = vsel %vm1404_vm3, %v2593_v14, 0  ;;  %v2515_v17 = vpop.f32.mrf.mxu0  ;;  %v3756_v3 = vld [vmem:[%s5414_s2 + $0x4] sm:$0xf0] }
 0xefa   : > { %2607 = vmatpush.bf16.msrb.mxu3 %v2598_v2  ;;  %v2519_v31 = vadd.f32 %v2515_v17, %v2379_v29  ;;  %v3606_v7 = vor.u32 %v3756_v3, %v3605_v63  ;;  %v3777_v2 = vld [vmem:[%s4830_s0 + $0x70] sm:$0xff]  ;;  %v3768_v17 = vld [vmem:[%s4830_s0 + $0x28] sm:$0xff] }
 0xefb   : > { %v2591_v22 = vpack.c.bf16 %v2589_v16, %v2589_v16  ;;  %v3769_v16 = vld [vmem:[%s4830_s0 + $0x30] sm:$0xff]  ;;  %2957 = vmatpush.bf16.msra.mxu1 %v3777_v2 }
 0xefc   : > { %2783 = vmatpush.bf16.msra.mxu2 %v3606_v7  ;;  %2943 = vmatpush.bf16.msra.mxu0 %v3769_v16 }
 0xefd   : > { %3596 = vmatmul.msk.bf16.vlgmr.msrb.gmra.mxu3 %vm1376_vm5, %v2590_v41  ;;  %3597 = vmatmul.msk.bf16.vlgmr.msrb.gmra.mxu0 %vm1376_vm5, %v2591_v22 }
 0xefe   : > { %2794 = vmatpush.bf16.msra.mxu3 %v3634_v21  ;;  %v3771_v21 = vld [vmem:[%s4830_s0 + $0x40] sm:$0xff] }
 0xf00   : > { %2944 = vmatpush.bf16.msra.mxu0 %v3768_v17 }
 0xf02   : > { %2795 = vmatpush.bf16.msra.mxu3 %v3626_v52 }
 0xf06   : > { %2796 = vmatpush.bf16.msra.mxu3 %v3618_v59 }
 0xf7a   : > { %v2630_v60 = vpop.f32.mrf.mxu0 }
 0xf80   : > { %v2609_v25 = vpop.f32.mrf.mxu3 }
 0xf81   : > { %v2634_v19 = vpack.c.bf16 %v2630_v60, %v2609_v25  ;;  %v3776_v60 = vld [vmem:[%s4830_s0 + $0x68] sm:$0xff] }
 0xf82   : > { %v2632_v20 = vpop.f32.mrf.mxu0  ;;  %2958 = vmatpush.bf16.msra.mxu1 %v3776_v60 }
 0xf83   : > { %3602 = vmatmul.msk.bf16.vlgmr.msrb.gmra.mxu1 %vm1328_vm2, %v2634_v19  ;;  %v3767_v20 = vld [vmem:[%s4830_s0 + $0x20] sm:$0xff] }
 0xf84   : > { %2945 = vmatpush.bf16.msra.mxu0 %v3767_v20 }
 0xf88   : > { %v2611_v23 = vpop.f32.mrf.mxu3 }
 0xf89   : > { %v3775_v23 = vld [vmem:[%s4830_s0 + $0x60] sm:$0xff] }
 0xf8a   : > { %2959 = vmatpush.bf16.msra.mxu1 %v3775_v23 }
 0xf8e   : > { %2960 = vmatpush.bf16.msra.mxu1 %v3774_v44 }
 0xf92   : > { %2961 = vmatpush.bf16.msra.mxu1 %v3773_v47 }
 0xf96   : > { %2962 = vmatpush.bf16.msra.mxu1 %v3772_v48 }
 0xf9a   : > { %2963 = vmatpush.bf16.msra.mxu1 %v3771_v21 }
0x1000   : > { %v2653_v24 = vpop.f32.mrf.mxu1 }
0x1001   : > { %v2658_v36 = vadd.f32 %v2653_v24, %v2518_v9  ;;  %v3610_v9 = vor.u32 %v3755_v4, %v3607_v8 }
0x1003   : > { %v2660_v28 = vadd.f32 %v2658_v36, %v5050_v0  ;;  %2797 = vmatpush.bf16.msra.mxu3 %v3610_v9 }
0x1005   : > { %v2664_v30 = vsel %vm1274_vm1, %v2660_v28, 0.0 }
0x1006   : > { %2665 = vadd.xlane.f32.xlu0 %v2664_v30 }
0x1008   : > { %v2655_v32 = vpop.f32.mrf.mxu1 }
0x1009   : > { %v2659_v33 = vadd.f32 %v2655_v32, %v2519_v31 }
0x100b   : > { %v2661_v55 = vadd.f32 %v2659_v33, %v5052_v1  ;;  %v3907_v33 = vld [vmem:[%s1194_s25] ss:$0 sm:$0xff]  ;;  %s5417_s25 = sld [smem:[#allocation33_spill]] }
0x100d   : > { %v2667_v34 = vsel %vm1274_vm1, %v2661_v55, 0.0 }
0x100e   : > { %2668 = vadd.xlane.f32.xlu0 %v2667_v34 }
0x1011   : > { %v2727_v50 = vld [vmem:[%s5417_s25] sm:$0x3] }
0x1012   : > { %v2729_v26 = vperm.slane %v2727_v50, 0  ;;  %v2730_v45 = vperm.slane %v2727_v50, 1 }
0x1079   : > { %v2666_v62 = vpop.xlane.xlu0 %2665 }
0x107a   : > { %v2670_v27 = vmul.f32 %v2666_v62, %v5025_v18 }
0x107c   : > { %v5197_v0 = vsub.f32 %v2660_v28, %v2670_v27  ;;  %v3908_v27 = vld [vmem:[%s5416_s10] ss:$0 sm:$0xff] }
0x107e   : > { %v2674_v35 = vmul.f32 %v5197_v0, %v5197_v0 }
0x1080   : > { %v2676_v37 = vsel %vm1274_vm1, %v2674_v35, 0.0 }
0x1081   : > { %2677 = vadd.xlane.f32.xlu0 %v2676_v37  ;;  %v2669_v1 = vpop.xlane.xlu0 %2668 }
0x1082   : > { %v2671_v38 = vmul.f32 %v2669_v1, %v5025_v18 }
0x1084   : > { %v5203_v40 = vsub.f32 %v2661_v55, %v2671_v38 }
0x1086   : > { %v2675_v42 = vmul.f32 %v5203_v40, %v5203_v40 }
0x1088   : > { %v2679_v43 = vsel %vm1274_vm1, %v2675_v42, 0.0 }
0x1089   : > { %2680 = vadd.xlane.f32.xlu1 %v2679_v43 }
0x10f4   : > { %v2678_v58 = vpop.xlane.xlu0 %2677 }
0x10f5   : > { %v2682_v61 = vmul.f32 %v2678_v58, %v5025_v18 }
0x10f7   : > { %v2684_v6 = vadd.f32 1e-05, %v2682_v61 }
0x10f9   : > { %3982 = vrsqrt.f32 %v2684_v6  ;;  %vm2692_vm14 = vweird.f32 %v2684_v6 }
0x10fc   : > { %v2681_v13 = vpop.xlane.xlu1 %2680 }
0x10fd   : > { %v2683_v14 = vmul.f32 %v2681_v13, %v5025_v18 }
0x10ff   : > { %v3983_v41 = vpop.eup %3982  ;;  %v2685_v22 = vadd.f32 1e-05, %v2683_v14 }
0x1100   : > { %v2687_v11 = vmul.f32 %v3983_v41, %v2684_v6  ;;  %vm2693_vm13 = vweird.f32 %v3983_v41  ;;  %v3909_v6 = vld [vmem:[%s1185_s16] ss:$0 sm:$0xff]  ;;  %s5419_s16 = scalar_lea.vmem [#allocation17], %s4755_s7 }
0x1101   : > { %3984 = vrsqrt.f32 %v2685_v22  ;;  %vm2694_vm15 = vmor %vm2692_vm14, %vm2693_vm13  ;;  %vm2702_vm2 = vweird.f32 %v2685_v22 }
0x1102   : > { %v2688_v25 = vmul.f32 %v3983_v41, %v2687_v11 }
0x1104   : > { %v2689_v19 = vmul.f32 0.5, %v2688_v25 }
0x1106   : > { %v2690_v24 = vsub.f32 1.5, %v2689_v19 }
0x1107   : > { %v3985_v36 = vpop.eup %3984 }
0x1108   : > { %v2691_v53 = vmul.f32 %v3983_v41, %v2690_v24  ;;  %v2697_v28 = vmul.f32 %v3985_v36, %v2685_v22  ;;  %vm2703_vm0 = vweird.f32 %v3985_v36 }
0x1109   : > { %vm2704_vm3 = vmor %vm2702_vm2, %vm2703_vm0 }
0x110a   : > { %v2698_v29 = vmul.f32 %v3985_v36, %v2697_v28  ;;  %v2695_v30 = vsel %vm2694_vm15, %v3983_v41, %v2691_v53 }
0x110b   : > { %v2706_v55 = vmul.f32 %v2695_v30, %v5197_v0  ;;  %v3766_v0 = vld [vmem:[%s4830_s0 + $0x18] sm:$0xff] }
0x110c   : > { %v2699_v31 = vmul.f32 0.5, %v2698_v29  ;;  %2946 = vmatpush.bf16.msra.mxu0 %v3766_v0 }
0x110d   : > { %v2711_v35 = vmul.f32 %v3907_v33, %v2706_v55 }
0x110e   : > { %v2700_v32 = vsub.f32 1.5, %v2699_v31 }
0x110f   : > { %v2716_v38 = vadd.f32 %v3908_v27, %v2711_v35 }
0x1110   : > { %v2701_v34 = vmul.f32 %v3985_v36, %v2700_v32  ;;  %2947 = vmatpush.bf16.msra.mxu0 %v3765_v46 }
0x1112   : > { %v2705_v62 = vsel %vm2704_vm3, %v3985_v36, %v2701_v34 }
0x1113   : > { %v2707_v37 = vmul.f32 %v2705_v62, %v5203_v40  ;;  %v3764_v40 = vld [vmem:[%s4830_s0 + $0x8] sm:$0xff] }
0x1114   : > { %2948 = vmatpush.bf16.msra.mxu0 %v3764_v40 }
0x1115   : > { %v2712_v1 = vmul.f32 %v3907_v33, %v2707_v37 }
0x1117   : > { %v2717_v42 = vadd.f32 %v3908_v27, %v2712_v1 }
0x1118   : > { %2949 = vmatpush.bf16.msra.mxu0 %v3763_v49 }
0x1119   : > { %v2718_v43 = vpack.c.bf16 %v2717_v42, %v2716_v38 }
0x111b   : > { %3635 = vmatmul.msk.bf16.vlgmr.msra.gmra.mxu2 %vm1274_vm1, %v2718_v43  ;;  %3636 = vmatmul.msk.bf16.vlgmr.msra.gmra.mxu3 %vm1274_vm1, %v2718_v43  ;;  %v3910_v43 = vld [vmem:[%s5419_s16] ss:$0 sm:$0xff] }
0x119e   : > { %v2785_v51 = vpop.f32.mrf.mxu2  ;;  %v2799_v5 = vpop.f32.mrf.mxu3 }
0x119f   : > { %v2786_v52 = vadd.f32 %v2785_v51, %v2729_v26  ;;  %v2800_v54 = vadd.f32 %v2799_v5, %v2730_v45 }
0x11a1   : > { %v2804_v58 = vmax.f32 %v2786_v52, 0.0  ;;  %v2805_v59 = vmax.f32 %v2800_v54, 0.0 }
0x11a6   : > { %v2787_v39 = vpop.f32.mrf.mxu2  ;;  %v2801_v15 = vpop.f32.mrf.mxu3 }
0x11a7   : > { %v2788_v56 = vadd.f32 %v2787_v39, %v2729_v26  ;;  %v2802_v57 = vadd.f32 %v2801_v15, %v2730_v45 }
0x11a9   : > { %v2806_v61 = vmax.f32 %v2788_v56, 0.0  ;;  %v2807_v63 = vmax.f32 %v2802_v57, 0.0 }
0x11ab   : > { %v2808_v3 = vpack.c.bf16 %v2806_v61, %v2804_v58  ;;  %v2809_v4 = vpack.c.bf16 %v2807_v63, %v2805_v59 }
0x11ad   : > { %2950 = vmatmul.bf16.vlgmr.msra.gmra.mxu0 %v2808_v3  ;;  %2964 = vmatmul.bf16.vlgmr.msra.gmra.mxu1 %v2809_v4 }
0x122a   : > { %v2951_v7 = vpop.f32.mrf.mxu0  ;;  %v2965_v8 = vpop.f32.mrf.mxu1 }
0x122b   : > { %v2952_v9 = vadd.f32 %v3909_v6, %v2951_v7 }
0x122d   : > { %v2966_v10 = vadd.f32 %v2965_v8, %v2952_v9 }
0x122f   : > { %v2970_v12 = vadd.f32 %v2966_v10, %v2716_v38 }
0x1231   : > { %v2974_v13 = vsel %vm1274_vm1, %v2970_v12, 0.0 }
0x1232   : > { %v2953_v14 = vpop.f32.mrf.mxu0  ;;  %2975 = vadd.xlane.f32.xlu2 %v2974_v13  ;;  %v2967_v2 = vpop.f32.mrf.mxu1 }
0x1233   : > { %v2954_v16 = vadd.f32 %v3909_v6, %v2953_v14 }
0x1235   : > { %v2968_v41 = vadd.f32 %v2967_v2, %v2954_v16 }
0x1237   : > { %v2971_v22 = vadd.f32 %v2968_v41, %v2717_v42 }
0x1239   : > { %v2977_v11 = vsel %vm1274_vm1, %v2971_v22, 0.0 }
0x123a   : > { %2978 = vadd.xlane.f32.xlu0 %v2977_v11 }
0x12a5   : > { %v2976_v17 = vpop.xlane.xlu2 %2975 }
0x12a6   : > { %v2980_v60 = vmul.f32 %v2976_v17, %v5025_v18 }
0x12a8   : > { %v2982_v25 = vsub.f32 %v2970_v12, %v2980_v60 }
0x12aa   : > { %v2984_v19 = vmul.f32 %v2982_v25, %v2982_v25 }
0x12ac   : > { %v2986_v20 = vsel %vm1274_vm1, %v2984_v19, 0.0 }
0x12ad   : > { %v2979_v23 = vpop.xlane.xlu0 %2978  ;;  %2987 = vadd.xlane.f32.xlu0 %v2986_v20 }
0x12ae   : > { %v2981_v24 = vmul.f32 %v2979_v23, %v5025_v18 }
0x12b0   : > { %v2983_v36 = vsub.f32 %v2971_v22, %v2981_v24 }
0x12b2   : > { %v2985_v53 = vmul.f32 %v2983_v36, %v2983_v36 }
0x12b4   : > { %v2989_v28 = vsel %vm1274_vm1, %v2985_v53, 0.0 }
0x12b5   : > { %2990 = vadd.xlane.f32.xlu0 %v2989_v28 }
0x1320   : > { %v2988_v29 = vpop.xlane.xlu0 %2987 }
0x1321   : > { %v2992_v30 = vmul.f32 %v2988_v29, %v5025_v18 }
0x1323   : > { %v2994_v31 = vadd.f32 1e-05, %v2992_v30 }
0x1325   : > { %3986 = vrsqrt.f32 %v2994_v31  ;;  %vm3002_vm5 = vweird.f32 %v2994_v31 }
0x1328   : > { %v2991_v32 = vpop.xlane.xlu0 %2990 }
0x1329   : > { %v2993_v33 = vmul.f32 %v2991_v32, %v5025_v18  ;;  %v3911_v18 = vld [vmem:[%s1197_s21] ss:$0 sm:$0xff]  ;;  %s5421_s21 = sld [smem:[#allocation56_spill]] (!%p3701_p7) }
0x132b   : > { %v3987_v55 = vpop.eup %3986  ;;  %v2995_v34 = vadd.f32 1e-05, %v2993_v33 }
0x132c   : > { %v2997_v62 = vmul.f32 %v3987_v55, %v2994_v31  ;;  %vm3003_vm4 = vweird.f32 %v3987_v55 }
0x132d   : > { %3988 = vrsqrt.f32 %v2995_v34  ;;  %vm3004_vm6 = vmor %vm3002_vm5, %vm3003_vm4  ;;  %vm3012_vm8 = vweird.f32 %v2995_v34 }
0x132e   : > { %v2998_v27 = vmul.f32 %v3987_v55, %v2997_v62 }
0x1330   : > { %v2999_v35 = vmul.f32 0.5, %v2998_v27 }
0x1332   : > { %v3000_v37 = vsub.f32 1.5, %v2999_v35 }
0x1333   : > { %v3989_v1 = vpop.eup %3988 }
0x1334   : > { %v3001_v38 = vmul.f32 %v3987_v55, %v3000_v37  ;;  %v3007_v42 = vmul.f32 %v3989_v1, %v2995_v34  ;;  %vm3013_vm7 = vweird.f32 %v3989_v1 }
0x1335   : > { %vm3014_vm9 = vmor %vm3012_vm8, %vm3013_vm7 }
0x1336   : > { %v3005_v0 = vsel %vm3004_vm6, %v3987_v55, %v3001_v38  ;;  %v3008_v44 = vmul.f32 %v3989_v1, %v3007_v42 }
0x1337   : > { %v3016_v46 = vmul.f32 %v3005_v0, %v2982_v25 }
0x1338   : > { %v3009_v47 = vmul.f32 0.5, %v3008_v44 }
0x1339   : > { %v3021_v40 = vmul.f32 %v3910_v43, %v3016_v46 }
0x133a   : > { %v3010_v48 = vsub.f32 1.5, %v3009_v47 }
0x133b   : > { %v3026_v49 = vadd.f32 %v3911_v18, %v3021_v40 }
0x133c   : > { %v3011_v21 = vmul.f32 %v3989_v1, %v3010_v48 }
0x133d   : > { %3028 = vst.msk [vmem:[#allocation2] sm:$0xff] %vm1274_vm1, %v3026_v49 }
0x133e   : > { %v3015_v50 = vsel %vm3014_vm9, %v3989_v1, %v3011_v21 }
0x133f   : > { %v3017_v51 = vmul.f32 %v3015_v50, %v2983_v36 }
0x1341   : > { %v3022_v5 = vmul.f32 %v3910_v43, %v3017_v51  ;;  %3033 = sbr.rel (%p3701_p7) target bundleno = 5087 (0x13df), region = 160 }
0x1343   : > { %v3027_v26 = vadd.f32 %v3911_v18, %v3022_v5 }
0x1345   : > { %3029 = vst.msk [vmem:[#allocation2 + $0x8] sm:$0xff] %vm1274_vm1, %v3027_v26 }
0x1346   : > { %v3782_v45 = vld [vmem:[#allocation18 + $0x18] sm:$0xff]  ;;  %v3781_v52 = vld [vmem:[#allocation18 + $0x10] sm:$0xff]  ;;  %v3780_v54 = vld [vmem:[#allocation18 + $0x8] sm:$0xff]  ;;  %v3034_v15 = vpack.c.bf16 %v3027_v26, %v3026_v49 }
0x1347   : > { %3078 = vmatpush.bf16.msra.mxu0 %v3782_v45  ;;  %v3779_v39 = vld [vmem:[#allocation18] sm:$0xff]  ;;  %v3990_v56 = vld [vmem:[%s5421_s21] ss:$0 sm:$0xff] }
0x134b   : > { %3079 = vmatpush.bf16.msra.mxu0 %v3781_v52 }
0x134f   : > { %3080 = vmatpush.bf16.msra.mxu0 %v3780_v54 }
0x1353   : > { %3081 = vmatpush.bf16.msra.mxu0 %v3779_v39 }
0x1356   : > { %3718 = vmatmul.msk.bf16.vlgmr.msra.gmra.mxu0 %vm1274_vm1, %v3034_v15 }
0x13d3   : > { %v3083_v57 = vpop.f32.mrf.mxu0 }
0x13d4   : > { %v3084_v58 = vadd.f32 %v3990_v56, %v3083_v57 }
0x13d6   : > { %3088 = vst [vmem:[#allocation20] sm:$0xff] %v3084_v58 }
0x13db   : > { %v3085_v59 = vpop.f32.mrf.mxu0 }
0x13dc   : > { %v3086_v61 = vadd.f32 %v3990_v56, %v3085_v59 }
0x13de   : > { %3089 = vst [vmem:[#allocation20 + $0x8] sm:$0xff] %v3086_v61 }
0x13df PF: > { %p3852_p12 = scmp.eq.s32.totalorder %s4641_s24, 1  ;;  %s4391_s5 = smov [#allocation20]  }
0x13e0   : > { %s3095_s29 = sshll.u32 %s4391_s5, 4  ;;  %s5422_s18 = sld [smem:[#allocation57_spill]]  ;;  %s3096_s29 = int_to_ptr.vmem [resolvable:$true] %s3095_s29 }
0x13e1   : > { %s4392_s28 = smov 128   ;;  %s4393_s17 = smov 8  }
0x13e6   : > { %s3097_s8 = sshll.u32 %s5422_s18, 4  ;;  %s3098_s8 = int_to_ptr.hbm [resolvable:$true] %s3097_s8 }
0x13e7   : > { %3812 = dma.vmem_to_hbm [thread:$0]  (%p3852_p12), %s3096_s29, 256, %s3098_s8, [#allocation5], %s4392_s28, %s4392_s28, %s4393_s17  }
0x13e8   : > { %4360 = dma.done.wait (%p3852_p12), [#allocation5], 256  }
0x13e9   : > { %4362 = vsyncadd (%p3852_p12), [#allocation5], 4294967040 }
0x13ea PF: > { %s5423_s25 = sld [smem:[#allocation30_spill]] }
0x13eb   : > { %s5424_s4 = sld [smem:[#allocation28_spill]] }
0x13ec   : > { %s5425_s30 = sld [smem:[#allocation29_spill]] }
0x13ed   : > { %s5426_s24 = sld [smem:[#allocation31_spill]] }
0x13f0   : > { %p45_p1 = scmp.ge.s32.totalorder %s5423_s25, 4  }
0x13f2   :  { %47 = sbr.rel (!%p45_p1) target bundleno = 37 (0x25), region = 285 }
0x13f7   :  { %3114 = vsyncpa [#allocation4], 1 }
0x13f8   :  { %3116 = vsyncpa [#allocation4 + $0x1], 1 }
0x13f9   :  { %3117 = vsyncpa [#allocation7], 1 }
0x13fa   :  { %3119 = vsyncpa [#allocation7 + $0x1], 1 }
0x13fb   :  { %3120 = vsyncpa [#allocation10], 1 }
0x13fc   :  { %3122 = vsyncpa [#allocation10 + $0x1], 1 }
0x13fd   :  { %3123 = vsyncpa [#allocation13], 1 }
0x13fe   :  { %3125 = vsyncpa [#allocation13 + $0x1], 1 }
0x13ff   :  { %3126 = vsyncpa [#allocation16], 1 }
0x1400   :  { %3128 = vsyncpa [#allocation16 + $0x1], 1 }
0x1401   :  { %3129 = vsyncpa [#allocation19], 1 }
0x1402   :  { %3130 = vsyncpa [#allocation5], 1 }
0x1403   :  { %3132 = vsyncpa [#allocation5 + $0x1], 1 }

</bundles_post_ra>
